<compile_context>
chip_gen: v6e
topology: v6e:2x2x1
jax: 0.10.0
libtpu: 0.0.40
codegen_flags: <defaults>
</compile_context>

<pallas_src>
import numpy as np
import jax
import jax.numpy as jnp
from jax.experimental import pallas as pl
from jax.experimental.pallas import tpu as pltpu

PAD = 4            # spatial halo = max padding over the three PSConv2d branches
PARTS = 4
# (dilation, window base offset inside the pad-4 frame) per PSConv2d branch, in
# the SAME order as the branch blocks of the banded conv2 weight:
#   dil=1 : self.conv          (pad=1, dense, PSG-masked)
#   dil=2 : self.gwconv        (pad=2, groups=parts)
#   dil=4 : self.gwconv_shift  (pad=4, groups=parts, half-swap folded into weight)
TAP_PATHS = ((1, 3), (2, 2), (4, 0))
N_ROW_TAPS = 3 * len(TAP_PATHS)     # 9 (branch, kh) banded matmuls


# ----------------------------- fused kernel ----------------------------------
def psbottleneck_kernel(x_ref, w1_ref, w2_ref, w3_ref,
                        s1_ref, b1_ref, s2_ref, b2_ref, s3_ref, b3_ref,
                        o_ref, x1pad_ref):
    """Whole PSBottleneck for one batch element, lane-dense (H, W*C) slabs.

    x_ref   : (1, H, W*Cin)    f32   input slab (also the identity residual)
    w1_ref  : (W*Cin, Wp*C1)   bf16  block-diag conv1 weight, shifted by PAD cols
    w2_ref  : (9, Wp*C1, W*C2) bf16  banded PSConv2d weights, one per (branch,kh)
    w3_ref  : (W*C2, W*Cout)   bf16  block-diag conv3 weight
    s*/b*   : (1, lanes)       f32   folded BatchNorm scale/bias tiled per pixel
                                     (zero in the conv1 halo-column lanes)
    o_ref   : (1, H, W*Cout)   f32   output slab
    x1pad_ref : (Hp, Wp*C1)    bf16  VMEM scratch: conv1 output in a zero halo
    """
    H = x_ref.shape[1]
    Hp = x1pad_ref.shape[0]
    WpC1 = x1pad_ref.shape[1]

    x_f32 = x_ref[0]                                   # (H, W*Cin) f32 residual
    x_bf = x_f32.astype(jnp.bfloat16)

    # ---- conv1 (1x1) + bn1 + relu, written into the interior rows of the
    # zero-padded frame. Halo COLUMNS come out zero because the banded weight
    # and the BN scale/bias are zero in those lanes; only halo ROWS are zeroed.
    y1 = jnp.dot(x_bf, w1_ref[...], preferred_element_type=jnp.float32)
    y1 = jnp.maximum(y1 * s1_ref[...] + b1_ref[...], 0.0)
    x1pad_ref[0:PAD, :] = jnp.zeros((PAD, WpC1), x1pad_ref.dtype)
    x1pad_ref[PAD + H:Hp, :] = jnp.zeros((Hp - PAD - H, WpC1), x1pad_ref.dtype)
    x1pad_ref[PAD:PAD + H, :] = y1.astype(x1pad_ref.dtype)

    # ---- conv2 = PSConv2d: 3 dilated branches x 3 kh rows = 9 banded matmuls.
    # The kw taps are folded into the band structure of w2, so each LHS is just
    # a contiguous row-slice of the padded activation scratch (no im2col).
    acc2 = jnp.zeros((H, w2_ref.shape[2]), jnp.float32)
    j = 0
    for dil, base in TAP_PATHS:
        for kh in range(3):
            row0 = base + kh * dil
            lhs = x1pad_ref[row0:row0 + H, :]                 # (H, Wp*C1) bf16
            acc2 = acc2 + jnp.dot(lhs, w2_ref[j],
                                  preferred_element_type=jnp.float32)
            j += 1
    z = jnp.maximum(acc2 * s2_ref[...] + b2_ref[...], 0.0).astype(jnp.bfloat16)

    # ---- conv3 (1x1) + bn3 + identity residual + relu (lane-dense f32 store)
    y3 = jnp.dot(z, w3_ref[...], preferred_element_type=jnp.float32)
    y3 = y3 * s3_ref[...] + b3_ref[...] + x_f32
    o_ref[0] = jnp.maximum(y3, 0.0)


# ------------------------------- wrappers -------------------------------------
def psbottleneck_forward_slab(x_slab, w1, w2, w3, s1, b1, s2, b2, s3, b3):
    """x_slab: (B, H, W*Cin) f32 lane-dense slab.  Returns (B, H, W*Cout) f32."""
    B, H, WCin = x_slab.shape
    WpC1 = w1.shape[1]
    WC2 = w3.shape[0]
    WCout = w3.shape[1]
    Hp = H + 2 * PAD
    if w2.shape != (N_ROW_TAPS, WpC1, WC2):
        raise ValueError("banded conv2 weight has the wrong shape")
    if WCout != WCin:
        raise ValueError("identity residual requires inplanes == planes*expansion")

    # TODO(synk): for production resolutions (large H), add an H-strip grid axis
    # with a 2*PAD-row halo on the scratch so VMEM scales with the strip height.
    return pl.pallas_call(
        psbottleneck_kernel,
        out_shape=jax.ShapeDtypeStruct((B, H, WCout), jnp.float32),
        grid=(B,),
        in_specs=[
            pl.BlockSpec((1, H, WCin), lambda b: (b, 0, 0)),
            pl.BlockSpec((WCin, WpC1), lambda b: (0, 0)),
            pl.BlockSpec((N_ROW_TAPS, WpC1, WC2), lambda b: (0, 0, 0)),
            pl.BlockSpec((WC2, WCout), lambda b: (0, 0)),
            pl.BlockSpec((1, WpC1), lambda b: (0, 0)),
            pl.BlockSpec((1, WpC1), lambda b: (0, 0)),
            pl.BlockSpec((1, WC2), lambda b: (0, 0)),
            pl.BlockSpec((1, WC2), lambda b: (0, 0)),
            pl.BlockSpec((1, WCout), lambda b: (0, 0)),
            pl.BlockSpec((1, WCout), lambda b: (0, 0)),
        ],
        out_specs=pl.BlockSpec((1, H, WCout), lambda b: (b, 0, 0)),
        scratch_shapes=[pltpu.VMEM((Hp, WpC1), jnp.bfloat16)],
        compiler_params=pltpu.CompilerParams(
            dimension_semantics=("parallel",),          # megacore / v7x 2-TC split
            vmem_limit_bytes=32 * 1024 * 1024),
    )(x_slab, w1, w2, w3, s1, b1, s2, b2, s3, b3)


def psbottleneck_forward(x_nchw, *params):
    """NCHW convenience wrapper around the lane-dense slab interface (in a real
    network the (B, H, W*C) slab would be the block-to-block interface)."""
    B, Cin, H, W = x_nchw.shape
    x_slab = jnp.transpose(x_nchw, (0, 2, 3, 1)).reshape(B, H, W * Cin)
    out_slab = psbottleneck_forward_slab(x_slab, *params)
    Cout = out_slab.shape[2] // W
    return jnp.transpose(out_slab.reshape(B, H, W, Cout), (0, 3, 1, 2))


# ------------------------- parameter construction ----------------------------
def densify_grouped(w, cin, groups):
    """[Cout, Cin//G, kh, kw] grouped conv weight -> dense [Cout, Cin, kh, kw]."""
    w = np.asarray(w, np.float32)
    cout = w.shape[0]
    assert cin % groups == 0 and cout % groups == 0 and w.shape[1] == cin // groups
    cin_g, cout_g = cin // groups, cout // groups
    dense = np.zeros((cout, cin, w.shape[2], w.shape[3]), np.float32)
    for g in range(groups):
        dense[g * cout_g:(g + 1) * cout_g, g * cin_g:(g + 1) * cin_g] = \
            w[g * cout_g:(g + 1) * cout_g]
    return dense


def build_ps_mask(out_channels, in_channels, parts):
    """Exact replica of the mask built in PSConv2d.__init__ (True = zeroed)."""
    assert in_channels % parts == 0 and out_channels % parts == 0
    mask = np.zeros((out_channels, in_channels, 3, 3), np.bool_)
    _in = in_channels // parts
    _out = out_channels // parts
    for i in range(parts):
        mask[i * _out:(i + 1) * _out, i * _in:(i + 1) * _in] = True
        k = (i + parts // 2) % parts
        mask[k * _out:(k + 1) * _out, i * _in:(i + 1) * _in] = True
    return mask


def build_w1_band(w1_oihw, W, pad):
    """1x1 conv -> block-diagonal (W*Cin, (W+2*pad)*C1) matmul weight whose
    output-pixel blocks are shifted right by `pad` (the left spatial halo)."""
    w = np.asarray(w1_oihw, np.float32)[:, :, 0, 0]        # (C1, Cin)
    C1, Cin = w.shape
    Wp = W + 2 * pad
    band = np.zeros((W * Cin, Wp * C1), np.float32)
    for x in range(W):
        band[x * Cin:(x + 1) * Cin, (x + pad) * C1:(x + pad + 1) * C1] = w.T
    return band


def build_w2_bands(w_gw, w_shift, w_conv_masked, cin, W):
    """PSConv2d -> 9 banded (Wp*Cin, W*Cout) matmul weights, one per (branch, kh).
    The 3 kw taps become bands at input-pixel offset w + base + kw*dil."""
    cout = np.asarray(w_gw).shape[0]
    assert cin % 2 == 0, "channel-half-swap fold requires an even channel count"
    d_conv = np.asarray(w_conv_masked, np.float32)         # dense, PSG-masked
    d_gw = densify_grouped(w_gw, cin, PARTS)               # groups=parts -> dense
    d_shift = densify_grouped(w_shift, cin, PARTS)
    perm = (np.arange(cin) + cin // 2) % cin               # half swap (involution)
    d_shift_x = d_shift[:, perm, :, :]                     # fold swap into weight
    Wp = W + 2 * PAD
    bands = np.zeros((N_ROW_TAPS, Wp * cin, W * cout), np.float32)
    j = 0
    for wd, (dil, base) in zip((d_conv, d_gw, d_shift_x), TAP_PATHS):
        for kh in range(3):
            for kw in range(3):
                blk = wd[:, :, kh, kw].T                   # (Cin, Cout)
                for x in range(W):
                    wp = x + base + kw * dil
                    bands[j, wp * cin:(wp + 1) * cin,
                          x * cout:(x + 1) * cout] = blk
            j += 1
    return bands


def build_w3_band(w3_oihw, W):
    """1x1 conv -> block-diagonal (W*C2, W*Cout) matmul weight."""
    w = np.asarray(w3_oihw, np.float32)[:, :, 0, 0]        # (Cout, C2)
    Cout, C2 = w.shape
    band = np.zeros((W * C2, W * Cout), np.float32)
    for x in range(W):
        band[x * C2:(x + 1) * C2, x * Cout:(x + 1) * Cout] = w.T
    return band


def tile_bn(scale, bias, W):
    return (np.tile(np.asarray(scale, np.float32), W),
            np.tile(np.asarray(bias, np.float32), W))


def tile_bn_padded(scale, bias, W, pad):
    c = np.asarray(scale).shape[0]
    Wp = W + 2 * pad
    s = np.zeros(Wp * c, np.float32)
    b = np.zeros(Wp * c, np.float32)
    s[pad * c:(pad + W) * c] = np.tile(np.asarray(scale, np.float32), W)
    b[pad * c:(pad + W) * c] = np.tile(np.asarray(bias, np.float32), W)
    return s, b


# ------------------------------ pure-JAX reference ---------------------------
def _conv_nchw(x, w, pad, dil, groups=1):
    return jax.lax.conv_general_dilated(
        x, w, window_strides=(1, 1), padding=((pad, pad), (pad, pad)),
        rhs_dilation=(dil, dil), feature_group_count=groups,
        dimension_numbers=("NCHW", "OIHW", "NCHW"),
        preferred_element_type=jnp.float32)


def _q(a):  # mirror the kernel's bf16 quantization of activations / weights
    return a.astype(jnp.bfloat16).astype(jnp.float32)


def psbottleneck_reference(x, w1, w_gw, w_shift, w_conv_masked, w3,
                           s1, b1, s2, b2, s3, b3):
    def bn(y, s, b):
        return y * s[None, :, None, None] + b[None, :, None, None]

    y = jnp.maximum(bn(_conv_nchw(_q(x), _q(w1), 0, 1), s1, b1), 0.0)
    y = _q(y)
    # PSConv2d forward (dilation=2): gwconv + masked conv + gwconv_shift(x_merge)
    y1, y2 = jnp.split(y, 2, axis=1)
    y_merge = jnp.concatenate([y2, y1], axis=1)
    z = (_conv_nchw(y, _q(w_gw), 2, 2, PARTS)
         + _conv_nchw(y, _q(w_conv_masked), 1, 1, 1)
         + _conv_nchw(y_merge, _q(w_shift), 4, 4, PARTS))
    z = jnp.maximum(bn(z, s2, b2), 0.0)
    z = _q(z)
    o = bn(_conv_nchw(z, _q(w3), 0, 1), s3, b3) + x
    return jnp.maximum(o, 0.0)


# ---------------------------------- main --------------------------------------
if __name__ == "__main__":
    # PSBottleneck(inplanes=64, planes=16): first_planes = width = 16,
    # outplanes = 64, conv2 = PSConv2d(16, 16, k=3, s=1, pad=1, dil=2, parts=4).
    B, H, W = 2, 16, 16
    inplanes, planes = 64, 16
    width = planes                      # cardinality=1, base_width=64
    first_planes = width
    outplanes = planes * 4
    assert inplanes == outplanes
    assert first_planes % (2 * PARTS) == 0

    key = jax.random.PRNGKey(0)
    ks = jax.random.split(key, 9)

    x = jax.random.normal(ks[0], (B, inplanes, H, W), jnp.float32)

    # PyTorch-layout (OIHW) conv weights, bias=False everywhere
    w1 = jax.random.normal(ks[1], (first_planes, inplanes, 1, 1), jnp.float32) * 0.1
    w_gw = jax.random.normal(ks[2], (width, first_planes // PARTS, 3, 3), jnp.float32) * 0.1
    w_shift = jax.random.normal(ks[3], (width, first_planes // PARTS, 3, 3), jnp.float32) * 0.1
    w_conv = jax.random.normal(ks[4], (width, first_planes, 3, 3), jnp.float32) * 0.1
    w3 = jax.random.normal(ks[5], (outplanes, width, 1, 1), jnp.float32) * 0.1

    mask = build_ps_mask(width, first_planes, PARTS)
    w_conv_masked = jnp.where(jnp.asarray(mask), 0.0, w_conv)   # conv.weight[mask]=0

    # inference-mode BatchNorm folded into per-channel scale/bias
    def bn_scale_bias(k, c):
        k1, k2, k3, k4 = jax.random.split(k, 4)
        gamma = 1.0 + 0.1 * jax.random.normal(k1, (c,), jnp.float32)
        beta = 0.1 * jax.random.normal(k2, (c,), jnp.float32)
        mean = 0.1 * jax.random.normal(k3, (c,), jnp.float32)
        var = jax.random.uniform(k4, (c,), jnp.float32, 0.5, 1.5)
        scale = gamma / jnp.sqrt(var + 1e-5)
        return scale, beta - mean * scale

    s1, b1 = bn_scale_bias(ks[6], first_planes)
    s2, b2 = bn_scale_bias(ks[7], width)
    s3, b3 = bn_scale_bias(ks[8], outplanes)

    # ---- kernel-side parameters: banded/block-diag bf16 matmul weights and
    # BN folded into f32 (1, lanes) rows tiled per pixel (zero on halo lanes).
    # TODO(synk): the banded weights bake in the spatial width W; a production
    # deployment would rebuild (or strip-tile) them per input resolution.
    w1_k = jnp.asarray(build_w1_band(w1, W, PAD), jnp.bfloat16)           # (W*Cin, Wp*C1)
    w2_k = jnp.asarray(build_w2_bands(w_gw, w_shift, w_conv_masked,
                                      first_planes, W), jnp.bfloat16)     # (9, Wp*C1, W*C2)
    w3_k = jnp.asarray(build_w3_band(w3, W), jnp.bfloat16)                # (W*C2, W*Cout)

    s1t, b1t = tile_bn_padded(s1, b1, W, PAD)
    s2t, b2t = tile_bn(s2, b2, W)
    s3t, b3t = tile_bn(s3, b3, W)
    row = lambda v: jnp.asarray(v, jnp.float32).reshape(1, -1)

    fwd = jax.jit(psbottleneck_forward)
    out = fwd(x, w1_k, w2_k, w3_k,
              row(s1t), row(b1t), row(s2t), row(b2t), row(s3t), row(b3t))
    out = jax.block_until_ready(out)

    ref = psbottleneck_reference(x, w1, w_gw, w_shift, w_conv_masked, w3,
                                 s1, b1, s2, b2, s3, b3)
    ref = jax.block_until_ready(ref)

    # TODO(synk): training-mode BatchNorm statistics, the conv-weight gradient
    # mask hook, and the optional downsample/SE/aa/drop branches (all disabled
    # under PSBottleneck defaults) are not translated.
    np.testing.assert_allclose(np.asarray(out), np.asarray(ref),
                               rtol=1e-2, atol=1e-2)
    print("KERNEL_OK")
</pallas_src>

<mosaic_0001>
module attributes {stable_mosaic.version = 11 : i64} {
  func.func @psbottleneck_kernel(%arg0: i32, %arg1: memref<1x16x1024xf32, #tpu.memory_space<vmem>>, %arg2: memref<1024x384xbf16, #tpu.memory_space<vmem>>, %arg3: memref<9x384x256xbf16, #tpu.memory_space<vmem>>, %arg4: memref<256x1024xbf16, #tpu.memory_space<vmem>>, %arg5: memref<1x384xf32, #tpu.memory_space<vmem>>, %arg6: memref<1x384xf32, #tpu.memory_space<vmem>>, %arg7: memref<1x256xf32, #tpu.memory_space<vmem>>, %arg8: memref<1x256xf32, #tpu.memory_space<vmem>>, %arg9: memref<1x1024xf32, #tpu.memory_space<vmem>>, %arg10: memref<1x1024xf32, #tpu.memory_space<vmem>>, %arg11: memref<1x16x1024xf32, #tpu.memory_space<vmem>>, %arg12: memref<24x384xbf16, #tpu.memory_space<vmem>>) attributes {dimension_semantics = [#tpu.dimension_semantics<parallel>], iteration_bounds = array<i64: 2>, scalar_prefetch = 0 : i64, scratch_operands = 1 : i64, tpu.core_type = #tpu.core_type<tc>, window_params = [{transform_indices = @transform_0, window_bounds = array<i64: 1, 16, 1024>}, {pipeline_mode = #tpu.pipeline_mode<synchronous>, transform_indices = @transform_1, window_bounds = array<i64: 1024, 384>}, {pipeline_mode = #tpu.pipeline_mode<synchronous>, transform_indices = @transform_2, window_bounds = array<i64: 9, 384, 256>}, {pipeline_mode = #tpu.pipeline_mode<synchronous>, transform_indices = @transform_3, window_bounds = array<i64: 256, 1024>}, {pipeline_mode = #tpu.pipeline_mode<synchronous>, transform_indices = @transform_4, window_bounds = array<i64: 1, 384>}, {pipeline_mode = #tpu.pipeline_mode<synchronous>, transform_indices = @transform_5, window_bounds = array<i64: 1, 384>}, {pipeline_mode = #tpu.pipeline_mode<synchronous>, transform_indices = @transform_6, window_bounds = array<i64: 1, 256>}, {pipeline_mode = #tpu.pipeline_mode<synchronous>, transform_indices = @transform_7, window_bounds = array<i64: 1, 256>}, {pipeline_mode = #tpu.pipeline_mode<synchronous>, transform_indices = @transform_8, window_bounds = array<i64: 1, 1024>}, {pipeline_mode = #tpu.pipeline_mode<synchronous>, transform_indices = @transform_9, window_bounds = array<i64: 1, 1024>}, {transform_indices = @transform_10, window_bounds = array<i64: 1, 16, 1024>}]} {
    %c0 = arith.constant 0 : index
    %c0_0 = arith.constant 0 : index
    %c0_1 = arith.constant 0 : index
    %0 = vector.load %arg1[%c0, %c0_0, %c0_1] : memref<1x16x1024xf32, #tpu.memory_space<vmem>>, vector<1x16x1024xf32>
    %1 = vector.shape_cast %0 : vector<1x16x1024xf32> to vector<16x1024xf32>
    %2 = arith.truncf %1 : vector<16x1024xf32> to vector<16x1024xbf16>
    %c0_2 = arith.constant 0 : index
    %c0_3 = arith.constant 0 : index
    %3 = vector.load %arg2[%c0_2, %c0_3] : memref<1024x384xbf16, #tpu.memory_space<vmem>>, vector<1024x384xbf16>
    %cst = arith.constant dense<0.000000e+00> : vector<16x384xf32>
    %4 = tpu.matmul %2, %3, %cst {dimension_numbers = #tpu.dot_dimension_numbers<[1], [0], [0], [1], [0, 0, 1, 1], [], []>} : vector<16x1024xbf16>, vector<1024x384xbf16>, vector<16x384xf32> -> vector<16x384xf32>
    %c0_4 = arith.constant 0 : index
    %c0_5 = arith.constant 0 : index
    %5 = vector.load %arg5[%c0_4, %c0_5] : memref<1x384xf32, #tpu.memory_space<vmem>>, vector<1x384xf32>
    %6 = vector.broadcast %5 : vector<1x384xf32> to vector<16x384xf32>
    %7 = arith.mulf %4, %6 : vector<16x384xf32>
    %c0_6 = arith.constant 0 : index
    %c0_7 = arith.constant 0 : index
    %8 = vector.load %arg6[%c0_6, %c0_7] : memref<1x384xf32, #tpu.memory_space<vmem>>, vector<1x384xf32>
    %9 = vector.broadcast %8 : vector<1x384xf32> to vector<16x384xf32>
    %10 = arith.addf %7, %9 : vector<16x384xf32>
    %cst_8 = arith.constant 0.000000e+00 : f32
    %11 = vector.broadcast %cst_8 : f32 to vector<16x384xf32>
    %12 = arith.maximumf %10, %11 : vector<16x384xf32>
    %cst_9 = arith.constant 0.000000e+00 : bf16
    %13 = vector.broadcast %cst_9 : bf16 to vector<4x384xbf16>
    %c0_10 = arith.constant 0 : index
    %c0_11 = arith.constant 0 : index
    %14 = vector.load %arg12[%c0_10, %c0_11] : memref<24x384xbf16, #tpu.memory_space<vmem>>, vector<4x384xbf16>
    tpu.vector_store %arg12[%c0_10, %c0_11], %13 {strides = array<i32>} : memref<24x384xbf16, #tpu.memory_space<vmem>>, vector<4x384xbf16>,
    %cst_12 = arith.constant 0.000000e+00 : bf16
    %15 = vector.broadcast %cst_12 : bf16 to vector<4x384xbf16>
    %c20 = arith.constant 20 : index
    %c0_13 = arith.constant 0 : index
    %16 = vector.load %arg12[%c20, %c0_13] : memref<24x384xbf16, #tpu.memory_space<vmem>>, vector<4x384xbf16>
    tpu.vector_store %arg12[%c20, %c0_13], %15 {strides = array<i32>} : memref<24x384xbf16, #tpu.memory_space<vmem>>, vector<4x384xbf16>,
    %17 = arith.truncf %12 : vector<16x384xf32> to vector<16x384xbf16>
    %c4 = arith.constant 4 : index
    %c0_14 = arith.constant 0 : index
    %18 = vector.load %arg12[%c4, %c0_14] : memref<24x384xbf16, #tpu.memory_space<vmem>>, vector<16x384xbf16>
    tpu.vector_store %arg12[%c4, %c0_14], %17 {strides = array<i32>} : memref<24x384xbf16, #tpu.memory_space<vmem>>, vector<16x384xbf16>,
    %cst_15 = arith.constant 0.000000e+00 : f32
    %19 = vector.broadcast %cst_15 : f32 to vector<16x256xf32>
    %c3 = arith.constant 3 : index
    %c0_16 = arith.constant 0 : index
    %20 = vector.load %arg12[%c3, %c0_16] : memref<24x384xbf16, #tpu.memory_space<vmem>>, vector<16x384xbf16>
    %c0_17 = arith.constant 0 : index
    %c0_18 = arith.constant 0 : index
    %c0_19 = arith.constant 0 : index
    %21 = vector.load %arg3[%c0_17, %c0_18, %c0_19] : memref<9x384x256xbf16, #tpu.memory_space<vmem>>, vector<1x384x256xbf16>
    %22 = vector.shape_cast %21 : vector<1x384x256xbf16> to vector<384x256xbf16>
    %cst_20 = arith.constant dense<0.000000e+00> : vector<16x256xf32>
    %23 = tpu.matmul %20, %22, %cst_20 {dimension_numbers = #tpu.dot_dimension_numbers<[1], [0], [0], [1], [0, 0, 1, 1], [], []>} : vector<16x384xbf16>, vector<384x256xbf16>, vector<16x256xf32> -> vector<16x256xf32>
    %24 = arith.addf %19, %23 : vector<16x256xf32>
    %c4_21 = arith.constant 4 : index
    %c0_22 = arith.constant 0 : index
    %25 = vector.load %arg12[%c4_21, %c0_22] : memref<24x384xbf16, #tpu.memory_space<vmem>>, vector<16x384xbf16>
    %c1 = arith.constant 1 : index
    %c0_23 = arith.constant 0 : index
    %c0_24 = arith.constant 0 : index
    %26 = vector.load %arg3[%c1, %c0_23, %c0_24] : memref<9x384x256xbf16, #tpu.memory_space<vmem>>, vector<1x384x256xbf16>
    %27 = vector.shape_cast %26 : vector<1x384x256xbf16> to vector<384x256xbf16>
    %cst_25 = arith.constant dense<0.000000e+00> : vector<16x256xf32>
    %28 = tpu.matmul %25, %27, %cst_25 {dimension_numbers = #tpu.dot_dimension_numbers<[1], [0], [0], [1], [0, 0, 1, 1], [], []>} : vector<16x384xbf16>, vector<384x256xbf16>, vector<16x256xf32> -> vector<16x256xf32>
    %29 = arith.addf %24, %28 : vector<16x256xf32>
    %c5 = arith.constant 5 : index
    %c0_26 = arith.constant 0 : index
    %30 = vector.load %arg12[%c5, %c0_26] : memref<24x384xbf16, #tpu.memory_space<vmem>>, vector<16x384xbf16>
    %c2 = arith.constant 2 : index
    %c0_27 = arith.constant 0 : index
    %c0_28 = arith.constant 0 : index
    %31 = vector.load %arg3[%c2, %c0_27, %c0_28] : memref<9x384x256xbf16, #tpu.memory_space<vmem>>, vector<1x384x256xbf16>
    %32 = vector.shape_cast %31 : vector<1x384x256xbf16> to vector<384x256xbf16>
    %cst_29 = arith.constant dense<0.000000e+00> : vector<16x256xf32>
    %33 = tpu.matmul %30, %32, %cst_29 {dimension_numbers = #tpu.dot_dimension_numbers<[1], [0], [0], [1], [0, 0, 1, 1], [], []>} : vector<16x384xbf16>, vector<384x256xbf16>, vector<16x256xf32> -> vector<16x256xf32>
    %34 = arith.addf %29, %33 : vector<16x256xf32>
    %c2_30 = arith.constant 2 : index
    %c0_31 = arith.constant 0 : index
    %35 = vector.load %arg12[%c2_30, %c0_31] : memref<24x384xbf16, #tpu.memory_space<vmem>>, vector<16x384xbf16>
    %c3_32 = arith.constant 3 : index
    %c0_33 = arith.constant 0 : index
    %c0_34 = arith.constant 0 : index
    %36 = vector.load %arg3[%c3_32, %c0_33, %c0_34] : memref<9x384x256xbf16, #tpu.memory_space<vmem>>, vector<1x384x256xbf16>
    %37 = vector.shape_cast %36 : vector<1x384x256xbf16> to vector<384x256xbf16>
    %cst_35 = arith.constant dense<0.000000e+00> : vector<16x256xf32>
    %38 = tpu.matmul %35, %37, %cst_35 {dimension_numbers = #tpu.dot_dimension_numbers<[1], [0], [0], [1], [0, 0, 1, 1], [], []>} : vector<16x384xbf16>, vector<384x256xbf16>, vector<16x256xf32> -> vector<16x256xf32>
    %39 = arith.addf %34, %38 : vector<16x256xf32>
    %c4_36 = arith.constant 4 : index
    %c0_37 = arith.constant 0 : index
    %40 = vector.load %arg12[%c4_36, %c0_37] : memref<24x384xbf16, #tpu.memory_space<vmem>>, vector<16x384xbf16>
    %c4_38 = arith.constant 4 : index
    %c0_39 = arith.constant 0 : index
    %c0_40 = arith.constant 0 : index
    %41 = vector.load %arg3[%c4_38, %c0_39, %c0_40] : memref<9x384x256xbf16, #tpu.memory_space<vmem>>, vector<1x384x256xbf16>
    %42 = vector.shape_cast %41 : vector<1x384x256xbf16> to vector<384x256xbf16>
    %cst_41 = arith.constant dense<0.000000e+00> : vector<16x256xf32>
    %43 = tpu.matmul %40, %42, %cst_41 {dimension_numbers = #tpu.dot_dimension_numbers<[1], [0], [0], [1], [0, 0, 1, 1], [], []>} : vector<16x384xbf16>, vector<384x256xbf16>, vector<16x256xf32> -> vector<16x256xf32>
    %44 = arith.addf %39, %43 : vector<16x256xf32>
    %c6 = arith.constant 6 : index
    %c0_42 = arith.constant 0 : index
    %45 = vector.load %arg12[%c6, %c0_42] : memref<24x384xbf16, #tpu.memory_space<vmem>>, vector<16x384xbf16>
    %c5_43 = arith.constant 5 : index
    %c0_44 = arith.constant 0 : index
    %c0_45 = arith.constant 0 : index
    %46 = vector.load %arg3[%c5_43, %c0_44, %c0_45] : memref<9x384x256xbf16, #tpu.memory_space<vmem>>, vector<1x384x256xbf16>
    %47 = vector.shape_cast %46 : vector<1x384x256xbf16> to vector<384x256xbf16>
    %cst_46 = arith.constant dense<0.000000e+00> : vector<16x256xf32>
    %48 = tpu.matmul %45, %47, %cst_46 {dimension_numbers = #tpu.dot_dimension_numbers<[1], [0], [0], [1], [0, 0, 1, 1], [], []>} : vector<16x384xbf16>, vector<384x256xbf16>, vector<16x256xf32> -> vector<16x256xf32>
    %49 = arith.addf %44, %48 : vector<16x256xf32>
    %c0_47 = arith.constant 0 : index
    %c0_48 = arith.constant 0 : index
    %50 = vector.load %arg12[%c0_47, %c0_48] : memref<24x384xbf16, #tpu.memory_space<vmem>>, vector<16x384xbf16>
    %c6_49 = arith.constant 6 : index
    %c0_50 = arith.constant 0 : index
    %c0_51 = arith.constant 0 : index
    %51 = vector.load %arg3[%c6_49, %c0_50, %c0_51] : memref<9x384x256xbf16, #tpu.memory_space<vmem>>, vector<1x384x256xbf16>
    %52 = vector.shape_cast %51 : vector<1x384x256xbf16> to vector<384x256xbf16>
    %cst_52 = arith.constant dense<0.000000e+00> : vector<16x256xf32>
    %53 = tpu.matmul %50, %52, %cst_52 {dimension_numbers = #tpu.dot_dimension_numbers<[1], [0], [0], [1], [0, 0, 1, 1], [], []>} : vector<16x384xbf16>, vector<384x256xbf16>, vector<16x256xf32> -> vector<16x256xf32>
    %54 = arith.addf %49, %53 : vector<16x256xf32>
    %c4_53 = arith.constant 4 : index
    %c0_54 = arith.constant 0 : index
    %55 = vector.load %arg12[%c4_53, %c0_54] : memref<24x384xbf16, #tpu.memory_space<vmem>>, vector<16x384xbf16>
    %c7 = arith.constant 7 : index
    %c0_55 = arith.constant 0 : index
    %c0_56 = arith.constant 0 : index
    %56 = vector.load %arg3[%c7, %c0_55, %c0_56] : memref<9x384x256xbf16, #tpu.memory_space<vmem>>, vector<1x384x256xbf16>
    %57 = vector.shape_cast %56 : vector<1x384x256xbf16> to vector<384x256xbf16>
    %cst_57 = arith.constant dense<0.000000e+00> : vector<16x256xf32>
    %58 = tpu.matmul %55, %57, %cst_57 {dimension_numbers = #tpu.dot_dimension_numbers<[1], [0], [0], [1], [0, 0, 1, 1], [], []>} : vector<16x384xbf16>, vector<384x256xbf16>, vector<16x256xf32> -> vector<16x256xf32>
    %59 = arith.addf %54, %58 : vector<16x256xf32>
    %c8 = arith.constant 8 : index
    %c0_58 = arith.constant 0 : index
    %60 = vector.load %arg12[%c8, %c0_58] : memref<24x384xbf16, #tpu.memory_space<vmem>>, vector<16x384xbf16>
    %c8_59 = arith.constant 8 : index
    %c0_60 = arith.constant 0 : index
    %c0_61 = arith.constant 0 : index
    %61 = vector.load %arg3[%c8_59, %c0_60, %c0_61] : memref<9x384x256xbf16, #tpu.memory_space<vmem>>, vector<1x384x256xbf16>
    %62 = vector.shape_cast %61 : vector<1x384x256xbf16> to vector<384x256xbf16>
    %cst_62 = arith.constant dense<0.000000e+00> : vector<16x256xf32>
    %63 = tpu.matmul %60, %62, %cst_62 {dimension_numbers = #tpu.dot_dimension_numbers<[1], [0], [0], [1], [0, 0, 1, 1], [], []>} : vector<16x384xbf16>, vector<384x256xbf16>, vector<16x256xf32> -> vector<16x256xf32>
    %64 = arith.addf %59, %63 : vector<16x256xf32>
    %c0_63 = arith.constant 0 : index
    %c0_64 = arith.constant 0 : index
    %65 = vector.load %arg7[%c0_63, %c0_64] : memref<1x256xf32, #tpu.memory_space<vmem>>, vector<1x256xf32>
    %66 = vector.broadcast %65 : vector<1x256xf32> to vector<16x256xf32>
    %67 = arith.mulf %64, %66 : vector<16x256xf32>
    %c0_65 = arith.constant 0 : index
    %c0_66 = arith.constant 0 : index
    %68 = vector.load %arg8[%c0_65, %c0_66] : memref<1x256xf32, #tpu.memory_space<vmem>>, vector<1x256xf32>
    %69 = vector.broadcast %68 : vector<1x256xf32> to vector<16x256xf32>
    %70 = arith.addf %67, %69 : vector<16x256xf32>
    %cst_67 = arith.constant 0.000000e+00 : f32
    %71 = vector.broadcast %cst_67 : f32 to vector<16x256xf32>
    %72 = arith.maximumf %70, %71 : vector<16x256xf32>
    %73 = arith.truncf %72 : vector<16x256xf32> to vector<16x256xbf16>
    %c0_68 = arith.constant 0 : index
    %c0_69 = arith.constant 0 : index
    %74 = vector.load %arg4[%c0_68, %c0_69] : memref<256x1024xbf16, #tpu.memory_space<vmem>>, vector<256x1024xbf16>
    %cst_70 = arith.constant dense<0.000000e+00> : vector<16x1024xf32>
    %75 = tpu.matmul %73, %74, %cst_70 {dimension_numbers = #tpu.dot_dimension_numbers<[1], [0], [0], [1], [0, 0, 1, 1], [], []>} : vector<16x256xbf16>, vector<256x1024xbf16>, vector<16x1024xf32> -> vector<16x1024xf32>
    %c0_71 = arith.constant 0 : index
    %c0_72 = arith.constant 0 : index
    %76 = vector.load %arg9[%c0_71, %c0_72] : memref<1x1024xf32, #tpu.memory_space<vmem>>, vector<1x1024xf32>
    %77 = vector.broadcast %76 : vector<1x1024xf32> to vector<16x1024xf32>
    %78 = arith.mulf %75, %77 : vector<16x1024xf32>
    %c0_73 = arith.constant 0 : index
    %c0_74 = arith.constant 0 : index
    %79 = vector.load %arg10[%c0_73, %c0_74] : memref<1x1024xf32, #tpu.memory_space<vmem>>, vector<1x1024xf32>
    %80 = vector.broadcast %79 : vector<1x1024xf32> to vector<16x1024xf32>
    %81 = arith.addf %78, %80 : vector<16x1024xf32>
    %82 = arith.addf %81, %1 : vector<16x1024xf32>
    %cst_75 = arith.constant 0.000000e+00 : f32
    %83 = vector.broadcast %cst_75 : f32 to vector<16x1024xf32>
    %84 = arith.maximumf %82, %83 : vector<16x1024xf32>
    %c0_76 = arith.constant 0 : index
    %c0_77 = arith.constant 0 : index
    %c0_78 = arith.constant 0 : index
    %85 = vector.load %arg11[%c0_76, %c0_77, %c0_78] : memref<1x16x1024xf32, #tpu.memory_space<vmem>>, vector<1x16x1024xf32>
    %86 = vector.shape_cast %85 : vector<1x16x1024xf32> to vector<16x1024xf32>
    %87 = vector.shape_cast %84 : vector<16x1024xf32> to vector<1x16x1024xf32>
    tpu.vector_store %arg11[%c0_76, %c0_77, %c0_78], %87 {strides = array<i32>} : memref<1x16x1024xf32, #tpu.memory_space<vmem>>, vector<1x16x1024xf32>,
    return
  }
  func.func @transform_0(%arg0: i32) -> (i32, i32, i32) {
    %c0_i32 = arith.constant 0 : i32
    %c0_i32_0 = arith.constant 0 : i32
    %c0_i32_1 = arith.constant 0 : i32
    return %arg0, %c0_i32, %c0_i32_0 : i32, i32, i32
  }
  func.func @transform_1(%arg0: i32) -> (i32, i32) {
    %c0_i32 = arith.constant 0 : i32
    %c0_i32_0 = arith.constant 0 : i32
    %c0_i32_1 = arith.constant 0 : i32
    return %c0_i32, %c0_i32_0 : i32, i32
  }
  func.func @transform_2(%arg0: i32) -> (i32, i32, i32) {
    %c0_i32 = arith.constant 0 : i32
    %c0_i32_0 = arith.constant 0 : i32
    %c0_i32_1 = arith.constant 0 : i32
    %c0_i32_2 = arith.constant 0 : i32
    return %c0_i32, %c0_i32_0, %c0_i32_1 : i32, i32, i32
  }
  func.func @transform_3(%arg0: i32) -> (i32, i32) {
    %c0_i32 = arith.constant 0 : i32
    %c0_i32_0 = arith.constant 0 : i32
    %c0_i32_1 = arith.constant 0 : i32
    return %c0_i32, %c0_i32_0 : i32, i32
  }
  func.func @transform_4(%arg0: i32) -> (i32, i32) {
    %c0_i32 = arith.constant 0 : i32
    %c0_i32_0 = arith.constant 0 : i32
    %c0_i32_1 = arith.constant 0 : i32
    return %c0_i32, %c0_i32_0 : i32, i32
  }
  func.func @transform_5(%arg0: i32) -> (i32, i32) {
    %c0_i32 = arith.constant 0 : i32
    %c0_i32_0 = arith.constant 0 : i32
    %c0_i32_1 = arith.constant 0 : i32
    return %c0_i32, %c0_i32_0 : i32, i32
  }
  func.func @transform_6(%arg0: i32) -> (i32, i32) {
    %c0_i32 = arith.constant 0 : i32
    %c0_i32_0 = arith.constant 0 : i32
    %c0_i32_1 = arith.constant 0 : i32
    return %c0_i32, %c0_i32_0 : i32, i32
  }
  func.func @transform_7(%arg0: i32) -> (i32, i32) {
    %c0_i32 = arith.constant 0 : i32
    %c0_i32_0 = arith.constant 0 : i32
    %c0_i32_1 = arith.constant 0 : i32
    return %c0_i32, %c0_i32_0 : i32, i32
  }
  func.func @transform_8(%arg0: i32) -> (i32, i32) {
    %c0_i32 = arith.constant 0 : i32
    %c0_i32_0 = arith.constant 0 : i32
    %c0_i32_1 = arith.constant 0 : i32
    return %c0_i32, %c0_i32_0 : i32, i32
  }
  func.func @transform_9(%arg0: i32) -> (i32, i32) {
    %c0_i32 = arith.constant 0 : i32
    %c0_i32_0 = arith.constant 0 : i32
    %c0_i32_1 = arith.constant 0 : i32
    return %c0_i32, %c0_i32_0 : i32, i32
  }
  func.func @transform_10(%arg0: i32) -> (i32, i32, i32) {
    %c0_i32 = arith.constant 0 : i32
    %c0_i32_0 = arith.constant 0 : i32
    %c0_i32_1 = arith.constant 0 : i32
    return %arg0, %c0_i32, %c0_i32_0 : i32, i32, i32
  }
}

</mosaic_0001>

<bundles_post_ra>
// kernel: psbottleneck_forward.1
= control target key start
LH: loop header
LB: loop body
LE: loop exit
PB: predicated region body
PF: predicated region fallthrough
CT: control target
= control target key end

     0   :  { %15 = vsyncpa [#allocation4], 0  ;;  %s9934_s0 = inlined_call_operand.vmem [shape: f32[2,16,1024], index: 0, kind: input, shape index: {}]   ;;  %s9935_s1 = inlined_call_operand.hbm [shape: bf16[1024,384], index: 1, kind: input, shape index: {}]   ;;  %s9936_s2 = inlined_call_operand.hbm [shape: bf16[9,384,256], index: 2, kind: input, shape index: {}]   ;;  %s9937_s3 = inlined_call_operand.hbm [shape: bf16[256,1024], index: 3, kind: input, shape index: {}]   ;;  %s9938_s4 = inlined_call_operand.hbm [shape: f32[1,384], index: 4, kind: input, shape index: {}]   ;;  %s9939_s5 = inlined_call_operand.hbm [shape: f32[1,384], index: 5, kind: input, shape index: {}]   ;;  %s9940_s6 = inlined_call_operand.hbm [shape: f32[1,256], index: 6, kind: input, shape index: {}]   ;;  %s9941_s7 = inlined_call_operand.hbm [shape: f32[1,256], index: 7, kind: input, shape index: {}]   ;;  %s9942_s8 = inlined_call_operand.hbm [shape: f32[1,1024], index: 8, kind: input, shape index: {}]   ;;  %s9943_s9 = inlined_call_operand.hbm [shape: f32[1,1024], index: 9, kind: input, shape index: {}]   ;;  %s9944_s10 = inlined_call_operand.vmem [shape: f32[2,16,1024], index: 10, kind: output, shape index: {}]  }
   0x1   :  { %16 = vsyncpa [#allocation6], 0 }
   0x2   :  { %17 = vsyncpa [#allocation9], 0 }
   0x3   :  { %18 = vsyncpa [#allocation12], 0 }
   0x4   :  { %19 = vsyncpa [#allocation15], 0  ;;  %s9434_s13 = smov 0  }
   0x5 LB: > { %s9363_s14 = smov [#allocation5]   ;;  %s9440_s16 = sadd.s32 4294967295, %s9361_s13   ;;  %s9361_s13 = sphi %s9434_s13, %s25_s13  }
   0x6   : > { %s296_s15 = sshll.u32 %s9363_s14, 4  ;;  %p7155_p0 = scmp.ge.s32.totalorder %s9361_s13, 1  ;;  %s297_s15 = int_to_ptr.vmem [resolvable:$true] %s296_s15 }
   0x7   : > { %p271_p1 = scmp.lt.s32.totalorder %s9361_s13, 3  ;;  %p9945_p2 = scmp.eq.s32.totalorder %s9440_s16, 0 }
   0x8   : > { %s9364_s18 = smov [#allocation8]   ;;  %s9365_s21 = smov [#allocation11]  }
   0x9   : > { %p9445_p3 = pnand %p7155_p0, %p271_p1  ;;  %s323_s19 = sshll.u32 %s9364_s18, 4  ;;  %s9451_s19 = int_to_ptr.vmem [resolvable:$true] %s323_s19 }
   0xa   : > { %s345_s22 = sshll.u32 %s9365_s21, 4  ;;  %s9366_s23 = smov [#allocation14]   ;;  %s9459_s22 = int_to_ptr.vmem [resolvable:$true] %s345_s22 }
   0xb   : > { %s9959_s17 = scalar_select %p9445_p3, 1, 0 }
   0xc   : > { %p8092_p4 = pneg %p9445_p3  ;;  %s9461_s24 = sshll.u32 %s9366_s23, 4  ;;  %s368_s24 = int_to_ptr.vmem [resolvable:$true] %s9461_s24 }
   0xd   : > { %s9112_s26 = scalar_lea.vmem %s297_s15, 55296  ;;  %p9120_p10 = scmp.lt.s32.totalorder %s297_s15, %s297_s15 }
   0xe   : > { %p9455_p5 = pnand %p9945_p2, %p8092_p4  ;;  %p9113_p7 = scmp.ne.s32.totalorder %s297_s15, %s9112_s26 }
   0xf   : > { %p9121_p11 = scmp.lt.s32.totalorder %s9112_s26, %s9112_s26 }
  0x10   : > { %p9465_p6 = pneg %p9455_p5 }
  0x11   : > { %p9122_p12 = por %p9121_p11, %p9120_p10 }
  0x12   : > { %p9115_p8 = pnand %p9113_p7, %p9465_p6 }
  0x14   : > { %p9116_p9 = pneg %p9115_p8 }
  0x16   : > { %p9123_p13 = pnand %p9122_p12, %p9116_p9 }
  0x18   : > { %9126 = shalt.err (!%p9123_p13)
}
  0x19   : > { %s9367_s27 = smov 128   ;;  %s9368_s28 = smov 8  }
  0x1a   : > { %8098 = dma.hbm_to_vmem [thread:$0]  (!%p9455_p5), %s9936_s2, 55296, %s297_s15, [#allocation6], %s9367_s27, %s9367_s27, %s9368_s28  }
  0x1b   : > { %s9138_s11 = scalar_lea.vmem %s9451_s19, 48  ;;  %s9145_s12 = scalar_lea.vmem %s9451_s19, 64 }
  0x1c   : > { %p9139_p0 = scmp.ne.s32.totalorder %s9451_s19, %s9138_s11  ;;  %p9146_p7 = scmp.lt.s32.totalorder %s9451_s19, %s9451_s19 }
  0x1d   : > { %p9147_p8 = scmp.lt.s32.totalorder %s9145_s12, %s9138_s11 }
  0x1e   : > { %p9141_p1 = pnand %p9139_p0, %p9465_p6 }
  0x1f   : > { %p9148_p9 = por %p9147_p8, %p9146_p7 }
  0x20   : > { %p9142_p4 = pneg %p9141_p1 }
  0x22   : > { %p9149_p10 = pnand %p9148_p9, %p9142_p4 }
  0x24   : > { %9152 = shalt.err (!%p9149_p10)
}
  0x25   : > { %8104 = dma.hbm_to_vmem [thread:$0]  (!%p9455_p5), %s9938_s4, 48, %s9451_s19, [#allocation9]  }
  0x26   : > { %s9164_s15 = scalar_lea.vmem %s9459_s22, 32  ;;  %p9172_p0 = scmp.lt.s32.totalorder %s9459_s22, %s9459_s22 }
  0x27   : > { %p9165_p11 = scmp.ne.s32.totalorder %s9459_s22, %s9164_s15  ;;  %p9173_p1 = scmp.lt.s32.totalorder %s9164_s15, %s9164_s15 }
  0x29   : > { %p9167_p12 = pnand %p9165_p11, %p9465_p6  ;;  %p9174_p4 = por %p9173_p1, %p9172_p0 }
  0x2b   : > { %p9168_p13 = pneg %p9167_p12 }
  0x2d   : > { %p9175_p7 = pnand %p9174_p4, %p9168_p13 }
  0x2f   : > { %9178 = shalt.err (!%p9175_p7)
}
  0x30   : > { %8110 = dma.hbm_to_vmem [thread:$0]  (!%p9455_p5), %s9940_s6, 32, %s9459_s22, [#allocation12]  }
  0x31   : > { %s9190_s19 = scalar_lea.vmem %s368_s24, 128  ;;  %p9198_p11 = scmp.lt.s32.totalorder %s368_s24, %s368_s24 }
  0x32   : > { %p9191_p8 = scmp.ne.s32.totalorder %s368_s24, %s9190_s19  ;;  %p9199_p12 = scmp.lt.s32.totalorder %s9190_s19, %s9190_s19 }
  0x34   : > { %p9193_p9 = pnand %p9191_p8, %p9465_p6  ;;  %p9200_p0 = por %p9199_p12, %p9198_p11 }
  0x36   : > { %p9194_p10 = pneg %p9193_p9 }
  0x38   : > { %p9201_p13 = pnand %p9200_p0, %p9194_p10 }
  0x3a   : > { %9204 = shalt.err (!%p9201_p13)
}
  0x3b   : > { %8116 = dma.hbm_to_vmem [thread:$0]  (!%p9455_p5), %s9942_s8, 128, %s368_s24, [#allocation15]  }
  0x3c   : > { %s9369_s28 = smov [#allocation3]  }
  0x3d   : > { %s283_s22 = sshll.u32 %s9369_s28, 4  ;;  %s284_s22 = int_to_ptr.vmem [resolvable:$true] %s283_s22 }
  0x3e   : > { %s9216_s29 = scalar_lea.vmem %s284_s22, 24576  ;;  %p9224_p8 = scmp.lt.s32.totalorder %s284_s22, %s284_s22 }
  0x3f   : > { %p9217_p1 = scmp.ne.s32.totalorder %s284_s22, %s9216_s29  ;;  %p9225_p9 = scmp.lt.s32.totalorder %s9216_s29, %s9216_s29 }
  0x41   : > { %p9219_p4 = pnand %p9217_p1, %p9465_p6  ;;  %p9226_p11 = por %p9225_p9, %p9224_p8 }
  0x43   : > { %p9220_p7 = pneg %p9219_p4 }
  0x45   : > { %p9227_p10 = pnand %p9226_p11, %p9220_p7 }
  0x47   : > { %9230 = shalt.err (!%p9227_p10)
}
  0x48   : > { %s9370_s30 = smov 192   ;;  %s9371_s11 = smov 12  }
  0x49   : > { %8095 = dma.hbm_to_vmem [thread:$0]  (!%p9455_p5), %s9935_s1, 24576, %s284_s22, [#allocation4], %s9370_s30, %s9370_s30, %s9371_s11  }
  0x4a   : > { %s9372_s14 = smov [#allocation7]  }
  0x4b   : > { %s309_s18 = sshll.u32 %s9372_s14, 4  ;;  %s310_s18 = int_to_ptr.vmem [resolvable:$true] %s309_s18 }
  0x4c   : > { %s9242_s15 = scalar_lea.vmem %s310_s18, 16384  ;;  %p9250_p1 = scmp.lt.s32.totalorder %s310_s18, %s310_s18 }
  0x4d   : > { %p9243_p12 = scmp.ne.s32.totalorder %s310_s18, %s9242_s15  ;;  %p9251_p4 = scmp.lt.s32.totalorder %s9242_s15, %s9242_s15 }
  0x4f   : > { %p9245_p0 = pnand %p9243_p12, %p9465_p6  ;;  %p9252_p7 = por %p9251_p4, %p9250_p1 }
  0x51   : > { %p9246_p13 = pneg %p9245_p0 }
  0x53   : > { %p9253_p8 = pnand %p9252_p7, %p9246_p13 }
  0x55   : > { %9256 = shalt.err (!%p9253_p8)
}
  0x56   : > { %s9373_s21 = smov 512   ;;  %s9374_s23 = smov 32  }
  0x57   : > { %8101 = dma.hbm_to_vmem [thread:$0]  (!%p9455_p5), %s9937_s3, 16384, %s310_s18, [#allocation6], %s9373_s21, %s9373_s21, %s9374_s23  }
  0x58   : > { %s9375_s27 = smov [#allocation10]   ;;  %s9376_s22 = smov [#allocation13]  }
  0x59   : > { %s334_s28 = sshll.u32 %s9375_s27, 4  ;;  %s356_s29 = sshll.u32 %s9376_s22, 4  ;;  %s335_s28 = int_to_ptr.vmem [resolvable:$true] %s334_s28  ;;  %s357_s29 = int_to_ptr.vmem [resolvable:$true] %s356_s29 }
  0x5a   : > { %s9268_s30 = scalar_lea.vmem %s335_s28, 48  ;;  %s9275_s11 = scalar_lea.vmem %s335_s28, 64 }
  0x5b   : > { %p9269_p9 = scmp.ne.s32.totalorder %s335_s28, %s9268_s30  ;;  %p9276_p12 = scmp.lt.s32.totalorder %s335_s28, %s335_s28 }
  0x5c   : > { %p9277_p0 = scmp.lt.s32.totalorder %s9275_s11, %s9268_s30 }
  0x5d   : > { %p9271_p11 = pnand %p9269_p9, %p9465_p6 }
  0x5e   : > { %p9278_p13 = por %p9277_p0, %p9276_p12 }
  0x5f   : > { %p9272_p10 = pneg %p9271_p11 }
  0x61   : > { %p9279_p1 = pnand %p9278_p13, %p9272_p10 }
  0x63   : > { %9282 = shalt.err (!%p9279_p1)
}
  0x64   : > { %8107 = dma.hbm_to_vmem [thread:$0]  (!%p9455_p5), %s9939_s5, 48, %s335_s28, [#allocation9]  }
  0x65   : > { %s9294_s14 = scalar_lea.vmem %s357_s29, 32  ;;  %p9302_p9 = scmp.lt.s32.totalorder %s357_s29, %s357_s29 }
  0x66   : > { %p9295_p4 = scmp.ne.s32.totalorder %s357_s29, %s9294_s14  ;;  %p9303_p11 = scmp.lt.s32.totalorder %s9294_s14, %s9294_s14 }
  0x68   : > { %p9297_p7 = pnand %p9295_p4, %p9465_p6  ;;  %p9304_p2 = por %p9303_p11, %p9302_p9 }
  0x6a   : > { %p9298_p8 = pneg %p9297_p7 }
  0x6c   : > { %p9305_p3 = pnand %p9304_p2, %p9298_p8 }
  0x6e   : > { %9308 = shalt.err (!%p9305_p3)
}
  0x6f   : > { %8113 = dma.hbm_to_vmem [thread:$0]  (!%p9455_p5), %s9941_s7, 32, %s357_s29, [#allocation12]  }
  0x70   : > { %s9377_s21 = smov [#allocation16]  }
  0x71   : > { %s378_s23 = sshll.u32 %s9377_s21, 4  ;;  %s379_s23 = int_to_ptr.vmem [resolvable:$true] %s378_s23 }
  0x72   : > { %s9320_s19 = scalar_lea.vmem %s379_s23, 128  ;;  %p9328_p13 = scmp.lt.s32.totalorder %s379_s23, %s379_s23 }
  0x73   : > { %p9321_p10 = scmp.ne.s32.totalorder %s379_s23, %s9320_s19  ;;  %p9329_p1 = scmp.lt.s32.totalorder %s9320_s19, %s9320_s19 }
  0x75   : > { %p9323_p12 = pnand %p9321_p10, %p9465_p6  ;;  %p9330_p4 = por %p9329_p1, %p9328_p13 }
  0x77   : > { %p9324_p0 = pneg %p9323_p12 }
  0x79   : > { %p9331_p2 = pnand %p9330_p4, %p9324_p0 }
  0x7b   : > { %9334 = shalt.err (!%p9331_p2)
}
  0x7c   : > { %8119 = dma.hbm_to_vmem [thread:$0]  (!%p9455_p5), %s9943_s9, 128, %s379_s23, [#allocation15]  }
  0x7d   : > { %p9962_p3 = scmp.ne.s32.totalorder %s9959_s17, 0 }
  0x7f   : > { %399 = sbr.rel (%p9962_p3) target bundleno = 1439 (0x59f), region = 60 }
  0x84   : > { %p9963_p7 = scmp.eq.s32.totalorder %s9440_s16, 0 }
  0x86   : > { %9340 = dma.done.wait (%p9963_p7), [#allocation4], 24576   ;;  %p9964_p6 = pmov %p9963_p7 }
  0x88   : > { %9342 = vsyncadd (%p9964_p6), [#allocation4], 4294942720  ;;  %p9965_p8 = pmov %p9964_p6 }
  0x89   : > { %p9966_p9 = pmov %p9964_p6 }
  0x8a   : > { %9344 = dma.done.wait (%p9965_p8), [#allocation6], 71680  }
  0x8b   : > { %9346 = vsyncadd (%p9966_p9), [#allocation6], 4294895616  ;;  %p9967_p11 = pmov %p9964_p6 }
  0x8c   : > { %p9968_p5 = pmov %p9964_p6 }
  0x8d   : > { %9348 = dma.done.wait (%p9967_p11), [#allocation9], 96  }
  0x8e   : > { %9350 = vsyncadd (%p9968_p5), [#allocation9], 4294967200  ;;  %p9969_p10 = pmov %p9968_p5 }
  0x8f   : > { %p9970_p12 = pmov %p9968_p5 }
  0x90   : > { %9352 = dma.done.wait (%p9969_p10), [#allocation12], 64  }
  0x91   : > { %9354 = vsyncadd (%p9970_p12), [#allocation12], 4294967232  ;;  %p9971_p0 = pmov %p9968_p5 }
  0x93   : > { %9356 = dma.done.wait (%p9971_p0), [#allocation15], 256   ;;  %p9972_p13 = pmov %p9971_p0 }
  0x94   : > { %v8162_v0 = vld [vmem:[#allocation3 + $0xac] ss:$12 sps:$4 sm:$0xff]   ;;  %v8166_v2 = vld [vmem:[#allocation3 + $0xa8] ss:$12 sps:$4 sm:$0xff]   ;;  %v8172_v6 = vld [vmem:[#allocation3 + $0x90] ss:$12 sps:$4 sm:$0xff]  }
  0x95   : > { %9358 = vsyncadd (%p9972_p13), [#allocation15], 4294967040  ;;  %v8164_v1 = vld [vmem:[#allocation3 + $0x22c] ss:$12 sps:$4 sm:$0xff]   ;;  %1784 = vmatprep.subr.bf16.mxu0 %v8162_v0  ;;  %v8167_v3 = vld [vmem:[#allocation3 + $0x228] ss:$12 sps:$4 sm:$0xff]  }
  0x96   : > { %1827 = vmatprep.subr.bf16.mxu1 %v8164_v1  ;;  %v8168_v4 = vld [vmem:[#allocation3 + $0x94] ss:$12 sps:$4 sm:$0xff]   ;;  %1785 = vmatpush1.bf16.msra.mxu0 %v8166_v2  ;;  %v8173_v7 = vld [vmem:[#allocation3 + $0x210] ss:$12 sps:$4 sm:$0xff]   ;;  %v8178_v10 = vld [vmem:[#allocation3 + $0x78] ss:$12 sps:$4 sm:$0xff]  }
  0x97   : > { %1828 = vmatpush1.bf16.msra.mxu1 %v8167_v3  ;;  %v8170_v5 = vld [vmem:[#allocation3 + $0x214] ss:$12 sps:$4 sm:$0xff]   ;;  %1786 = vmatprep.subr.bf16.mxu0 %v8168_v4  ;;  %v8174_v8 = vld [vmem:[#allocation3 + $0x7c] ss:$12 sps:$4 sm:$0xff]   ;;  %v8179_v11 = vld [vmem:[#allocation3 + $0x1f8] ss:$12 sps:$4 sm:$0xff]  }
  0x98   : > { %1829 = vmatprep.subr.bf16.mxu1 %v8170_v5  ;;  %v8176_v9 = vld [vmem:[#allocation3 + $0x1fc] ss:$12 sps:$4 sm:$0xff]   ;;  %v8180_v12 = vld [vmem:[#allocation3 + $0x64] ss:$12 sps:$4 sm:$0xff]   ;;  %v8184_v14 = vld [vmem:[#allocation3 + $0x60] ss:$12 sps:$4 sm:$0xff]  }
  0x99   : > { %v8182_v13 = vld [vmem:[#allocation3 + $0x1e4] ss:$12 sps:$4 sm:$0xff]   ;;  %v8185_v15 = vld [vmem:[#allocation3 + $0x1e0] ss:$12 sps:$4 sm:$0xff]   ;;  %v8190_v18 = vld [vmem:[#allocation3 + $0x48] ss:$12 sps:$4 sm:$0xff]  }
  0x9a   : > { %1787 = vmatpush1.bf16.msra.mxu0 %v8172_v6  ;;  %v8186_v16 = vld [vmem:[#allocation3 + $0x4c] ss:$12 sps:$4 sm:$0xff]   ;;  %v8191_v19 = vld [vmem:[#allocation3 + $0x1c8] ss:$12 sps:$4 sm:$0xff]   ;;  %v8196_v22 = vld [vmem:[#allocation3 + $0x30] ss:$12 sps:$4 sm:$0xff]  }
  0x9b   : > { %1830 = vmatpush1.bf16.msra.mxu1 %v8173_v7  ;;  %1788 = vmatprep.subr.bf16.mxu0 %v8174_v8  ;;  %v8188_v17 = vld [vmem:[#allocation3 + $0x1cc] ss:$12 sps:$4 sm:$0xff]   ;;  %v8192_v20 = vld [vmem:[#allocation3 + $0x34] ss:$12 sps:$4 sm:$0xff]   ;;  %v8197_v23 = vld [vmem:[#allocation3 + $0x1b0] ss:$12 sps:$4 sm:$0xff]  }
  0x9c   : > { %1831 = vmatprep.subr.bf16.mxu1 %v8176_v9  ;;  %v8194_v21 = vld [vmem:[#allocation3 + $0x1b4] ss:$12 sps:$4 sm:$0xff]   ;;  %v8198_v24 = vld [vmem:[#allocation3 + $0x1c] ss:$12 sps:$4 sm:$0xff]   ;;  %v8202_v26 = vld [vmem:[#allocation3 + $0x18] ss:$12 sps:$4 sm:$0xff]  }
  0x9d   : > { %v8200_v25 = vld [vmem:[#allocation3 + $0x19c] ss:$12 sps:$4 sm:$0xff]   ;;  %v8203_v27 = vld [vmem:[#allocation3 + $0x198] ss:$12 sps:$4 sm:$0xff]   ;;  %v8208_v30 = vld [vmem:[#allocation3] ss:$12 sps:$4 sm:$0xff]  }
  0x9e   : > { %1789 = vmatpush1.bf16.msra.mxu0 %v8178_v10  ;;  %v8204_v28 = vld [vmem:[#allocation3 + $0x4] ss:$12 sps:$4 sm:$0xff]   ;;  %v8209_v31 = vld [vmem:[#allocation3 + $0x180] ss:$12 sps:$4 sm:$0xff]   ;;  %p469_p1 = scmp.lt.s32.totalorder %s9440_s16, 1  ;;  %vm2192_vm0 = vcmask 1041408  }
  0x9f   : > { %1832 = vmatpush1.bf16.msra.mxu1 %v8179_v11  ;;  %1790 = vmatprep.subr.bf16.mxu0 %v8180_v12  ;;  %v8206_v29 = vld [vmem:[#allocation3 + $0x184] ss:$12 sps:$4 sm:$0xff]   ;;  %v8210_v32 = vld [vmem:[#allocation3 + $0x16c] ss:$12 sps:$4 sm:$0xff]   ;;  %v8214_v34 = vld [vmem:[#allocation3 + $0x168] ss:$12 sps:$4 sm:$0xff]  }
  0xa0   : > { %1833 = vmatprep.subr.bf16.mxu1 %v8182_v13  ;;  %v8212_v33 = vld [vmem:[#allocation3 + $0x2ec] ss:$12 sps:$4 sm:$0xff]   ;;  %v8215_v35 = vld [vmem:[#allocation3 + $0x2e8] ss:$12 sps:$4 sm:$0xff]   ;;  %s10004_s16 = smov (!%p469_p1, %s9440_s16), 1  ;;  %vm2193_vm1 = vcmask 1045508  }
  0xa1   : > { %v8216_v36 = vld [vmem:[#allocation3 + $0x154] ss:$12 sps:$4 sm:$0xff]   ;;  %v8220_v38 = vld [vmem:[#allocation3 + $0x150] ss:$12 sps:$4 sm:$0xff]   ;;  %s7962_s17 = sshll.u32 %s10004_s16, 7  ;;  %vm9651_vm2 = vmor %vm2192_vm0, %vm2193_vm1  ;;  %vm2343_vm3 = vcmask 1045504  }
  0xa2   : > { %1791 = vmatpush1.bf16.msra.mxu0 %v8184_v14  ;;  %v8218_v37 = vld [vmem:[#allocation3 + $0x2d4] ss:$12 sps:$4 sm:$0xff]   ;;  %v8221_v39 = vld [vmem:[#allocation3 + $0x2d0] ss:$12 sps:$4 sm:$0xff]   ;;  %v8226_v42 = vld [vmem:[#allocation3 + $0x138] ss:$12 sps:$4 sm:$0xff]   ;;  %s9576_s28 = scalar_lea.vmem %s9934_s0, %s7962_s17  ;;  %s9887_s30 = scalar_lea.vmem %s9944_s10, %s7962_s17 }
  0xa3   : > { %1834 = vmatpush1.bf16.msra.mxu1 %v8185_v15  ;;  %1792 = vmatprep.subr.bf16.mxu0 %v8186_v16  ;;  %v8222_v40 = vld [vmem:[#allocation3 + $0x13c] ss:$12 sps:$4 sm:$0xff]   ;;  %v8227_v43 = vld [vmem:[#allocation3 + $0x2b8] ss:$12 sps:$4 sm:$0xff]   ;;  %v8232_v50 = vld [vmem:[#allocation3 + $0x120] ss:$12 sps:$4 sm:$0xff]  }
  0xa4   : > { %1835 = vmatprep.subr.bf16.mxu1 %v8188_v17  ;;  %v8224_v41 = vld [vmem:[#allocation3 + $0x2bc] ss:$12 sps:$4 sm:$0xff]   ;;  %v8228_v44 = vld [vmem:[#allocation3 + $0x124] ss:$12 sps:$4 sm:$0xff]   ;;  %v483_v48 = vld [vmem:[%s9576_s28 + $0x18] sm:$0xff]  ;;  %vm4355_vm5 = vcmask 1044480  }
  0xa5   : > { %v8230_v45 = vld [vmem:[#allocation3 + $0x2a4] ss:$12 sps:$4 sm:$0xff]   ;;  %v491_v49 = vld [vmem:[%s9576_s28 + $0x58] sm:$0xff]  ;;  %v8233_v51 = vld [vmem:[#allocation3 + $0x2a0] ss:$12 sps:$4 sm:$0xff]   ;;  %vm3574_vm7 = vcmask 1046528  }
  0xa6   : > { %1793 = vmatpush1.bf16.msra.mxu0 %v8190_v18  ;;  %v481_v46 = vld [vmem:[%s9576_s28 + $0x8] sm:$0xff]  ;;  %v8234_v52 = vld [vmem:[#allocation3 + $0x10c] ss:$12 sps:$4 sm:$0xff]   ;;  %v9584_v54 = vpack.c.bf16 %v491_v49, %v483_v48  ;;  %v8240_v58 = vld [vmem:[#allocation3 + $0xf4] ss:$12 sps:$4 sm:$0xff]  }
  0xa7   : > { %1836 = vmatpush1.bf16.msra.mxu1 %v8191_v19  ;;  %1794 = vmatprep.subr.bf16.mxu0 %v8192_v20  ;;  %v489_v47 = vld [vmem:[%s9576_s28 + $0x48] sm:$0xff]  ;;  %v8236_v55 = vld [vmem:[#allocation3 + $0x28c] ss:$12 sps:$4 sm:$0xff]   ;;  %v8242_v59 = vld [vmem:[#allocation3 + $0x274] ss:$12 sps:$4 sm:$0xff]  }
  0xa8   : > { %1837 = vmatprep.subr.bf16.mxu1 %v8194_v21  ;;  %v9582_v53 = vpack.c.bf16 %v489_v47, %v481_v46  ;;  %1859 = vmatprep.mubr.bf16.mxu1 %v9584_v54  ;;  %v8238_v56 = vld [vmem:[#allocation3 + $0x108] ss:$12 sps:$4 sm:$0xff]   ;;  %v8244_v60 = vld [vmem:[#allocation3 + $0xf0] ss:$12 sps:$4 sm:$0xff]   ;;  %v8250_v0 = vld [vmem:[#allocation3 + $0xd8] ss:$12 sps:$4 sm:$0xff]  }
  0xa9   : > { %v8239_v57 = vld [vmem:[#allocation3 + $0x288] ss:$12 sps:$4 sm:$0xff]   ;;  %v8245_v61 = vld [vmem:[#allocation3 + $0x270] ss:$12 sps:$4 sm:$0xff]   ;;  %v8251_v1 = vld [vmem:[#allocation3 + $0x258] ss:$12 sps:$4 sm:$0xff]  }
  0xaa   : > { %1795 = vmatpush1.bf16.msra.mxu0 %v8196_v22  ;;  %1816 = vmatprep.mubr.bf16.mxu0 %v9582_v53  ;;  %v8246_v62 = vld [vmem:[#allocation3 + $0xdc] ss:$12 sps:$4 sm:$0xff]   ;;  %v8252_v2 = vld [vmem:[#allocation3 + $0xc4] ss:$12 sps:$4 sm:$0xff]   ;;  %v8256_v4 = vld [vmem:[#allocation3 + $0xc0] ss:$12 sps:$4 sm:$0xff]  }
  0xab   : > { %1838 = vmatpush1.bf16.msra.mxu1 %v8197_v23  ;;  %1796 = vmatprep.subr.bf16.mxu0 %v8198_v24  ;;  %v8248_v63 = vld [vmem:[#allocation3 + $0x25c] ss:$12 sps:$4 sm:$0xff]   ;;  %v8254_v3 = vld [vmem:[#allocation3 + $0x244] ss:$12 sps:$4 sm:$0xff]   ;;  %v8257_v5 = vld [vmem:[#allocation3 + $0x240] ss:$12 sps:$4 sm:$0xff]  }
  0xac   : > { %1839 = vmatprep.subr.bf16.mxu1 %v8200_v25  ;;  %v480_v6 = vld [vmem:[%s9576_s28] sm:$0xff]  ;;  %v482_v8 = vld [vmem:[%s9576_s28 + $0x10] sm:$0xff]  ;;  %v8258_v14 = vld [vmem:[#allocation3 + $0x3a8] ss:$12 sps:$4 sm:$0xff]   ;;  %vm2690_vm4 = vsmask.f32 6400 }
  0xad   : > { %v488_v7 = vld [vmem:[%s9576_s28 + $0x40] sm:$0xff]  ;;  %v490_v9 = vld [vmem:[%s9576_s28 + $0x50] sm:$0xff]  ;;  %v8261_v15 = vld [vmem:[#allocation3 + $0x528] ss:$12 sps:$4 sm:$0xff]   ;;  %vm3130_vm6 = vsmask.f32 5376 }
  0xae   : > { %1797 = vmatpush1.bf16.msra.mxu0 %v8202_v26  ;;  %v8260_v10 = vld [vmem:[#allocation3 + $0x3ac] ss:$12 sps:$4 sm:$0xff]   ;;  %v9592_v12 = vpack.c.bf16 %v488_v7, %v480_v6  ;;  %v9594_v13 = vpack.c.bf16 %v490_v9, %v482_v8  ;;  %v8266_v16 = vld [vmem:[#allocation3 + $0x394] ss:$12 sps:$4 sm:$0xff]   ;;  %v8264_v18 = vld [vmem:[#allocation3 + $0x390] ss:$12 sps:$4 sm:$0xff]  }
  0xaf   : > { %1840 = vmatpush1.bf16.msra.mxu1 %v8203_v27  ;;  %1798 = vmatprep.subr.bf16.mxu0 %v8204_v28  ;;  %v8263_v11 = vld [vmem:[#allocation3 + $0x52c] ss:$12 sps:$4 sm:$0xff]   ;;  %v8269_v17 = vld [vmem:[#allocation3 + $0x514] ss:$12 sps:$4 sm:$0xff]   ;;  %v8267_v19 = vld [vmem:[#allocation3 + $0x510] ss:$12 sps:$4 sm:$0xff]  }
  0xb0   : > { %1841 = vmatprep.subr.bf16.mxu1 %v8206_v29  ;;  %v8272_v20 = vld [vmem:[#allocation3 + $0x37c] ss:$12 sps:$4 sm:$0xff]   ;;  %v8270_v22 = vld [vmem:[#allocation3 + $0x378] ss:$12 sps:$4 sm:$0xff]   ;;  %v8276_v26 = vld [vmem:[#allocation3 + $0x360] ss:$12 sps:$4 sm:$0xff]  }
  0xb1   : > { %v8275_v21 = vld [vmem:[#allocation3 + $0x4fc] ss:$12 sps:$4 sm:$0xff]   ;;  %v8273_v23 = vld [vmem:[#allocation3 + $0x4f8] ss:$12 sps:$4 sm:$0xff]   ;;  %v8279_v27 = vld [vmem:[#allocation3 + $0x4e0] ss:$12 sps:$4 sm:$0xff]  }
  0xb2   : > { %1799 = vmatpush1.bf16.msra.mxu0 %v8208_v30  ;;  %v8278_v24 = vld [vmem:[#allocation3 + $0x364] ss:$12 sps:$4 sm:$0xff]   ;;  %v8284_v28 = vld [vmem:[#allocation3 + $0x34c] ss:$12 sps:$4 sm:$0xff]   ;;  %v8282_v30 = vld [vmem:[#allocation3 + $0x348] ss:$12 sps:$4 sm:$0xff]  }
  0xb3   : > { %1842 = vmatpush1.bf16.msra.mxu1 %v8209_v31  ;;  %1800 = vmatprep.subr.bf16.mxu0 %v8210_v32  ;;  %v8281_v25 = vld [vmem:[#allocation3 + $0x4e4] ss:$12 sps:$4 sm:$0xff]   ;;  %v8287_v29 = vld [vmem:[#allocation3 + $0x4cc] ss:$12 sps:$4 sm:$0xff]   ;;  %v8285_v31 = vld [vmem:[#allocation3 + $0x4c8] ss:$12 sps:$4 sm:$0xff]  }
  0xb4   : > { %1843 = vmatprep.subr.bf16.mxu1 %v8212_v33  ;;  %v8290_v32 = vld [vmem:[#allocation3 + $0x334] ss:$12 sps:$4 sm:$0xff]  }
  0xb5   : > { %v8293_v33 = vld [vmem:[#allocation3 + $0x4b4] ss:$12 sps:$4 sm:$0xff]  }
  0xb6   : > { %1801 = vmatpush2.bf16.msra.mxu0 %v8214_v34  ;;  %v8288_v34 = vld [vmem:[#allocation3 + $0x330] ss:$12 sps:$4 sm:$0xff]   ;;  %v495_v46 = vld [vmem:[%s9576_s28 + $0x78] sm:$0xff]  ;;  %v8300_v47 = vld [vmem:[#allocation3 + $0x300] ss:$12 sps:$4 sm:$0xff]  }
  0xb7   : > { %1844 = vmatpush2.bf16.msra.mxu1 %v8215_v35  ;;  %1802 = vmatprep.subr.bf16.mxu0 %v8216_v36  ;;  %v8291_v35 = vld [vmem:[#allocation3 + $0x4b0] ss:$12 sps:$4 sm:$0xff]   ;;  %v8303_v49 = vld [vmem:[#allocation3 + $0x480] ss:$12 sps:$4 sm:$0xff]   ;;  %v8330_v6 = vld [vmem:[#allocation3 + $0x408] ss:$12 sps:$4 sm:$0xff]  }
  0xb8   : > { %1845 = vmatprep.subr.bf16.mxu1 %v8218_v37  ;;  %v8296_v36 = vld [vmem:[#allocation3 + $0x31c] ss:$12 sps:$4 sm:$0xff]   ;;  %v8338_v8 = vld [vmem:[#allocation3 + $0x3f4] ss:$12 sps:$4 sm:$0xff]  }
  0xb9   : > { %v8299_v37 = vld [vmem:[#allocation3 + $0x49c] ss:$12 sps:$4 sm:$0xff]   ;;  %v8341_v9 = vld [vmem:[#allocation3 + $0x574] ss:$12 sps:$4 sm:$0xff]  }
  0xba   : > { %1803 = vmatpush2.bf16.msra.mxu0 %v8220_v38  ;;  %v8294_v38 = vld [vmem:[#allocation3 + $0x318] ss:$12 sps:$4 sm:$0xff]   ;;  %v8333_v7 = vld [vmem:[#allocation3 + $0x588] ss:$12 sps:$4 sm:$0xff]  }
  0xbb   : > { %1846 = vmatpush2.bf16.msra.mxu1 %v8221_v39  ;;  %1804 = vmatprep.subr.bf16.mxu0 %v8222_v40  ;;  %v8297_v39 = vld [vmem:[#allocation3 + $0x498] ss:$12 sps:$4 sm:$0xff]  }
  0xbc   : > { %1847 = vmatprep.subr.bf16.mxu1 %v8224_v41  ;;  %v485_v40 = vld [vmem:[%s9576_s28 + $0x28] sm:$0xff] }
  0xbd   : > { %v493_v41 = vld [vmem:[%s9576_s28 + $0x68] sm:$0xff] }
  0xbe   : > { %1805 = vmatpush2.bf16.msra.mxu0 %v8226_v42  ;;  %v487_v42 = vld [vmem:[%s9576_s28 + $0x38] sm:$0xff] }
  0xbf   : > { %1848 = vmatpush2.bf16.msra.mxu1 %v8227_v43  ;;  %1806 = vmatprep.subr.bf16.mxu0 %v8228_v44  ;;  %v8302_v43 = vld [vmem:[#allocation3 + $0x304] ss:$12 sps:$4 sm:$0xff]   ;;  %v9604_v48 = vpack.c.bf16 %v495_v46, %v487_v42  ;;  %v8368_v42 = vld [vmem:[#allocation3 + $0x68] ss:$12 sps:$4 sm:$0xff]  }
  0xc0   : > { %1849 = vmatprep.subr.bf16.mxu1 %v8230_v45  ;;  %v8305_v44 = vld [vmem:[#allocation3 + $0x484] ss:$12 sps:$4 sm:$0xff]   ;;  %v9601_v45 = vpack.c.bf16 %v493_v41, %v485_v40  ;;  %v8366_v40 = vld [vmem:[#allocation3 + $0x128] ss:$12 sps:$4 sm:$0xff]  }
  0xc1   : > { %v8367_v41 = vld [vmem:[#allocation3 + $0x2a8] ss:$12 sps:$4 sm:$0xff]   ;;  %v8371_v46 = vld [vmem:[#allocation3 + $0x290] ss:$12 sps:$4 sm:$0xff]  }
  0xc2   : > { %1807 = vmatpush2.bf16.msra.mxu0 %v8232_v50  ;;  %v8308_v50 = vld [vmem:[#allocation3 + $0x46c] ss:$12 sps:$4 sm:$0xff]  }
  0xc3   : > { %1850 = vmatpush2.bf16.msra.mxu1 %v8233_v51  ;;  %1808 = vmatprep.subr.bf16.mxu0 %v8234_v52  ;;  %v8311_v51 = vld [vmem:[#allocation3 + $0x5ec] ss:$12 sps:$4 sm:$0xff]   ;;  %v8306_v52 = vld [vmem:[#allocation3 + $0x468] ss:$12 sps:$4 sm:$0xff]  }
  0xc4   : > { %1851 = vmatprep.subr.bf16.mxu1 %v8236_v55  ;;  %v8309_v55 = vld [vmem:[#allocation3 + $0x5e8] ss:$12 sps:$4 sm:$0xff]  }
  0xc6   : > { %1809 = vmatpush2.bf16.msra.mxu0 %v8238_v56  ;;  %v8314_v56 = vld [vmem:[#allocation3 + $0x454] ss:$12 sps:$4 sm:$0xff]  }
  0xc7   : > { %1852 = vmatpush2.bf16.msra.mxu1 %v8239_v57  ;;  %1810 = vmatprep.subr.bf16.mxu0 %v8240_v58  ;;  %v8317_v57 = vld [vmem:[#allocation3 + $0x5d4] ss:$12 sps:$4 sm:$0xff]   ;;  %v8312_v58 = vld [vmem:[#allocation3 + $0x450] ss:$12 sps:$4 sm:$0xff]  }
  0xc8   : > { %1853 = vmatprep.subr.bf16.mxu1 %v8242_v59  ;;  %v8315_v59 = vld [vmem:[#allocation3 + $0x5d0] ss:$12 sps:$4 sm:$0xff]  }
  0xca   : > { %1811 = vmatpush2.bf16.msra.mxu0 %v8244_v60  ;;  %v8320_v60 = vld [vmem:[#allocation3 + $0x43c] ss:$12 sps:$4 sm:$0xff]  }
  0xcb   : > { %1854 = vmatpush2.bf16.msra.mxu1 %v8245_v61  ;;  %1812 = vmatprep.subr.bf16.mxu0 %v8246_v62  ;;  %v8323_v61 = vld [vmem:[#allocation3 + $0x5bc] ss:$12 sps:$4 sm:$0xff]   ;;  %v8318_v62 = vld [vmem:[#allocation3 + $0x438] ss:$12 sps:$4 sm:$0xff]  }
  0xcc   : > { %1855 = vmatprep.subr.bf16.mxu1 %v8248_v63  ;;  %v8321_v63 = vld [vmem:[#allocation3 + $0x5b8] ss:$12 sps:$4 sm:$0xff]  }
  0xce   : > { %1813 = vmatpush2.bf16.msra.mxu0 %v8250_v0  ;;  %v8326_v0 = vld [vmem:[#allocation3 + $0x424] ss:$12 sps:$4 sm:$0xff]  }
  0xcf   : > { %1856 = vmatpush2.bf16.msra.mxu1 %v8251_v1  ;;  %1814 = vmatprep.subr.bf16.mxu0 %v8252_v2  ;;  %v8329_v1 = vld [vmem:[#allocation3 + $0x5a4] ss:$12 sps:$4 sm:$0xff]   ;;  %v8324_v2 = vld [vmem:[#allocation3 + $0x420] ss:$12 sps:$4 sm:$0xff]  }
  0xd0   : > { %1857 = vmatprep.subr.bf16.mxu1 %v8254_v3  ;;  %v8327_v3 = vld [vmem:[#allocation3 + $0x5a0] ss:$12 sps:$4 sm:$0xff]  }
  0xd2   : > { %1815 = vmatpush2.bf16.msra.mxu0 %v8256_v4  ;;  %v8332_v4 = vld [vmem:[#allocation3 + $0x40c] ss:$12 sps:$4 sm:$0xff]  }
  0xd3   : > { %1858 = vmatpush2.bf16.msra.mxu1 %v8257_v5  ;;  %1870 = vmatprep.subr.bf16.mxu0 %v8260_v10  ;;  %v8335_v5 = vld [vmem:[#allocation3 + $0x58c] ss:$12 sps:$4 sm:$0xff]   ;;  %v8336_v10 = vld [vmem:[#allocation3 + $0x3f0] ss:$12 sps:$4 sm:$0xff]  }
  0xd4   : > { %1913 = vmatprep.subr.bf16.mxu1 %v8263_v11  ;;  %v8339_v11 = vld [vmem:[#allocation3 + $0x570] ss:$12 sps:$4 sm:$0xff]  }
  0xd5   : > { %1817 = vmatmul.mubr.bf16.vlgmr.msra.gmra.mxu0 %v9592_v12 }
  0xd6   : > { %1860 = vmatmul.mubr.bf16.vlgmr.msra.gmra.mxu1 %v9594_v13  ;;  %1871 = vmatpush1.bf16.msra.mxu0 %v8258_v14  ;;  %v8344_v14 = vld [vmem:[#allocation3 + $0x3dc] ss:$12 sps:$4 sm:$0xff]  }
  0xd7   : > { %1914 = vmatpush1.bf16.msra.mxu1 %v8261_v15  ;;  %1872 = vmatprep.subr.bf16.mxu0 %v8266_v16  ;;  %v8347_v15 = vld [vmem:[#allocation3 + $0x55c] ss:$12 sps:$4 sm:$0xff]   ;;  %v8342_v16 = vld [vmem:[#allocation3 + $0x3d8] ss:$12 sps:$4 sm:$0xff]  }
  0xd8   : > { %1915 = vmatprep.subr.bf16.mxu1 %v8269_v17  ;;  %1902 = vmatprep.mubr.bf16.mxu0 %v9601_v45  ;;  %v8345_v17 = vld [vmem:[#allocation3 + $0x558] ss:$12 sps:$4 sm:$0xff]  }
  0xd9   : > { %1945 = vmatprep.mubr.bf16.mxu1 %v9604_v48 }
  0xda   : > { %1873 = vmatpush1.bf16.msra.mxu0 %v8264_v18  ;;  %v8350_v18 = vld [vmem:[#allocation3 + $0x3c4] ss:$12 sps:$4 sm:$0xff]  }
  0xdb   : > { %1916 = vmatpush1.bf16.msra.mxu1 %v8267_v19  ;;  %1874 = vmatprep.subr.bf16.mxu0 %v8272_v20  ;;  %v8353_v19 = vld [vmem:[#allocation3 + $0x544] ss:$12 sps:$4 sm:$0xff]   ;;  %v8348_v20 = vld [vmem:[#allocation3 + $0x3c0] ss:$12 sps:$4 sm:$0xff]  }
  0xdc   : > { %1917 = vmatprep.subr.bf16.mxu1 %v8275_v21  ;;  %v8351_v21 = vld [vmem:[#allocation3 + $0x540] ss:$12 sps:$4 sm:$0xff]  }
  0xde   : > { %1875 = vmatpush1.bf16.msra.mxu0 %v8270_v22  ;;  %v484_v22 = vld [vmem:[%s9576_s28 + $0x20] sm:$0xff] }
  0xdf   : > { %1918 = vmatpush1.bf16.msra.mxu1 %v8273_v23  ;;  %1876 = vmatprep.subr.bf16.mxu0 %v8278_v24  ;;  %v492_v23 = vld [vmem:[%s9576_s28 + $0x60] sm:$0xff]  ;;  %v486_v24 = vld [vmem:[%s9576_s28 + $0x30] sm:$0xff] }
  0xe0   : > { %1919 = vmatprep.subr.bf16.mxu1 %v8281_v25  ;;  %v494_v25 = vld [vmem:[%s9576_s28 + $0x70] sm:$0xff] }
  0xe2   : > { %1877 = vmatpush1.bf16.msra.mxu0 %v8276_v26  ;;  %v8354_v26 = vld [vmem:[#allocation3 + $0x170] ss:$12 sps:$4 sm:$0xff]  }
  0xe3   : > { %1920 = vmatpush1.bf16.msra.mxu1 %v8279_v27  ;;  %1878 = vmatprep.subr.bf16.mxu0 %v8284_v28  ;;  %v8355_v27 = vld [vmem:[#allocation3 + $0x2f0] ss:$12 sps:$4 sm:$0xff]  }
  0xe4   : > { %1921 = vmatprep.subr.bf16.mxu1 %v8287_v29  ;;  %v8356_v28 = vld [vmem:[#allocation3 + $0xb0] ss:$12 sps:$4 sm:$0xff]   ;;  %v9612_v29 = vpack.c.bf16 %v492_v23, %v484_v22  ;;  %v8412_v22 = vld [vmem:[#allocation3 + $0x320] ss:$12 sps:$4 sm:$0xff]  }
  0xe5   : > { %v8413_v23 = vld [vmem:[#allocation3 + $0x4a0] ss:$12 sps:$4 sm:$0xff]  }
  0xe6   : > { %1879 = vmatpush1.bf16.msra.mxu0 %v8282_v30  ;;  %v9614_v30 = vpack.c.bf16 %v494_v25, %v486_v24  ;;  %v8414_v24 = vld [vmem:[#allocation3 + $0x3c8] ss:$12 sps:$4 sm:$0xff]  }
  0xe7   : > { %1922 = vmatpush1.bf16.msra.mxu1 %v8285_v31  ;;  %1880 = vmatprep.subr.bf16.mxu0 %v8290_v32  ;;  %v8357_v31 = vld [vmem:[#allocation3 + $0x230] ss:$12 sps:$4 sm:$0xff]   ;;  %v8358_v32 = vld [vmem:[#allocation3 + $0x158] ss:$12 sps:$4 sm:$0xff]   ;;  %v8415_v25 = vld [vmem:[#allocation3 + $0x548] ss:$12 sps:$4 sm:$0xff]  }
  0xe8   : > { %1923 = vmatprep.subr.bf16.mxu1 %v8293_v33  ;;  %v8359_v33 = vld [vmem:[#allocation3 + $0x2d8] ss:$12 sps:$4 sm:$0xff]  }
  0xea   : > { %1881 = vmatpush1.bf16.msra.mxu0 %v8288_v34  ;;  %v8360_v34 = vld [vmem:[#allocation3 + $0x98] ss:$12 sps:$4 sm:$0xff]  }
  0xeb   : > { %1924 = vmatpush1.bf16.msra.mxu1 %v8291_v35  ;;  %1882 = vmatprep.subr.bf16.mxu0 %v8296_v36  ;;  %v8361_v35 = vld [vmem:[#allocation3 + $0x218] ss:$12 sps:$4 sm:$0xff]   ;;  %v8362_v36 = vld [vmem:[#allocation3 + $0x140] ss:$12 sps:$4 sm:$0xff]  }
  0xec   : > { %1925 = vmatprep.subr.bf16.mxu1 %v8299_v37  ;;  %v8363_v37 = vld [vmem:[#allocation3 + $0x2c0] ss:$12 sps:$4 sm:$0xff]  }
  0xee   : > { %1883 = vmatpush1.bf16.msra.mxu0 %v8294_v38  ;;  %v8364_v38 = vld [vmem:[#allocation3 + $0x80] ss:$12 sps:$4 sm:$0xff]  }
  0xef   : > { %1926 = vmatpush1.bf16.msra.mxu1 %v8297_v39  ;;  %1884 = vmatprep.subr.bf16.mxu0 %v8302_v43  ;;  %v8365_v39 = vld [vmem:[#allocation3 + $0x200] ss:$12 sps:$4 sm:$0xff]   ;;  %v8369_v43 = vld [vmem:[#allocation3 + $0x1e8] ss:$12 sps:$4 sm:$0xff]  }
  0xf0   : > { %1927 = vmatprep.subr.bf16.mxu1 %v8305_v44  ;;  %v8370_v44 = vld [vmem:[#allocation3 + $0x110] ss:$12 sps:$4 sm:$0xff]  }
  0xf2   : > { %1885 = vmatpush1.bf16.msra.mxu0 %v8300_v47  ;;  %v8372_v47 = vld [vmem:[#allocation3 + $0x50] ss:$12 sps:$4 sm:$0xff]  }
  0xf3   : > { %1928 = vmatpush1.bf16.msra.mxu1 %v8303_v49  ;;  %1886 = vmatprep.subr.bf16.mxu0 %v8308_v50  ;;  %v8373_v49 = vld [vmem:[#allocation3 + $0x1d0] ss:$12 sps:$4 sm:$0xff]   ;;  %v8376_v50 = vld [vmem:[#allocation3 + $0x38] ss:$12 sps:$4 sm:$0xff]  }
  0xf4   : > { %1929 = vmatprep.subr.bf16.mxu1 %v8311_v51  ;;  %v8377_v51 = vld [vmem:[#allocation3 + $0x1b8] ss:$12 sps:$4 sm:$0xff]  }
  0xf6   : > { %1887 = vmatpush2.bf16.msra.mxu0 %v8306_v52  ;;  %v8378_v52 = vld [vmem:[#allocation3 + $0xe0] ss:$12 sps:$4 sm:$0xff]  }
  0xf7   : > { %1930 = vmatpush2.bf16.msra.mxu1 %v8309_v55  ;;  %1888 = vmatprep.subr.bf16.mxu0 %v8314_v56  ;;  %v8379_v55 = vld [vmem:[#allocation3 + $0x260] ss:$12 sps:$4 sm:$0xff]  }
  0xf8   : > { %1931 = vmatprep.subr.bf16.mxu1 %v8317_v57  ;;  %v8380_v56 = vld [vmem:[#allocation3 + $0x20] ss:$12 sps:$4 sm:$0xff]  }
  0xf9   : > { %v8381_v57 = vld [vmem:[#allocation3 + $0x1a0] ss:$12 sps:$4 sm:$0xff]  }
  0xfa   : > { %1889 = vmatpush2.bf16.msra.mxu0 %v8312_v58  ;;  %v8382_v58 = vld [vmem:[#allocation3 + $0xc8] ss:$12 sps:$4 sm:$0xff]  }
  0xfb   : > { %1932 = vmatpush2.bf16.msra.mxu1 %v8315_v59  ;;  %1890 = vmatprep.subr.bf16.mxu0 %v8320_v60  ;;  %v8383_v59 = vld [vmem:[#allocation3 + $0x248] ss:$12 sps:$4 sm:$0xff]  }
  0xfc   : > { %1933 = vmatprep.subr.bf16.mxu1 %v8323_v61  ;;  %v8384_v60 = vld [vmem:[#allocation3 + $0x8] ss:$12 sps:$4 sm:$0xff]  }
  0xfd   : > { %v8385_v61 = vld [vmem:[#allocation3 + $0x188] ss:$12 sps:$4 sm:$0xff]  }
  0xfe   : > { %1891 = vmatpush2.bf16.msra.mxu0 %v8318_v62  ;;  %v8386_v62 = vld [vmem:[#allocation3 + $0x470] ss:$12 sps:$4 sm:$0xff]  }
  0xff   : > { %1934 = vmatpush2.bf16.msra.mxu1 %v8321_v63  ;;  %1892 = vmatprep.subr.bf16.mxu0 %v8326_v0  ;;  %v8387_v63 = vld [vmem:[#allocation3 + $0x5f0] ss:$12 sps:$4 sm:$0xff]  }
 0x100   : > { %1935 = vmatprep.subr.bf16.mxu1 %v8329_v1  ;;  %v8388_v0 = vld [vmem:[#allocation3 + $0x3b0] ss:$12 sps:$4 sm:$0xff]  }
 0x101   : > { %v8389_v1 = vld [vmem:[#allocation3 + $0x530] ss:$12 sps:$4 sm:$0xff]  }
 0x102   : > { %1893 = vmatpush2.bf16.msra.mxu0 %v8324_v2  ;;  %v8390_v2 = vld [vmem:[#allocation3 + $0x458] ss:$12 sps:$4 sm:$0xff]  }
 0x103   : > { %1936 = vmatpush2.bf16.msra.mxu1 %v8327_v3  ;;  %1894 = vmatprep.subr.bf16.mxu0 %v8332_v4  ;;  %v8391_v3 = vld [vmem:[#allocation3 + $0x5d8] ss:$12 sps:$4 sm:$0xff]  }
 0x104   : > { %1937 = vmatprep.subr.bf16.mxu1 %v8335_v5  ;;  %v8392_v4 = vld [vmem:[#allocation3 + $0x398] ss:$12 sps:$4 sm:$0xff]  }
 0x105   : > { %v8393_v5 = vld [vmem:[#allocation3 + $0x518] ss:$12 sps:$4 sm:$0xff]  }
 0x106   : > { %1895 = vmatpush2.bf16.msra.mxu0 %v8330_v6  ;;  %v8394_v6 = vld [vmem:[#allocation3 + $0x440] ss:$12 sps:$4 sm:$0xff]  }
 0x107   : > { %1938 = vmatpush2.bf16.msra.mxu1 %v8333_v7  ;;  %1896 = vmatprep.subr.bf16.mxu0 %v8338_v8  ;;  %v8395_v7 = vld [vmem:[#allocation3 + $0x5c0] ss:$12 sps:$4 sm:$0xff]  }
 0x108   : > { %1939 = vmatprep.subr.bf16.mxu1 %v8341_v9  ;;  %v8396_v8 = vld [vmem:[#allocation3 + $0x380] ss:$12 sps:$4 sm:$0xff]  }
 0x109   : > { %v8397_v9 = vld [vmem:[#allocation3 + $0x500] ss:$12 sps:$4 sm:$0xff]  }
 0x10a   : > { %1897 = vmatpush2.bf16.msra.mxu0 %v8336_v10  ;;  %v8398_v10 = vld [vmem:[#allocation3 + $0x428] ss:$12 sps:$4 sm:$0xff]  }
 0x10b   : > { %1940 = vmatpush2.bf16.msra.mxu1 %v8339_v11  ;;  %1898 = vmatprep.subr.bf16.mxu0 %v8344_v14  ;;  %v8399_v11 = vld [vmem:[#allocation3 + $0x5a8] ss:$12 sps:$4 sm:$0xff]   ;;  %v8402_v14 = vld [vmem:[#allocation3 + $0x410] ss:$12 sps:$4 sm:$0xff]  }
 0x10c   : > { %1941 = vmatprep.subr.bf16.mxu1 %v8347_v15  ;;  %v8403_v15 = vld [vmem:[#allocation3 + $0x590] ss:$12 sps:$4 sm:$0xff]  }
 0x10e   : > { %1899 = vmatpush2.bf16.msra.mxu0 %v8342_v16  ;;  %v8404_v16 = vld [vmem:[#allocation3 + $0x350] ss:$12 sps:$4 sm:$0xff]  }
 0x10f   : > { %1942 = vmatpush2.bf16.msra.mxu1 %v8345_v17  ;;  %1900 = vmatprep.subr.bf16.mxu0 %v8350_v18  ;;  %v8405_v17 = vld [vmem:[#allocation3 + $0x4d0] ss:$12 sps:$4 sm:$0xff]   ;;  %v8406_v18 = vld [vmem:[#allocation3 + $0x3f8] ss:$12 sps:$4 sm:$0xff]  }
 0x110   : > { %1943 = vmatprep.subr.bf16.mxu1 %v8353_v19  ;;  %v8409_v19 = vld [vmem:[#allocation3 + $0x4b8] ss:$12 sps:$4 sm:$0xff]  }
 0x112   : > { %1901 = vmatpush2.bf16.msra.mxu0 %v8348_v20  ;;  %v8410_v20 = vld [vmem:[#allocation3 + $0x3e0] ss:$12 sps:$4 sm:$0xff]  }
 0x113   : > { %1944 = vmatpush2.bf16.msra.mxu1 %v8351_v21  ;;  %7968 = vmatprep.subr.bf16.mxu0 %v8354_v26  ;;  %v8411_v21 = vld [vmem:[#allocation3 + $0x560] ss:$12 sps:$4 sm:$0xff]   ;;  %v8416_v26 = vld [vmem:[#allocation3 + $0x308] ss:$12 sps:$4 sm:$0xff]  }
 0x114   : > { %7990 = vmatprep.subr.bf16.mxu1 %v8355_v27  ;;  %v8417_v27 = vld [vmem:[#allocation3 + $0x488] ss:$12 sps:$4 sm:$0xff]  }
 0x115   : > { %1903 = vmatmul.mubr.bf16.vlgmr.msra.gmra.mxu0 %v9612_v29 }
 0x116   : > { %1946 = vmatmul.mubr.bf16.vlgmr.msra.gmra.mxu1 %v9614_v30  ;;  %7969 = vmatpush3.bf16.msra.mxu0 %v8356_v28  ;;  %v8420_v28 = vld [vmem:[#allocation5 + $0x1f4] ss:$8 sps:$4 sm:$0xff]  }
 0x117   : > { %7991 = vmatpush3.bf16.msra.mxu1 %v8357_v31  ;;  %7970 = vmatprep.subr.bf16.mxu0 %v8358_v32  ;;  %v8418_v31 = vld [vmem:[#allocation5 + $0x1f0] ss:$8 sps:$4 sm:$0xff]   ;;  %v8423_v32 = vld [vmem:[#allocation5 + $0x1e4] ss:$8 sps:$4 sm:$0xff]  }
 0x118   : > { %7992 = vmatprep.subr.bf16.mxu1 %v8359_v33  ;;  %1988 = vmatprep.mubr.bf16.mxu0 %v9582_v53  ;;  %v8374_v53 = vld [vmem:[#allocation3 + $0xf8] ss:$12 sps:$4 sm:$0xff]   ;;  %v8421_v33 = vld [vmem:[#allocation5 + $0x1e0] ss:$8 sps:$4 sm:$0xff]  }
 0x119   : > { %2029 = vmatprep.mubr.bf16.mxu1 %v9584_v54  ;;  %v8375_v54 = vld [vmem:[#allocation3 + $0x278] ss:$12 sps:$4 sm:$0xff]  }
 0x11a   : > { %7971 = vmatpush3.bf16.msra.mxu0 %v8360_v34  ;;  %v8426_v34 = vld [vmem:[#allocation5 + $0x1d4] ss:$8 sps:$4 sm:$0xff]  }
 0x11b   : > { %7993 = vmatpush3.bf16.msra.mxu1 %v8361_v35  ;;  %7972 = vmatprep.subr.bf16.mxu0 %v8362_v36  ;;  %v8424_v35 = vld [vmem:[#allocation5 + $0x1d0] ss:$8 sps:$4 sm:$0xff]   ;;  %v8429_v36 = vld [vmem:[#allocation5 + $0x1c4] ss:$8 sps:$4 sm:$0xff]  }
 0x11c   : > { %7994 = vmatprep.subr.bf16.mxu1 %v8363_v37  ;;  %v8427_v37 = vld [vmem:[#allocation5 + $0x1c0] ss:$8 sps:$4 sm:$0xff]  }
 0x11e   : > { %7973 = vmatpush3.bf16.msra.mxu0 %v8364_v38  ;;  %v8432_v38 = vld [vmem:[#allocation5 + $0x1b4] ss:$8 sps:$4 sm:$0xff]  }
 0x11f   : > { %7995 = vmatpush3.bf16.msra.mxu1 %v8365_v39  ;;  %7974 = vmatprep.subr.bf16.mxu0 %v8366_v40  ;;  %v8430_v39 = vld [vmem:[#allocation5 + $0x1b0] ss:$8 sps:$4 sm:$0xff]   ;;  %v8435_v40 = vld [vmem:[#allocation5 + $0x1a4] ss:$8 sps:$4 sm:$0xff]  }
 0x120   : > { %7996 = vmatprep.subr.bf16.mxu1 %v8367_v41  ;;  %v8433_v41 = vld [vmem:[#allocation5 + $0x1a0] ss:$8 sps:$4 sm:$0xff]  }
 0x122   : > { %7975 = vmatpush3.bf16.msra.mxu0 %v8368_v42  ;;  %v8436_v42 = vld [vmem:[#allocation5 + $0x190] ss:$8 sps:$4 sm:$0xff]  }
 0x123   : > { %7997 = vmatpush3.bf16.msra.mxu1 %v8369_v43  ;;  %7976 = vmatprep.subr.bf16.mxu0 %v8370_v44  ;;  %v8441_v43 = vld [vmem:[#allocation5 + $0x184] ss:$8 sps:$4 sm:$0xff]   ;;  %v8439_v44 = vld [vmem:[#allocation5 + $0x180] ss:$8 sps:$4 sm:$0xff]  }
 0x124   : > { %7998 = vmatprep.subr.bf16.mxu1 %v8371_v46  ;;  %v8444_v46 = vld [vmem:[#allocation5 + $0x274] ss:$8 sps:$4 sm:$0xff]  }
 0x126   : > { %7977 = vmatpush3.bf16.msra.mxu0 %v8372_v47  ;;  %v8442_v47 = vld [vmem:[#allocation5 + $0x270] ss:$8 sps:$4 sm:$0xff]  }
 0x127   : > { %7999 = vmatpush3.bf16.msra.mxu1 %v8373_v49  ;;  %7978 = vmatprep.subr.bf16.mxu0 %v8374_v53  ;;  %v8447_v49 = vld [vmem:[#allocation5 + $0x264] ss:$8 sps:$4 sm:$0xff]   ;;  %v8445_v53 = vld [vmem:[#allocation5 + $0x260] ss:$8 sps:$4 sm:$0xff]  }
 0x128   : > { %8000 = vmatprep.subr.bf16.mxu1 %v8375_v54  ;;  %v8450_v54 = vld [vmem:[#allocation5 + $0x254] ss:$8 sps:$4 sm:$0xff]  }
 0x12a   : > { %7979 = vmatpush3.bf16.msra.mxu0 %v8376_v50  ;;  %v8448_v50 = vld [vmem:[#allocation5 + $0x250] ss:$8 sps:$4 sm:$0xff]  }
 0x12b   : > { %8001 = vmatpush3.bf16.msra.mxu1 %v8377_v51  ;;  %7980 = vmatprep.subr.bf16.mxu0 %v8378_v52  ;;  %v8453_v51 = vld [vmem:[#allocation5 + $0x244] ss:$8 sps:$4 sm:$0xff]   ;;  %v8451_v52 = vld [vmem:[#allocation5 + $0x240] ss:$8 sps:$4 sm:$0xff]  }
 0x12c   : > { %8002 = vmatprep.subr.bf16.mxu1 %v8379_v55  ;;  %v8456_v55 = vld [vmem:[#allocation5 + $0x234] ss:$8 sps:$4 sm:$0xff]  }
 0x12e   : > { %7981 = vmatpush3.bf16.msra.mxu0 %v8380_v56  ;;  %v8454_v56 = vld [vmem:[#allocation5 + $0x230] ss:$8 sps:$4 sm:$0xff]  }
 0x12f   : > { %8003 = vmatpush3.bf16.msra.mxu1 %v8381_v57  ;;  %7982 = vmatprep.subr.bf16.mxu0 %v8382_v58  ;;  %v8459_v57 = vld [vmem:[#allocation5 + $0x224] ss:$8 sps:$4 sm:$0xff]   ;;  %v8457_v58 = vld [vmem:[#allocation5 + $0x220] ss:$8 sps:$4 sm:$0xff]  }
 0x130   : > { %8004 = vmatprep.subr.bf16.mxu1 %v8383_v59  ;;  %v8462_v59 = vld [vmem:[#allocation5 + $0x214] ss:$8 sps:$4 sm:$0xff]  }
 0x132   : > { %7983 = vmatpush3.bf16.msra.mxu0 %v8384_v60  ;;  %v8460_v60 = vld [vmem:[#allocation5 + $0x210] ss:$8 sps:$4 sm:$0xff]  }
 0x133   : > { %8005 = vmatpush3.bf16.msra.mxu1 %v8385_v61  ;;  %8012 = vmatprep.subr.bf16.mxu0 %v8386_v62  ;;  %v8465_v61 = vld [vmem:[#allocation5 + $0x204] ss:$8 sps:$4 sm:$0xff]   ;;  %v8463_v62 = vld [vmem:[#allocation5 + $0x200] ss:$8 sps:$4 sm:$0xff]  }
 0x134   : > { %8034 = vmatprep.subr.bf16.mxu1 %v8387_v63  ;;  %v8470_v63 = vld [vmem:[#allocation5 + $0x2f4] ss:$8 sps:$4 sm:$0xff]  }
 0x135   : > { %1989 = vmatmul.mubr.bf16.vlgmr.msra.gmra.mxu0 %v9592_v12  ;;  %v8400_v12 = vld [vmem:[#allocation3 + $0x368] ss:$12 sps:$4 sm:$0xff]  }
 0x136   : > { %2030 = vmatmul.mubr.bf16.vlgmr.msra.gmra.mxu1 %v9594_v13  ;;  %8013 = vmatpush3.bf16.msra.mxu0 %v8388_v0  ;;  %v8401_v13 = vld [vmem:[#allocation3 + $0x4e8] ss:$12 sps:$4 sm:$0xff]   ;;  %v8468_v0 = vld [vmem:[#allocation5 + $0x2f0] ss:$8 sps:$4 sm:$0xff]  }
 0x137   : > { %8035 = vmatpush3.bf16.msra.mxu1 %v8389_v1  ;;  %8014 = vmatprep.subr.bf16.mxu0 %v8390_v2  ;;  %v8473_v1 = vld [vmem:[#allocation5 + $0x2e4] ss:$8 sps:$4 sm:$0xff]   ;;  %v8476_v2 = vld [vmem:[#allocation5 + $0x174] ss:$8 sps:$4 sm:$0xff]  }
 0x138   : > { %8036 = vmatprep.subr.bf16.mxu1 %v8391_v3  ;;  %2070 = vmatprep.mubr.bf16.mxu0 %v9601_v45  ;;  %v8407_v45 = vld [vmem:[#allocation3 + $0x578] ss:$12 sps:$4 sm:$0xff]   ;;  %v8471_v3 = vld [vmem:[#allocation5 + $0x2e0] ss:$8 sps:$4 sm:$0xff]  }
 0x139   : > { %2111 = vmatprep.mubr.bf16.mxu1 %v9604_v48  ;;  %v8408_v48 = vld [vmem:[#allocation3 + $0x338] ss:$12 sps:$4 sm:$0xff]  }
 0x13a   : > { %8015 = vmatpush3.bf16.msra.mxu0 %v8392_v4  ;;  %v8479_v4 = vld [vmem:[#allocation5 + $0x2d4] ss:$8 sps:$4 sm:$0xff]  }
 0x13b   : > { %8037 = vmatpush3.bf16.msra.mxu1 %v8393_v5  ;;  %8016 = vmatprep.subr.bf16.mxu0 %v8394_v6  ;;  %v8477_v5 = vld [vmem:[#allocation5 + $0x2d0] ss:$8 sps:$4 sm:$0xff]   ;;  %v8485_v6 = vld [vmem:[#allocation5 + $0x2c4] ss:$8 sps:$4 sm:$0xff]  }
 0x13c   : > { %8038 = vmatprep.subr.bf16.mxu1 %v8395_v7  ;;  %v8483_v7 = vld [vmem:[#allocation5 + $0x2c0] ss:$8 sps:$4 sm:$0xff]  }
 0x13e   : > { %8017 = vmatpush3.bf16.msra.mxu0 %v8396_v8  ;;  %v8491_v8 = vld [vmem:[#allocation5 + $0x2b4] ss:$8 sps:$4 sm:$0xff]  }
 0x13f   : > { %8039 = vmatpush3.bf16.msra.mxu1 %v8397_v9  ;;  %8018 = vmatprep.subr.bf16.mxu0 %v8398_v10  ;;  %v8489_v9 = vld [vmem:[#allocation5 + $0x2b0] ss:$8 sps:$4 sm:$0xff]   ;;  %v8497_v10 = vld [vmem:[#allocation5 + $0x2a4] ss:$8 sps:$4 sm:$0xff]  }
 0x140   : > { %8040 = vmatprep.subr.bf16.mxu1 %v8399_v11  ;;  %v8495_v11 = vld [vmem:[#allocation5 + $0x2a0] ss:$8 sps:$4 sm:$0xff]  }
 0x142   : > { %8019 = vmatpush3.bf16.msra.mxu0 %v8400_v12  ;;  %v8501_v12 = vld [vmem:[#allocation5 + $0x290] ss:$8 sps:$4 sm:$0xff]  }
 0x143   : > { %8041 = vmatpush3.bf16.msra.mxu1 %v8401_v13  ;;  %8020 = vmatprep.subr.bf16.mxu0 %v8402_v14  ;;  %v8503_v13 = vld [vmem:[#allocation5 + $0x294] ss:$8 sps:$4 sm:$0xff]   ;;  %v8509_v14 = vld [vmem:[#allocation5 + $0x284] ss:$8 sps:$4 sm:$0xff]  }
 0x144   : > { %8042 = vmatprep.subr.bf16.mxu1 %v8403_v15  ;;  %v8507_v15 = vld [vmem:[#allocation5 + $0x280] ss:$8 sps:$4 sm:$0xff]  }
 0x146   : > { %8021 = vmatpush3.bf16.msra.mxu0 %v8404_v16  ;;  %v8515_v16 = vld [vmem:[#allocation5 + $0x74] ss:$8 sps:$4 sm:$0xff]  }
 0x147   : > { %8043 = vmatpush3.bf16.msra.mxu1 %v8405_v17  ;;  %8022 = vmatprep.subr.bf16.mxu0 %v8406_v18 }
 0x148   : > { %8044 = vmatprep.subr.bf16.mxu1 %v8407_v45  ;;  %v2122_v45 = vlaneseq }
 0x14a   : > { %8023 = vmatpush3.bf16.msra.mxu0 %v8408_v48 }
 0x14b   : > { %8045 = vmatpush3.bf16.msra.mxu1 %v8409_v19  ;;  %8024 = vmatprep.subr.bf16.mxu0 %v8410_v20  ;;  %v9631_v20 = vshrl.u32 %v2122_v45, 7 }
 0x14c   : > { %8046 = vmatprep.subr.bf16.mxu1 %v8411_v21 }
 0x14d   : > { %9973 = vst [vmem:[#allocation22_spill] sm:$0xff] %v9631_v20 }
 0x14e   : > { %8025 = vmatpush3.bf16.msra.mxu0 %v8412_v22 }
 0x14f   : > { %8047 = vmatpush3.bf16.msra.mxu1 %v8413_v23  ;;  %8026 = vmatprep.subr.bf16.mxu0 %v8414_v24  ;;  %v9633_v23 = vld [vmem:[#allocation8] sm:$0x7]  ;;  %v9636_v24 = vsub.s32 0, %v9631_v20 }
 0x150   : > { %8048 = vmatprep.subr.bf16.mxu1 %v8415_v25 }
 0x151   : > { %9974 = vst [vmem:[#allocation23_spill] sm:$0xff] %v9636_v24 }
 0x152   : > { %8027 = vmatpush3.bf16.msra.mxu0 %v8416_v26 }
 0x153   : > { %8049 = vmatpush3.bf16.msra.mxu1 %v8417_v27  ;;  %2596 = vmatprep.subr.bf16.mxu0 %v8420_v28  ;;  %v9638_v28 = vld [vmem:[#allocation10] sm:$0x7] }
 0x154   : > { %2639 = vmatprep.subr.bf16.mxu1 %v8470_v63 }
 0x155   : > { %2071 = vmatmul.mubr.bf16.vlgmr.msra.gmra.mxu0 %v9612_v29  ;;  %v9378_v29 = vmov 0  }
 0x156   : > { %2112 = vmatmul.mubr.bf16.vlgmr.msra.gmra.mxu1 %v9614_v30  ;;  %2597 = vmatpush1.bf16.msra.mxu0 %v8418_v31  ;;  %2172 = vst [vmem:[#allocation2] sm:$0x33] %v9378_v29  ;;  %2173 = vst [vmem:[#allocation2 + $0x8] sm:$0x3] %v9378_v29  ;;  %v8438_v30 = vld [vmem:[#allocation5 + $0x194] ss:$8 sps:$4 sm:$0xff]  }
 0x157   : > { %2598 = vmatprep.subr.bf16.mxu0 %v8423_v32  ;;  %2671 = vmatprep.mubr.bf16.mxu1 %v9378_v29  ;;  %2174 = vst [vmem:[#allocation2 + $0x18] sm:$0xcc] %v9378_v29  ;;  %2175 = vst [vmem:[#allocation2 + $0x20] sm:$0xc] %v9378_v29  ;;  %v9641_v31 = vsub.s32 1, %v9631_v20 }
 0x158   : > { %2640 = vmatpush1.bf16.msra.mxu1 %v8468_v0 }
 0x159   : > { %2641 = vmatprep.subr.bf16.mxu1 %v8473_v1  ;;  %9975 = vst [vmem:[#allocation24_spill] sm:$0xff] %v9641_v31 }
 0x15a   : > { %2599 = vmatpush1.bf16.msra.mxu0 %v8421_v33 }
 0x15b   : > { %2600 = vmatprep.subr.bf16.mxu0 %v8426_v34 }
 0x15c   : > { %2642 = vmatpush1.bf16.msra.mxu1 %v8471_v3 }
 0x15d   : > { %2643 = vmatprep.subr.bf16.mxu1 %v8479_v4 }
 0x15e   : > { %2601 = vmatpush1.bf16.msra.mxu0 %v8424_v35 }
 0x15f   : > { %2602 = vmatprep.subr.bf16.mxu0 %v8429_v36  ;;  %v2125_v36 = vrot.slane %v9633_v23, %v9636_v24 }
 0x160   : > { %2644 = vmatpush1.bf16.msra.mxu1 %v8477_v5 }
 0x161   : > { %2645 = vmatprep.subr.bf16.mxu1 %v8485_v6 }
 0x162   : > { %2603 = vmatpush1.bf16.msra.mxu0 %v8427_v37  ;;  %v2148_v37 = vrot.slane %v9638_v28, %v9636_v24 }
 0x163   : > { %2604 = vmatprep.subr.bf16.mxu0 %v8432_v38 }
 0x164   : > { %2646 = vmatpush1.bf16.msra.mxu1 %v8483_v7 }
 0x165   : > { %2647 = vmatprep.subr.bf16.mxu1 %v8491_v8 }
 0x166   : > { %2605 = vmatpush1.bf16.msra.mxu0 %v8430_v39 }
 0x167   : > { %2606 = vmatprep.subr.bf16.mxu0 %v8435_v40 }
 0x168   : > { %2648 = vmatpush1.bf16.msra.mxu1 %v8489_v9 }
 0x169   : > { %2649 = vmatprep.subr.bf16.mxu1 %v8497_v10 }
 0x16a   : > { %2607 = vmatpush1.bf16.msra.mxu0 %v8433_v41 }
 0x16b   : > { %2608 = vmatprep.subr.bf16.mxu0 %v8438_v30 }
 0x16c   : > { %2650 = vmatpush1.bf16.msra.mxu1 %v8495_v11 }
 0x16d   : > { %2651 = vmatprep.subr.bf16.mxu1 %v8503_v13 }
 0x16e   : > { %2609 = vmatpush1.bf16.msra.mxu0 %v8436_v42  ;;  %v2129_v42 = vrot.slane %v9633_v23, %v9641_v31 }
 0x16f   : > { %2610 = vmatprep.subr.bf16.mxu0 %v8441_v43  ;;  %v2152_v43 = vrot.slane %v9638_v28, %v9641_v31 }
 0x170   : > { %2652 = vmatpush1.bf16.msra.mxu1 %v8501_v12 }
 0x171   : > { %2653 = vmatprep.subr.bf16.mxu1 %v8509_v14 }
 0x172   : > { %2611 = vmatpush1.bf16.msra.mxu0 %v8439_v44 }
 0x173   : > { %2612 = vmatprep.subr.bf16.mxu0 %v8444_v46 }
 0x174   : > { %2654 = vmatpush1.bf16.msra.mxu1 %v8507_v15 }
 0x175   : > { %2985 = vmatprep.subr.bf16.mxu1 %v8515_v16 }
 0x176   : > { %2613 = vmatpush2.bf16.msra.mxu0 %v8442_v47 }
 0x177   : > { %2614 = vmatprep.subr.bf16.mxu0 %v8447_v49 }
 0x17a   : > { %2615 = vmatpush2.bf16.msra.mxu0 %v8445_v53 }
 0x17b   : > { %2616 = vmatprep.subr.bf16.mxu0 %v8450_v54 }
 0x17e   : > { %2617 = vmatpush2.bf16.msra.mxu0 %v8448_v50 }
 0x17f   : > { %2618 = vmatprep.subr.bf16.mxu0 %v8453_v51 }
 0x182   : > { %2619 = vmatpush2.bf16.msra.mxu0 %v8451_v52 }
 0x183   : > { %2620 = vmatprep.subr.bf16.mxu0 %v8456_v55 }
 0x186   : > { %2621 = vmatpush2.bf16.msra.mxu0 %v8454_v56 }
 0x187   : > { %2622 = vmatprep.subr.bf16.mxu0 %v8459_v57 }
 0x18a   : > { %2623 = vmatpush2.bf16.msra.mxu0 %v8457_v58 }
 0x18b   : > { %2624 = vmatprep.subr.bf16.mxu0 %v8462_v59 }
 0x18e   : > { %2625 = vmatpush2.bf16.msra.mxu0 %v8460_v60 }
 0x18f   : > { %2626 = vmatprep.subr.bf16.mxu0 %v8465_v61 }
 0x192   : > { %2627 = vmatpush2.bf16.msra.mxu0 %v8463_v62 }
 0x193   : > { %3028 = vmatprep.subr.bf16.mxu0 %v8476_v2 }
 0x195   : > { %v1818_v17 = vpop.f32.mrf.mxu0 }
 0x196   : > { %v1861_v18 = vpop.f32.mrf.mxu1 }
 0x197   : > { %v1820_v48 = vpop.f32.mrf.mxu0  ;;  %v1862_v27 = vadd.f32 %v1861_v18, %v1818_v17 }
 0x198   : > { %v1863_v19 = vpop.f32.mrf.mxu1 }
 0x199   : > { %v1822_v21 = vpop.f32.mrf.mxu0  ;;  %v1864_v34 = vadd.f32 %v1863_v19, %v1820_v48 }
 0x19a   : > { %v1865_v22 = vpop.f32.mrf.mxu1 }
 0x19b   : > { %v1824_v25 = vpop.f32.mrf.mxu0  ;;  %v1866_v40 = vadd.f32 %v1865_v22, %v1822_v21 }
 0x19c   : > { %v1867_v26 = vpop.f32.mrf.mxu1 }
 0x19d   : > { %v1868_v47 = vadd.f32 %v1867_v26, %v1824_v25 }
 0x1d5   : > { %v1904_v32 = vpop.f32.mrf.mxu0 }
 0x1d6   : > { %v1947_v33 = vpop.f32.mrf.mxu1  ;;  %v1905_v35 = vadd.f32 %v1904_v32, %v1862_v27  ;;  %v8474_v27 = vld [vmem:[#allocation5 + $0x170] ss:$8 sps:$4 sm:$0xff]  }
 0x1d7   : > { %v1906_v38 = vpop.f32.mrf.mxu0 }
 0x1d8   : > { %v1949_v39 = vpop.f32.mrf.mxu1  ;;  %v1948_v41 = vadd.f32 %v1947_v33, %v1905_v35  ;;  %v1907_v30 = vadd.f32 %v1906_v38, %v1864_v34  ;;  %v8482_v35 = vld [vmem:[#allocation5 + $0x164] ss:$8 sps:$4 sm:$0xff]  }
 0x1d9   : > { %v1908_v44 = vpop.f32.mrf.mxu0 }
 0x1da   : > { %v1951_v46 = vpop.f32.mrf.mxu1  ;;  %v2137_v49 = vmul.f32 %v2125_v36, %v1948_v41  ;;  %v1950_v53 = vadd.f32 %v1949_v39, %v1907_v30  ;;  %v1909_v54 = vadd.f32 %v1908_v44, %v1866_v40  ;;  %v8480_v40 = vld [vmem:[#allocation5 + $0x160] ss:$8 sps:$4 sm:$0xff]   ;;  %v8488_v41 = vld [vmem:[#allocation5 + $0x154] ss:$8 sps:$4 sm:$0xff]  }
 0x1db   : > { %v1910_v50 = vpop.f32.mrf.mxu0 }
 0x1dc   : > { %v2160_v51 = vadd.f32 %v2148_v37, %v2137_v49  ;;  %v2138_v52 = vmul.f32 %v2129_v42, %v1950_v53  ;;  %v1952_v55 = vadd.f32 %v1951_v46, %v1909_v54  ;;  %v1911_v56 = vadd.f32 %v1910_v50, %v1868_v47  ;;  %v1953_v57 = vpop.f32.mrf.mxu1  ;;  %v8486_v47 = vld [vmem:[#allocation5 + $0x150] ss:$8 sps:$4 sm:$0xff]  }
 0x1de   : > { %v2161_v58 = vadd.f32 %v2152_v43, %v2138_v52  ;;  %v2140_v59 = vmul.f32 %v2125_v36, %v1952_v55  ;;  %v1954_v60 = vadd.f32 %v1953_v57, %v1911_v56  ;;  %v2166_v61 = vmax.f32 %v2160_v51, 0.0  ;;  %v8494_v51 = vld [vmem:[#allocation5 + $0x144] ss:$8 sps:$4 sm:$0xff]   ;;  %v8492_v55 = vld [vmem:[#allocation5 + $0x140] ss:$8 sps:$4 sm:$0xff]  }
 0x1e0   : > { %v2167_v62 = vmax.f32 %v2161_v58, 0.0  ;;  %v2163_v63 = vadd.f32 %v2148_v37, %v2140_v59  ;;  %v2141_v0 = vmul.f32 %v2129_v42, %v1954_v60  ;;  %v8500_v60 = vld [vmem:[#allocation5 + $0x134] ss:$8 sps:$4 sm:$0xff]  }
 0x1e2   : > { %v7964_v1 = vpack.c.bf16 %v2167_v62, %v2166_v61  ;;  %v2164_v2 = vadd.f32 %v2152_v43, %v2141_v0  ;;  %v2169_v4 = vmax.f32 %v2163_v63, 0.0 }
 0x1e4   : > { %v2195_v3 = vrot.slane %v7964_v1, 6  ;;  %v2170_v5 = vmax.f32 %v2164_v2, 0.0  ;;  %v8498_v1 = vld [vmem:[#allocation5 + $0x130] ss:$8 sps:$4 sm:$0xff]   ;;  %v8506_v2 = vld [vmem:[#allocation5 + $0x124] ss:$8 sps:$4 sm:$0xff]  }
 0x1e6   : > { %2211 = vst [vmem:[#allocation2] sm:$0xcc] %v2195_v3  ;;  %v7966_v6 = vpack.c.bf16 %v2170_v5, %v2169_v4  ;;  %v2197_v8 = vrot.slane %v2195_v3, 4  ;;  %v8504_v5 = vld [vmem:[#allocation5 + $0x120] ss:$8 sps:$4 sm:$0xff]  }
 0x1e8   : > { %v2198_v9 = vrot.slane %v7966_v6, 6  ;;  %v8512_v6 = vld [vmem:[#allocation5 + $0x114] ss:$8 sps:$4 sm:$0xff]  }
 0x1ea   : > { %v9657_v10 = vsel %vm9651_vm2, %v2197_v8, %v2198_v9  ;;  %v2203_v11 = vrot.slane %v2198_v9, 4 }
 0x1eb   : > { %2213 = vst [vmem:[#allocation2 + $0xc] sm:$0xff] %v9657_v10 }
 0x1ec   : > { %2215 = vst [vmem:[#allocation2 + $0x18] sm:$0x33] %v2203_v11  ;;  %v8510_v11 = vld [vmem:[#allocation5 + $0x110] ss:$8 sps:$4 sm:$0xff]  }
 0x1ed   : > { %v2271_v12 = vld [vmem:[#allocation2] sm:$0xcc] }
 0x1ee   : > { %v9660_v13 = vld [vmem:[#allocation2] sm:$0xee]  ;;  %v9663_v14 = vcombine.high %v2271_v12, %v9657_v10  ;;  %v9666_v15 = vcombine.low %v2271_v12, %v9657_v10  ;;  %v8518_v12 = vld [vmem:[#allocation5 + $0x104] ss:$8 sps:$4 sm:$0xff]  }
 0x1ef   : > { %v9670_v16 = vcombine.low %v9660_v13, %v9657_v10  ;;  %v4296_v43 = vld [vmem:[#allocation2] sm:$0x88] }
 0x1f0   : > { %v2347_v48 = vrot.slane %v9663_v14, 2  ;;  %v2344_v19 = vrot.slane %v9666_v15, 2  ;;  %v7632_v54 = vcombine.high %v4296_v43, %v9657_v10  ;;  %v7631_v50 = vcombine.low %v4296_v43, %v9657_v10 }
 0x1f1   : > { %v2692_v25 = vshrl.u32 %v9670_v16, 16  ;;  %v2695_v26 = vshll.u32 %v9670_v16, 16 }
 0x1f2   : > { %v4359_v56 = vrot.slane %v7632_v54, 3  ;;  %v4356_v58 = vrot.slane %v7631_v50, 3 }
 0x1f3   : > { %v2221_v17 = vld [vmem:[#allocation2 + $0x18] sm:$0x33]  ;;  %v2694_v36 = vrot.slane %v2692_v25, 1  ;;  %v2697_v37 = vrot.slane %v2695_v26, 2 }
 0x1f4   : > { %v9672_v18 = vcombine.high %v2221_v17, %v2221_v17  ;;  %v7379_v45 = vcombine.low %v2221_v17, %v2221_v17  ;;  %v3071_v30 = vld [vmem:[#allocation2 + $0x18] sm:$0x77] }
 0x1f5   : > { %v2698_v44 = vor.u32 %v2697_v37, %v2694_v36  ;;  %v9688_v49 = vcombine.high %v3071_v30, %v3071_v30  ;;  %v9690_v53 = vcombine.low %v3071_v30, %v3071_v30  ;;  %v7984_v63 = vpop.f32.mrf.mxu0 }
 0x1f6   : > { %v2348_v21 = vrot.slane %v9672_v18, 2  ;;  %v2345_v22 = vrot.slane %v7379_v45, 2  ;;  %v2700_v32 = vshrl.u32 %v7379_v45, 16  ;;  %v2703_v39 = vshll.u32 %v7379_v45, 16  ;;  %v8006_v0 = vpop.f32.mrf.mxu1 }
 0x1f7   : > { %v4360_v57 = vrot.slane %v9688_v49, 3  ;;  %v4357_v59 = vrot.slane %v9690_v53, 3  ;;  %v7985_v3 = vpop.f32.mrf.mxu0  ;;  %v3160_v7 = vshll.u32 %v9688_v49, 16 }
 0x1f8   : > { %v9680_v33 = vsel %vm2343_vm3, %v2347_v48, %v2348_v21  ;;  %v9683_v34 = vsel %vm2343_vm3, %v2344_v19, %v2345_v22  ;;  %v2702_v38 = vrot.slane %v2700_v32, 1  ;;  %v2705_v42 = vrot.slane %v2703_v39, 2  ;;  %v8007_v4 = vpop.f32.mrf.mxu1  ;;  %v8516_v48 = vld [vmem:[#allocation5 + $0x100] ss:$8 sps:$4 sm:$0xff]   ;;  %v8526_v22 = vld [vmem:[#allocation5 + $0x374] ss:$8 sps:$4 sm:$0xff]  }
 0x1f9   : > { %2628 = vmatprep.mubr.bf16.mxu0 %v9680_v33  ;;  %v9700_v61 = vsel %vm4355_vm5, %v4359_v56, %v4360_v57  ;;  %v9703_v62 = vsel %vm4355_vm5, %v4356_v58, %v4357_v59  ;;  %v7987_v8 = vpop.f32.mrf.mxu0  ;;  %v7986_v19 = vadd.f32 %v7985_v3, %v7984_v63  ;;  %v8008_v21 = vadd.f32 %v8007_v4, %v8006_v0 }
 0x1fa   : > { %2629 = vmatmul.mubr.bf16.vlgmr.msra.gmra.mxu0 %v9683_v34  ;;  %v2706_v46 = vor.u32 %v2705_v42, %v2702_v38  ;;  %v8009_v9 = vpop.f32.mrf.mxu1 }
 0x1fb   : > { %3029 = vmatpush1.bf16.msra.mxu0 %v8474_v27  ;;  %3060 = vmatprep.mubr.bf16.mxu0 %v9378_v29  ;;  %v7988_v17 = vpop.f32.mrf.mxu0  ;;  %v9706_v27 = vsub.s32 2, %v9631_v20  ;;  %v2032_v36 = vadd.f32 %v8008_v21, %v7986_v19 }
 0x1fc   : > { %3030 = vmatprep.subr.bf16.mxu0 %v8482_v35  ;;  %v9695_v52 = vsel %vm2690_vm4, %v2698_v44, %v2706_v46  ;;  %v8010_v45 = vpop.f32.mrf.mxu1  ;;  %v7989_v37 = vadd.f32 %v7988_v17, %v7987_v8 }
 0x1fd   : > { %9978 = vst [vmem:[#allocation25_spill] sm:$0xff] %v9706_v27  ;;  %v8011_v38 = vadd.f32 %v8010_v45, %v8009_v9  ;;  %v2133_v43 = vrot.slane %v9633_v23, %v9706_v27  ;;  %v2156_v50 = vrot.slane %v9638_v28, %v9706_v27  ;;  %v2717_v9 = vshrl.u32 %v9672_v18, 16 }
 0x1fe   : > { %v3149_v45 = vshrl.u32 %v9663_v14, 16 }
 0x1ff   : > { %3031 = vmatpush1.bf16.msra.mxu0 %v8480_v40 }
 0x200   : > { %3032 = vmatprep.subr.bf16.mxu0 %v8488_v41 }
 0x203   : > { %3033 = vmatpush1.bf16.msra.mxu0 %v8486_v47  ;;  %v2035_v47 = vadd.f32 %v8011_v38, %v7989_v37  ;;  %v3151_v38 = vrot.slane %v3149_v45, 2 }
 0x204   : > { %3034 = vmatprep.subr.bf16.mxu0 %v8494_v51 }
 0x207   : > { %3035 = vmatpush1.bf16.msra.mxu0 %v8492_v55 }
 0x208   : > { %3036 = vmatprep.subr.bf16.mxu0 %v8500_v60 }
 0x20b   : > { %3037 = vmatpush1.bf16.msra.mxu0 %v8498_v1 }
 0x20c   : > { %3038 = vmatprep.subr.bf16.mxu0 %v8506_v2 }
 0x20f   : > { %3039 = vmatpush1.bf16.msra.mxu0 %v8504_v5 }
 0x210   : > { %3040 = vmatprep.subr.bf16.mxu0 %v8512_v6  ;;  %v9714_v6 = vcombine.high %v9660_v13, %v9657_v10  ;;  %v3157_v10 = vshrl.u32 %v9688_v49, 16 }
 0x212   : > { %v2712_v17 = vshll.u32 %v9714_v6, 16 }
 0x213   : > { %3041 = vmatpush1.bf16.msra.mxu0 %v8510_v11  ;;  %v2720_v11 = vshll.u32 %v9672_v18, 16  ;;  %v8513_v18 = vld [vmem:[#allocation5 + $0x70] ss:$8 sps:$4 sm:$0xff]  }
 0x214   : > { %3042 = vmatprep.subr.bf16.mxu0 %v8518_v12  ;;  %v2709_v12 = vshrl.u32 %v9714_v6, 16  ;;  %v2714_v21 = vrot.slane %v2712_v17, 2  ;;  %v8529_v17 = vld [vmem:[#allocation5 + $0x50] ss:$8 sps:$4 sm:$0xff]  }
 0x215   : > { %v8028_v25 = vpop.f32.mrf.mxu0  ;;  %v2722_v19 = vrot.slane %v2720_v11, 2 }
 0x216   : > { %v8050_v26 = vpop.f32.mrf.mxu1  ;;  %v2711_v13 = vrot.slane %v2709_v12, 1 }
 0x217   : > { %v8029_v32 = vpop.f32.mrf.mxu0  ;;  %3043 = vmatpush1.bf16.msra.mxu0 %v8516_v48  ;;  %v2719_v48 = vrot.slane %v2717_v9, 1 }
 0x218   : > { %v8051_v35 = vpop.f32.mrf.mxu1  ;;  %v8030_v39 = vadd.f32 %v8029_v32, %v8028_v25  ;;  %3425 = vmatprep.subr.bf16.mxu0 %v8526_v22  ;;  %v3152_v22 = vshll.u32 %v9663_v14, 16 }
 0x219   : > { %v8031_v40 = vpop.f32.mrf.mxu0  ;;  %v8052_v42 = vadd.f32 %v8051_v35, %v8050_v26 }
 0x21a   : > { %v8053_v41 = vpop.f32.mrf.mxu1  ;;  %v2073_v30 = vadd.f32 %v8030_v39, %v2032_v36  ;;  %v2723_v39 = vor.u32 %v2722_v19, %v2719_v48  ;;  %v8532_v48 = vld [vmem:[#allocation5 + $0x360] ss:$8 sps:$4 sm:$0xff]   ;;  %v8537_v19 = vld [vmem:[#allocation5 + $0x44] ss:$8 sps:$4 sm:$0xff]  }
 0x21b   : > { %v8032_v44 = vpop.f32.mrf.mxu0 }
 0x21c   : > { %v8054_v46 = vpop.f32.mrf.mxu1  ;;  %v2114_v54 = vadd.f32 %v8052_v42, %v2073_v30  ;;  %v8033_v51 = vadd.f32 %v8032_v44, %v8031_v40  ;;  %v3159_v40 = vrot.slane %v3157_v10, 2  ;;  %v2715_v44 = vor.u32 %v2714_v21, %v2711_v13  ;;  %v8540_v10 = vld [vmem:[#allocation5 + $0x354] ss:$8 sps:$4 sm:$0xff]   ;;  %v8538_v13 = vld [vmem:[#allocation5 + $0x350] ss:$8 sps:$4 sm:$0xff]  }
 0x21d   : > { %v8055_v57 = vadd.f32 %v8054_v46, %v8053_v41  ;;  %v3162_v41 = vrot.slane %v3160_v7, 3  ;;  %v8523_v46 = vld [vmem:[#allocation5 + $0x64] ss:$8 sps:$4 sm:$0xff]   ;;  %v8535_v7 = vld [vmem:[#allocation5 + $0x40] ss:$8 sps:$4 sm:$0xff]  }
 0x21e   : > { %v2139_v55 = vmul.f32 %v2133_v43, %v2114_v54  ;;  %v2076_v56 = vadd.f32 %v8033_v51, %v2035_v47  ;;  %v8543_v21 = vld [vmem:[#allocation5 + $0x34] ss:$8 sps:$4 sm:$0xff]  }
 0x220   : > { %v2162_v58 = vadd.f32 %v2156_v50, %v2139_v55  ;;  %v2117_v59 = vadd.f32 %v8055_v57, %v2076_v56  ;;  %v3154_v57 = vrot.slane %v3152_v22, 3  ;;  %v8546_v22 = vld [vmem:[#allocation5 + $0x344] ss:$8 sps:$4 sm:$0xff]  }
 0x222   : > { %v2168_v60 = vmax.f32 %v2162_v58, 0.0  ;;  %v2142_v63 = vmul.f32 %v2133_v43, %v2117_v59  ;;  %v2724_v59 = vsel %vm2690_vm4, %v2715_v44, %v2723_v39  ;;  %v8555_v39 = vld [vmem:[#allocation5 + $0x14] ss:$8 sps:$4 sm:$0xff]  }
 0x223   : > { %v8567_v44 = vld [vmem:[#allocation5 + $0xf4] ss:$8 sps:$4 sm:$0xff]  }
 0x224   : > { %v7965_v0 = vpack.c.bf16 %v2168_v60, %v2168_v60  ;;  %v2165_v1 = vadd.f32 %v2156_v50, %v2142_v63 }
 0x226   : > { %v2196_v2 = vrot.slane %v7965_v0, 6  ;;  %v2171_v3 = vmax.f32 %v2165_v1, 0.0  ;;  %v8521_v0 = vld [vmem:[#allocation5 + $0x60] ss:$8 sps:$4 sm:$0xff]  }
 0x228   : > { %2212 = vst [vmem:[#allocation2 + $0x8] sm:$0xc] %v2196_v2  ;;  %v7967_v23 = vpack.c.bf16 %v2171_v3, %v2171_v3  ;;  %v2200_v4 = vrot.slane %v2196_v2, 4  ;;  %v3163_v2 = vor.u32 %v3162_v41, %v3159_v40  ;;  %v8524_v3 = vld [vmem:[#allocation5 + $0x370] ss:$8 sps:$4 sm:$0xff]  }
 0x229   : > { %v8558_v40 = vld [vmem:[#allocation5 + $0x324] ss:$8 sps:$4 sm:$0xff]   ;;  %v8553_v41 = vld [vmem:[#allocation5 + $0x10] ss:$8 sps:$4 sm:$0xff]  }
 0x22a   : > { %v2201_v5 = vrot.slane %v7967_v23, 6 }
 0x22c   : > { %v2202_v28 = vsel %vm9651_vm2, %v2200_v4, %v2201_v5  ;;  %v2204_v8 = vrot.slane %v2201_v5, 4  ;;  %v8531_v4 = vld [vmem:[#allocation5 + $0x54] ss:$8 sps:$4 sm:$0xff]  }
 0x22d   : > { %2214 = vst [vmem:[#allocation2 + $0x14] sm:$0xf] %v2202_v28  ;;  %v3155_v28 = vor.u32 %v3154_v57, %v3151_v38  ;;  %v8550_v38 = vld [vmem:[#allocation5 + $0x330] ss:$8 sps:$4 sm:$0xff]  }
 0x22e   : > { %2216 = vst [vmem:[#allocation2 + $0x20] sm:$0x3] %v2204_v8  ;;  %v8534_v8 = vld [vmem:[#allocation5 + $0x364] ss:$8 sps:$4 sm:$0xff]   ;;  %v8574_v57 = vld [vmem:[#allocation5 + $0x3f0] ss:$8 sps:$4 sm:$0xff]  }
 0x22f   : > { %v2272_v26 = vld [vmem:[#allocation2 + $0x8] sm:$0xc]  ;;  %v3164_v12 = vsel %vm3130_vm6, %v3155_v28, %v3163_v2  ;;  %v8588_v2 = vld [vmem:[#allocation5 + $0x3d4] ss:$8 sps:$4 sm:$0xff]   ;;  %v8589_v28 = vld [vmem:[#allocation5 + $0xb0] ss:$8 sps:$4 sm:$0xff]  }
 0x230   : > { %v2218_v32 = vld [vmem:[#allocation2 + $0x8] sm:$0xe] }
 0x231   : > { %v4297_v30 = vld [vmem:[#allocation2 + $0x8] sm:$0x8] }
 0x234   : > { %v2220_v25 = vld [vmem:[#allocation2 + $0x14] sm:$0xf] }
 0x235   : > { %v9726_v35 = vcombine.low %v2272_v26, %v2220_v25  ;;  %v8520_v36 = vld [vmem:[#allocation2 + $0x20] ss:$0 sps:$4 sm:$0x33]   ;;  %v9728_v37 = vcombine.low %v2218_v32, %v2220_v25  ;;  %v7633_v50 = vcombine.low %v4297_v30, %v2220_v25  ;;  %v8541_v25 = vld [vmem:[#allocation5 + $0x30] ss:$8 sps:$4 sm:$0xff]  }
 0x236   : > { %v2351_v42 = vrot.slane %v8520_v36, 2  ;;  %v2734_v47 = vshrl.u32 %v8520_v36, 16  ;;  %v2737_v54 = vshll.u32 %v8520_v36, 16  ;;  %v9736_v58 = vld [vmem:[#allocation2 + $0x20] ss:$0 sps:$4 sm:$0x77]  }
 0x237   : > { %v2350_v49 = vrot.slane %v9726_v35, 2  ;;  %v2726_v43 = vshrl.u32 %v9728_v37, 16  ;;  %v2729_v14 = vshll.u32 %v9728_v37, 16  ;;  %v4362_v5 = vrot.slane %v7633_v50, 3  ;;  %v8544_v26 = vld [vmem:[#allocation5 + $0x340] ss:$8 sps:$4 sm:$0xff]  }
 0x238   : > { %v2736_v60 = vrot.slane %v2734_v47, 1  ;;  %v2739_v63 = vrot.slane %v2737_v54, 2  ;;  %v4363_v9 = vrot.slane %v9736_v58, 3  ;;  %v8549_v32 = vld [vmem:[#allocation5 + $0x24] ss:$8 sps:$4 sm:$0xff]  }
 0x239   : > { %v9734_v51 = vsel %vm2343_vm3, %v2350_v49, %v2351_v42  ;;  %v2728_v55 = vrot.slane %v2726_v43, 1  ;;  %v2731_v56 = vrot.slane %v2729_v14, 2  ;;  %v8547_v36 = vld [vmem:[#allocation5 + $0x20] ss:$8 sps:$4 sm:$0xff]   ;;  %v8561_v49 = vld [vmem:[#allocation5 + $0x4] ss:$8 sps:$4 sm:$0xff]  }
 0x23a   : > { %2672 = vmatmul.mubr.bf16.vlgmr.msra.gmra.mxu1 %v9734_v51  ;;  %v2740_v23 = vor.u32 %v2739_v63, %v2736_v60  ;;  %v9744_v45 = vsel %vm4355_vm5, %v4362_v5, %v4363_v9  ;;  %v8556_v30 = vld [vmem:[#allocation5 + $0x320] ss:$8 sps:$4 sm:$0xff]   ;;  %v8564_v42 = vld [vmem:[#allocation5 + $0x314] ss:$8 sps:$4 sm:$0xff]   ;;  %v8562_v14 = vld [vmem:[#allocation5 + $0x310] ss:$8 sps:$4 sm:$0xff]  }
 0x23b   : > { %2986 = vmatpush1.bf16.msra.mxu1 %v8513_v18  ;;  %3017 = vmatprep.mubr.bf16.mxu1 %v2724_v59  ;;  %v2732_v1 = vor.u32 %v2731_v56, %v2728_v55  ;;  %v8552_v18 = vld [vmem:[#allocation5 + $0x334] ss:$8 sps:$4 sm:$0xff]   ;;  %v8559_v43 = vld [vmem:[#allocation5] ss:$8 sps:$4 sm:$0xff]   ;;  %v8565_v47 = vld [vmem:[#allocation5 + $0xf0] ss:$8 sps:$4 sm:$0xff]  }
 0x23c   : > { %2987 = vmatprep.subr.bf16.mxu1 %v8523_v46  ;;  %v8570_v46 = vld [vmem:[#allocation5 + $0x304] ss:$8 sps:$4 sm:$0xff]   ;;  %v8568_v54 = vld [vmem:[#allocation5 + $0x300] ss:$8 sps:$4 sm:$0xff]   ;;  %v8576_v55 = vld [vmem:[#allocation5 + $0x3f4] ss:$8 sps:$4 sm:$0xff]  }
 0x23d   : > { %v2741_v11 = vsel %vm2690_vm4, %v2732_v1, %v2740_v23  ;;  %v8573_v50 = vld [vmem:[#allocation5 + $0xe4] ss:$8 sps:$4 sm:$0xff]   ;;  %v8571_v56 = vld [vmem:[#allocation5 + $0xe0] ss:$8 sps:$4 sm:$0xff]   ;;  %v8579_v59 = vld [vmem:[#allocation5 + $0xd4] ss:$8 sps:$4 sm:$0xff]  }
 0x23e   : > { %3061 = vmatmul.mubr.bf16.vlgmr.msra.gmra.mxu0 %v2741_v11  ;;  %v8582_v60 = vld [vmem:[#allocation5 + $0x3e4] ss:$8 sps:$4 sm:$0xff]   ;;  %v8577_v63 = vld [vmem:[#allocation5 + $0xd0] ss:$8 sps:$4 sm:$0xff]   ;;  %v8600_v11 = vld [vmem:[#allocation5 + $0x3b4] ss:$8 sps:$4 sm:$0xff]  }
 0x23f   : > { %2988 = vmatpush1.bf16.msra.mxu1 %v8521_v0  ;;  %3426 = vmatpush1.bf16.msra.mxu0 %v8524_v3  ;;  %v8580_v0 = vld [vmem:[#allocation5 + $0x3e0] ss:$8 sps:$4 sm:$0xff]   ;;  %v8585_v1 = vld [vmem:[#allocation5 + $0xc4] ss:$8 sps:$4 sm:$0xff]   ;;  %v8586_v23 = vld [vmem:[#allocation5 + $0x3d0] ss:$8 sps:$4 sm:$0xff]  }
 0x240   : > { %3457 = vmatprep.mubr.bf16.mxu0 %v3164_v12  ;;  %2989 = vmatprep.subr.bf16.mxu1 %v8531_v4  ;;  %v8583_v3 = vld [vmem:[#allocation5 + $0xc0] ss:$8 sps:$4 sm:$0xff]   ;;  %v8591_v4 = vld [vmem:[#allocation5 + $0xb4] ss:$8 sps:$4 sm:$0xff]   ;;  %v8594_v5 = vld [vmem:[#allocation5 + $0x3c4] ss:$8 sps:$4 sm:$0xff]  }
 0x241   : > { %3427 = vmatprep.subr.bf16.mxu0 %v8534_v8  ;;  %v8592_v8 = vld [vmem:[#allocation5 + $0x3c0] ss:$8 sps:$4 sm:$0xff]   ;;  %v8597_v9 = vld [vmem:[#allocation5 + $0xa4] ss:$8 sps:$4 sm:$0xff]  }
 0x242   : > { %v8595_v12 = vld [vmem:[#allocation5 + $0xa0] ss:$8 sps:$4 sm:$0xff]  }
 0x243   : > { %2990 = vmatpush1.bf16.msra.mxu1 %v8529_v17  ;;  %3428 = vmatpush1.bf16.msra.mxu0 %v8532_v48  ;;  %v8598_v17 = vld [vmem:[#allocation5 + $0x3b0] ss:$8 sps:$4 sm:$0xff]   ;;  %v8603_v48 = vld [vmem:[#allocation5 + $0x94] ss:$8 sps:$4 sm:$0xff]  }
 0x244   : > { %2991 = vmatprep.subr.bf16.mxu1 %v8537_v19  ;;  %3429 = vmatprep.subr.bf16.mxu0 %v8540_v10  ;;  %v8606_v19 = vld [vmem:[#allocation5 + $0x3a4] ss:$8 sps:$4 sm:$0xff]   ;;  %v8601_v10 = vld [vmem:[#allocation5 + $0x90] ss:$8 sps:$4 sm:$0xff]  }
 0x247   : > { %2992 = vmatpush1.bf16.msra.mxu1 %v8535_v7  ;;  %3430 = vmatpush1.bf16.msra.mxu0 %v8538_v13  ;;  %v8604_v7 = vld [vmem:[#allocation5 + $0x3a0] ss:$8 sps:$4 sm:$0xff]   ;;  %v8609_v13 = vld [vmem:[#allocation5 + $0x84] ss:$8 sps:$4 sm:$0xff]  }
 0x248   : > { %2993 = vmatprep.subr.bf16.mxu1 %v8543_v21  ;;  %3431 = vmatprep.subr.bf16.mxu0 %v8546_v22  ;;  %v8612_v21 = vld [vmem:[#allocation5 + $0x394] ss:$8 sps:$4 sm:$0xff]   ;;  %v3140_v22 = vshrl.u32 %v9690_v53, 16 }
 0x24b   : > { %2994 = vmatpush1.bf16.msra.mxu1 %v8541_v25  ;;  %3432 = vmatpush1.bf16.msra.mxu0 %v8544_v26  ;;  %v3143_v25 = vshll.u32 %v9690_v53, 16  ;;  %v8607_v26 = vld [vmem:[#allocation5 + $0x80] ss:$8 sps:$4 sm:$0xff]  }
 0x24c   : > { %2995 = vmatprep.subr.bf16.mxu1 %v8549_v32  ;;  %3433 = vmatprep.subr.bf16.mxu0 %v8552_v18  ;;  %v8610_v32 = vld [vmem:[#allocation5 + $0x390] ss:$8 sps:$4 sm:$0xff]   ;;  %v8618_v18 = vld [vmem:[#allocation5 + $0x474] ss:$8 sps:$4 sm:$0xff]  }
 0x24f   : > { %2996 = vmatpush1.bf16.msra.mxu1 %v8547_v36  ;;  %3434 = vmatpush1.bf16.msra.mxu0 %v8550_v38  ;;  %v3132_v36 = vshrl.u32 %v9666_v15, 16  ;;  %v3135_v38 = vshll.u32 %v9666_v15, 16 }
 0x250   : > { %2997 = vmatprep.subr.bf16.mxu1 %v8555_v39  ;;  %3435 = vmatprep.subr.bf16.mxu0 %v8558_v40  ;;  %v8615_v39 = vld [vmem:[#allocation5 + $0x384] ss:$8 sps:$4 sm:$0xff]   ;;  %v3142_v40 = vrot.slane %v3140_v22, 2 }
 0x251   : > { %v3134_v53 = vrot.slane %v3132_v36, 2  ;;  %v8665_v36 = vld [vmem:[#allocation5 + $0x4f4] ss:$8 sps:$4 sm:$0xff]  }
 0x253   : > { %2998 = vmatpush1.bf16.msra.mxu1 %v8553_v41  ;;  %3436 = vmatpush1.bf16.msra.mxu0 %v8556_v30  ;;  %v3145_v41 = vrot.slane %v3143_v25, 3  ;;  %v8616_v30 = vld [vmem:[#allocation5 + $0x470] ss:$8 sps:$4 sm:$0xff]  }
 0x254   : > { %2999 = vmatprep.subr.bf16.mxu1 %v8561_v49  ;;  %3437 = vmatprep.subr.bf16.mxu0 %v8564_v42  ;;  %v8613_v49 = vld [vmem:[#allocation5 + $0x380] ss:$8 sps:$4 sm:$0xff]   ;;  %v3137_v42 = vrot.slane %v3135_v38, 3 }
 0x256   : > { %v3138_v15 = vor.u32 %v3137_v42, %v3134_v53  ;;  %v8666_v53 = vld [vmem:[#allocation5 + $0x580] ss:$8 sps:$4 sm:$0xff]   ;;  %v3578_v42 = vrot.slane %v9714_v6, 1  ;;  %v8682_v6 = vld [vmem:[#allocation5 + $0x664] ss:$8 sps:$4 sm:$0xff]  }
 0x257   : > { %3000 = vmatpush1.bf16.msra.mxu1 %v8559_v43  ;;  %3438 = vmatpush1.bf16.msra.mxu0 %v8562_v14  ;;  %v8622_v43 = vld [vmem:[#allocation5 + $0x464] ss:$8 sps:$4 sm:$0xff]   ;;  %v8625_v14 = vld [vmem:[#allocation5 + $0x5f4] ss:$8 sps:$4 sm:$0xff]  }
 0x258   : > { %3001 = vmatprep.subr.bf16.mxu1 %v8567_v44  ;;  %3439 = vmatprep.subr.bf16.mxu0 %v8570_v46  ;;  %v3146_v44 = vor.u32 %v3145_v41, %v3142_v40  ;;  %v8620_v46 = vld [vmem:[#allocation5 + $0x460] ss:$8 sps:$4 sm:$0xff]   ;;  %v8668_v40 = vld [vmem:[#allocation5 + $0x584] ss:$8 sps:$4 sm:$0xff]  }
 0x25b   : > { %3002 = vmatpush2.bf16.msra.mxu1 %v8565_v47  ;;  %3440 = vmatpush1.bf16.msra.mxu0 %v8568_v54  ;;  %v8623_v47 = vld [vmem:[#allocation5 + $0x5f0] ss:$8 sps:$4 sm:$0xff]   ;;  %v8628_v54 = vld [vmem:[#allocation5 + $0x454] ss:$8 sps:$4 sm:$0xff]  }
 0x25c   : > { %3003 = vmatprep.subr.bf16.mxu1 %v8573_v50  ;;  %3441 = vmatprep.subr.bf16.mxu0 %v8576_v55  ;;  %v8631_v50 = vld [vmem:[#allocation5 + $0x5e4] ss:$8 sps:$4 sm:$0xff]   ;;  %v3147_v55 = vsel %vm3130_vm6, %v3138_v15, %v3146_v44  ;;  %v8676_v44 = vld [vmem:[#allocation5 + $0x674] ss:$8 sps:$4 sm:$0xff]   ;;  %v3581_v15 = vrot.slane %v9728_v37, 1 }
 0x25d   : > { %v8685_v37 = vld [vmem:[#allocation5 + $0x4c4] ss:$8 sps:$4 sm:$0xff]  }
 0x25f   : > { %3004 = vmatpush2.bf16.msra.mxu1 %v8571_v56  ;;  %3442 = vmatpush2.bf16.msra.mxu0 %v8574_v57  ;;  %v8626_v56 = vld [vmem:[#allocation5 + $0x450] ss:$8 sps:$4 sm:$0xff]   ;;  %v8634_v57 = vld [vmem:[#allocation5 + $0x444] ss:$8 sps:$4 sm:$0xff]  }
 0x260   : > { %3005 = vmatprep.subr.bf16.mxu1 %v8579_v59  ;;  %3443 = vmatprep.subr.bf16.mxu0 %v8582_v60  ;;  %v8637_v59 = vld [vmem:[#allocation5 + $0x5d4] ss:$8 sps:$4 sm:$0xff]   ;;  %v8632_v60 = vld [vmem:[#allocation5 + $0x440] ss:$8 sps:$4 sm:$0xff]  }
 0x263   : > { %3006 = vmatpush2.bf16.msra.mxu1 %v8577_v63  ;;  %3444 = vmatpush2.bf16.msra.mxu0 %v8580_v0  ;;  %v8635_v63 = vld [vmem:[#allocation5 + $0x5d0] ss:$8 sps:$4 sm:$0xff]   ;;  %v8640_v0 = vld [vmem:[#allocation5 + $0x434] ss:$8 sps:$4 sm:$0xff]  }
 0x264   : > { %3007 = vmatprep.subr.bf16.mxu1 %v8585_v1  ;;  %3445 = vmatprep.subr.bf16.mxu0 %v8588_v2  ;;  %v8643_v1 = vld [vmem:[#allocation5 + $0x5c4] ss:$8 sps:$4 sm:$0xff]   ;;  %v8638_v2 = vld [vmem:[#allocation5 + $0x430] ss:$8 sps:$4 sm:$0xff]  }
 0x267   : > { %3008 = vmatpush2.bf16.msra.mxu1 %v8583_v3  ;;  %3446 = vmatpush2.bf16.msra.mxu0 %v8586_v23  ;;  %v8641_v3 = vld [vmem:[#allocation5 + $0x5c0] ss:$8 sps:$4 sm:$0xff]   ;;  %v8646_v23 = vld [vmem:[#allocation5 + $0x424] ss:$8 sps:$4 sm:$0xff]  }
 0x268   : > { %3009 = vmatprep.subr.bf16.mxu1 %v8591_v4  ;;  %3447 = vmatprep.subr.bf16.mxu0 %v8594_v5  ;;  %v8649_v4 = vld [vmem:[#allocation5 + $0x5b4] ss:$8 sps:$4 sm:$0xff]   ;;  %v8644_v5 = vld [vmem:[#allocation5 + $0x420] ss:$8 sps:$4 sm:$0xff]  }
 0x26b   : > { %3010 = vmatpush2.bf16.msra.mxu1 %v8589_v28  ;;  %3448 = vmatpush2.bf16.msra.mxu0 %v8592_v8  ;;  %v8647_v28 = vld [vmem:[#allocation5 + $0x5b0] ss:$8 sps:$4 sm:$0xff]   ;;  %v8652_v8 = vld [vmem:[#allocation5 + $0x414] ss:$8 sps:$4 sm:$0xff]  }
 0x26c   : > { %3011 = vmatprep.subr.bf16.mxu1 %v8597_v9  ;;  %3449 = vmatprep.subr.bf16.mxu0 %v8600_v11  ;;  %v8655_v9 = vld [vmem:[#allocation5 + $0x5a4] ss:$8 sps:$4 sm:$0xff]   ;;  %v3166_v11 = vshrl.u32 %v9726_v35, 16 }
 0x26e   : > { %v3168_v22 = vrot.slane %v3166_v11, 2  ;;  %v8701_v11 = vld [vmem:[#allocation5 + $0x490] ss:$8 sps:$4 sm:$0xff]  }
 0x26f   : > { %3012 = vmatpush2.bf16.msra.mxu1 %v8595_v12  ;;  %3450 = vmatpush2.bf16.msra.mxu0 %v8598_v17  ;;  %v3169_v12 = vshll.u32 %v9726_v35, 16  ;;  %v3174_v17 = vshrl.u32 %v9736_v58, 16 }
 0x270   : > { %3013 = vmatprep.subr.bf16.mxu1 %v8603_v48  ;;  %3451 = vmatprep.subr.bf16.mxu0 %v8606_v19  ;;  %v3177_v48 = vshll.u32 %v9736_v58, 16  ;;  %v8650_v19 = vld [vmem:[#allocation5 + $0x410] ss:$8 sps:$4 sm:$0xff]  }
 0x271   : > { %v3171_v25 = vrot.slane %v3169_v12, 3  ;;  %v8659_v58 = vld [vmem:[#allocation5 + $0x590] ss:$8 sps:$4 sm:$0xff]   ;;  %v8704_v12 = vld [vmem:[#allocation5 + $0x620] ss:$8 sps:$4 sm:$0xff]  }
 0x273   : > { %3014 = vmatpush2.bf16.msra.mxu1 %v8601_v10  ;;  %3452 = vmatpush2.bf16.msra.mxu0 %v8604_v7  ;;  %v9758_v10 = vld [vmem:[#allocation2 + $0x18] sm:$0x11]  ;;  %v8653_v7 = vld [vmem:[#allocation5 + $0x5a0] ss:$8 sps:$4 sm:$0xff]   ;;  %v3172_v38 = vor.u32 %v3171_v25, %v3168_v22 }
 0x274   : > { %3015 = vmatprep.subr.bf16.mxu1 %v8609_v13  ;;  %3453 = vmatprep.subr.bf16.mxu0 %v8612_v21  ;;  %v8658_v13 = vld [vmem:[#allocation5 + $0x404] ss:$8 sps:$4 sm:$0xff]   ;;  %v8661_v21 = vld [vmem:[#allocation5 + $0x594] ss:$8 sps:$4 sm:$0xff]   ;;  %v7533_v35 = vcombine.high %v9758_v10, %v9758_v10  ;;  %v8713_v22 = vld [vmem:[#allocation5 + $0x570] ss:$8 sps:$4 sm:$0xff]  }
 0x275   : > { %v8716_v25 = vld [vmem:[#allocation5 + $0x600] ss:$8 sps:$4 sm:$0xff]  }
 0x276   : > { %v3579_v41 = vrot.slane %v7533_v35, 1  ;;  %v8719_v35 = vld [vmem:[#allocation5 + $0x560] ss:$8 sps:$4 sm:$0xff]  }
 0x277   : > { %3016 = vmatpush2.bf16.msra.mxu1 %v8607_v26  ;;  %3454 = vmatpush2.bf16.msra.mxu0 %v8610_v32  ;;  %v3176_v26 = vrot.slane %v3174_v17, 2  ;;  %v3179_v32 = vrot.slane %v3177_v48, 3  ;;  %v8709_v17 = vld [vmem:[#allocation5 + $0x484] ss:$8 sps:$4 sm:$0xff]   ;;  %v8712_v48 = vld [vmem:[#allocation5 + $0x614] ss:$8 sps:$4 sm:$0xff]  }
 0x278   : > { %3468 = vmatprep.subr.bf16.mxu1 %v8618_v18  ;;  %3455 = vmatprep.subr.bf16.mxu0 %v8615_v39  ;;  %v8656_v18 = vld [vmem:[#allocation5 + $0x400] ss:$8 sps:$4 sm:$0xff]  }
 0x279   : > { %v3180_v39 = vor.u32 %v3179_v32, %v3176_v26  ;;  %v8721_v26 = vld [vmem:[#allocation5 + $0x564] ss:$8 sps:$4 sm:$0xff]   ;;  %v8724_v32 = vld [vmem:[#allocation5 + $0x6f4] ss:$8 sps:$4 sm:$0xff]  }
 0x27a   : > { %3018 = vmatmul.mubr.bf16.vlgmr.msra.gmra.mxu1 %v9695_v52  ;;  %v8629_v52 = vld [vmem:[#allocation5 + $0x5e0] ss:$8 sps:$4 sm:$0xff]  }
 0x27b   : > { %3469 = vmatpush1.bf16.msra.mxu1 %v8616_v30  ;;  %3500 = vmatprep.mubr.bf16.mxu1 %v9378_v29  ;;  %v8673_v30 = vld [vmem:[#allocation2 + $0x20] ss:$0 sps:$4 sm:$0x11]  }
 0x27c   : > { %3456 = vmatpush2.bf16.msra.mxu0 %v8613_v49  ;;  %3470 = vmatprep.subr.bf16.mxu1 %v8622_v43  ;;  %v8663_v49 = vld [vmem:[#allocation5 + $0x4f0] ss:$8 sps:$4 sm:$0xff]   ;;  %v8672_v43 = vld [vmem:[#allocation5 + $0x4e4] ss:$8 sps:$4 sm:$0xff]  }
 0x27d   : > { %3870 = vmatprep.subr.bf16.mxu0 %v8625_v14  ;;  %v3181_v14 = vsel %vm3130_vm6, %v3172_v38, %v3180_v39  ;;  %v8725_v38 = vld [vmem:[#allocation5 + $0x550] ss:$8 sps:$4 sm:$0xff]   ;;  %v8728_v39 = vld [vmem:[#allocation5 + $0x6e0] ss:$8 sps:$4 sm:$0xff]  }
 0x27f   : > { %3458 = vmatmul.mubr.bf16.vlgmr.msra.gmra.mxu0 %v3147_v55  ;;  %3471 = vmatpush1.bf16.msra.mxu1 %v8620_v46  ;;  %v3580_v46 = vsel %vm3574_vm7, %v3578_v42, %v3579_v41  ;;  %v8679_v55 = vld [vmem:[#allocation5 + $0x4d4] ss:$8 sps:$4 sm:$0xff]   ;;  %v8742_v42 = vld [vmem:[#allocation5 + $0x6c4] ss:$8 sps:$4 sm:$0xff]  }
 0x280   : > { %3871 = vmatpush1.bf16.msra.mxu0 %v8623_v47  ;;  %3472 = vmatprep.subr.bf16.mxu1 %v8628_v54  ;;  %v3582_v47 = vrot.slane %v8673_v30, 1  ;;  %v8670_v54 = vld [vmem:[#allocation5 + $0x4e0] ss:$8 sps:$4 sm:$0xff]   ;;  %v8736_v41 = vld [vmem:[#allocation5 + $0x6d4] ss:$8 sps:$4 sm:$0xff]  }
 0x281   : > { %3872 = vmatprep.subr.bf16.mxu0 %v8631_v50  ;;  %3902 = vmatprep.mubr.bf16.mxu0 %v9378_v29  ;;  %v8674_v50 = vld [vmem:[#allocation5 + $0x670] ss:$8 sps:$4 sm:$0xff]   ;;  %v8731_v30 = vld [vmem:[#allocation5 + $0x540] ss:$8 sps:$4 sm:$0xff]  }
 0x283   : > { %3473 = vmatpush1.bf16.msra.mxu1 %v8626_v56  ;;  %v3583_v56 = vsel %vm3574_vm7, %v3581_v15, %v3582_v47  ;;  %v8743_v15 = vld [vmem:[#allocation5 + $0x520] ss:$8 sps:$4 sm:$0xff]   ;;  %v8746_v47 = vld [vmem:[#allocation5 + $0x6b0] ss:$8 sps:$4 sm:$0xff]  }
 0x284   : > { %3873 = vmatpush1.bf16.msra.mxu0 %v8629_v52  ;;  %3474 = vmatprep.subr.bf16.mxu1 %v8634_v57  ;;  %v8677_v52 = vld [vmem:[#allocation5 + $0x4d0] ss:$8 sps:$4 sm:$0xff]   ;;  %v8680_v57 = vld [vmem:[#allocation5 + $0x660] ss:$8 sps:$4 sm:$0xff]  }
 0x285   : > { %3874 = vmatprep.subr.bf16.mxu0 %v8637_v59  ;;  %v8688_v59 = vld [vmem:[#allocation5 + $0x654] ss:$8 sps:$4 sm:$0xff]  }
 0x287   : > { %3475 = vmatpush1.bf16.msra.mxu1 %v8632_v60  ;;  %v8683_v60 = vld [vmem:[#allocation5 + $0x4c0] ss:$8 sps:$4 sm:$0xff]  }
 0x288   : > { %3875 = vmatpush1.bf16.msra.mxu0 %v8635_v63  ;;  %3476 = vmatprep.subr.bf16.mxu1 %v8640_v0  ;;  %v8686_v63 = vld [vmem:[#allocation5 + $0x650] ss:$8 sps:$4 sm:$0xff]   ;;  %v8691_v0 = vld [vmem:[#allocation5 + $0x4b4] ss:$8 sps:$4 sm:$0xff]  }
 0x289   : > { %3876 = vmatprep.subr.bf16.mxu0 %v8643_v1  ;;  %v8694_v1 = vld [vmem:[#allocation5 + $0x644] ss:$8 sps:$4 sm:$0xff]  }
 0x28b   : > { %3477 = vmatpush1.bf16.msra.mxu1 %v8638_v2  ;;  %v8689_v2 = vld [vmem:[#allocation5 + $0x4b0] ss:$8 sps:$4 sm:$0xff]  }
 0x28c   : > { %3877 = vmatpush1.bf16.msra.mxu0 %v8641_v3  ;;  %3478 = vmatprep.subr.bf16.mxu1 %v8646_v23  ;;  %v8692_v3 = vld [vmem:[#allocation5 + $0x640] ss:$8 sps:$4 sm:$0xff]   ;;  %v8697_v23 = vld [vmem:[#allocation5 + $0x4a4] ss:$8 sps:$4 sm:$0xff]  }
 0x28d   : > { %3878 = vmatprep.subr.bf16.mxu0 %v8649_v4  ;;  %v8700_v4 = vld [vmem:[#allocation5 + $0x634] ss:$8 sps:$4 sm:$0xff]  }
 0x28f   : > { %3479 = vmatpush1.bf16.msra.mxu1 %v8644_v5  ;;  %v8695_v5 = vld [vmem:[#allocation5 + $0x4a0] ss:$8 sps:$4 sm:$0xff]  }
 0x290   : > { %3879 = vmatpush1.bf16.msra.mxu0 %v8647_v28  ;;  %3480 = vmatprep.subr.bf16.mxu1 %v8652_v8  ;;  %v8698_v28 = vld [vmem:[#allocation5 + $0x630] ss:$8 sps:$4 sm:$0xff]   ;;  %v8703_v8 = vld [vmem:[#allocation5 + $0x494] ss:$8 sps:$4 sm:$0xff]  }
 0x291   : > { %3880 = vmatprep.subr.bf16.mxu0 %v8655_v9  ;;  %v8706_v9 = vld [vmem:[#allocation5 + $0x624] ss:$8 sps:$4 sm:$0xff]  }
 0x293   : > { %3481 = vmatpush1.bf16.msra.mxu1 %v8650_v19  ;;  %v8707_v19 = vld [vmem:[#allocation5 + $0x480] ss:$8 sps:$4 sm:$0xff]  }
 0x294   : > { %3881 = vmatpush1.bf16.msra.mxu0 %v8653_v7  ;;  %3482 = vmatprep.subr.bf16.mxu1 %v8658_v13  ;;  %v8710_v7 = vld [vmem:[#allocation5 + $0x610] ss:$8 sps:$4 sm:$0xff]   ;;  %v8715_v13 = vld [vmem:[#allocation5 + $0x574] ss:$8 sps:$4 sm:$0xff]  }
 0x295   : > { %3882 = vmatprep.subr.bf16.mxu0 %v8661_v21  ;;  %v8718_v21 = vld [vmem:[#allocation5 + $0x604] ss:$8 sps:$4 sm:$0xff]  }
 0x297   : > { %3483 = vmatpush1.bf16.msra.mxu1 %v8656_v18  ;;  %v8722_v18 = vld [vmem:[#allocation5 + $0x6f0] ss:$8 sps:$4 sm:$0xff]  }
 0x298   : > { %3883 = vmatpush1.bf16.msra.mxu0 %v8659_v58  ;;  %3827 = vmatprep.subr.bf16.mxu1 %v8665_v36  ;;  %v8727_v58 = vld [vmem:[#allocation5 + $0x554] ss:$8 sps:$4 sm:$0xff]   ;;  %v8730_v36 = vld [vmem:[#allocation5 + $0x6e4] ss:$8 sps:$4 sm:$0xff]  }
 0x299   : > { %3884 = vmatprep.subr.bf16.mxu0 %v8668_v40  ;;  %v8733_v40 = vld [vmem:[#allocation5 + $0x544] ss:$8 sps:$4 sm:$0xff]  }
 0x29a   : > { %3501 = vmatmul.mubr.bf16.vlgmr.msra.gmra.mxu1 %v3181_v14  ;;  %v8740_v14 = vld [vmem:[#allocation5 + $0x6c0] ss:$8 sps:$4 sm:$0xff]  }
 0x29b   : > { %3828 = vmatpush1.bf16.msra.mxu1 %v8663_v49  ;;  %3859 = vmatprep.mubr.bf16.mxu1 %v3580_v46  ;;  %v8734_v49 = vld [vmem:[#allocation5 + $0x6d0] ss:$8 sps:$4 sm:$0xff]   ;;  %v8748_v46 = vld [vmem:[#allocation5 + $0x6b4] ss:$8 sps:$4 sm:$0xff]  }
 0x29c   : > { %3885 = vmatpush1.bf16.msra.mxu0 %v8666_v53  ;;  %3829 = vmatprep.subr.bf16.mxu1 %v8672_v43  ;;  %v8739_v53 = vld [vmem:[#allocation5 + $0x534] ss:$8 sps:$4 sm:$0xff]   ;;  %v8737_v43 = vld [vmem:[#allocation5 + $0x530] ss:$8 sps:$4 sm:$0xff]  }
 0x29d   : > { %4206 = vmatprep.subr.bf16.mxu0 %v8676_v44  ;;  %v8745_v44 = vld [vmem:[#allocation5 + $0x524] ss:$8 sps:$4 sm:$0xff]  }
 0x29f   : > { %3903 = vmatmul.mubr.bf16.vlgmr.msra.gmra.mxu0 %v3583_v56  ;;  %3830 = vmatpush1.bf16.msra.mxu1 %v8670_v54  ;;  %v8751_v54 = vld [vmem:[#allocation5 + $0x514] ss:$8 sps:$4 sm:$0xff]   ;;  %v8757_v56 = vld [vmem:[#allocation5 + $0x504] ss:$8 sps:$4 sm:$0xff]  }
 0x2a0   : > { %4207 = vmatpush1.bf16.msra.mxu0 %v8674_v50  ;;  %4238 = vmatprep.mubr.bf16.mxu0 %v9680_v33  ;;  %v8754_v50 = vld [vmem:[#allocation5 + $0x6a4] ss:$8 sps:$4 sm:$0xff]  }
 0x2a1   : > { %3831 = vmatprep.subr.bf16.mxu1 %v8679_v55  ;;  %4208 = vmatprep.subr.bf16.mxu0 %v8682_v6  ;;  %v8749_v55 = vld [vmem:[#allocation5 + $0x510] ss:$8 sps:$4 sm:$0xff]   ;;  %v8752_v6 = vld [vmem:[#allocation5 + $0x6a0] ss:$8 sps:$4 sm:$0xff]  }
 0x2a3   : > { %3832 = vmatpush1.bf16.msra.mxu1 %v8677_v52  ;;  %v8760_v52 = vld [vmem:[#allocation5 + $0x694] ss:$8 sps:$4 sm:$0xff]  }
 0x2a4   : > { %4209 = vmatpush1.bf16.msra.mxu0 %v8680_v57  ;;  %3833 = vmatprep.subr.bf16.mxu1 %v8685_v37  ;;  %v7532_v57 = vcombine.low %v9758_v10, %v9758_v10  ;;  %v8755_v37 = vld [vmem:[#allocation5 + $0x500] ss:$8 sps:$4 sm:$0xff]   ;;  %v8773_v10 = vld [vmem:[#allocation5 + $0x8f4] ss:$8 sps:$4 sm:$0xff]  }
 0x2a5   : > { %4210 = vmatprep.subr.bf16.mxu0 %v8688_v59  ;;  %v8758_v59 = vld [vmem:[#allocation5 + $0x690] ss:$8 sps:$4 sm:$0xff]  }
 0x2a7   : > { %3834 = vmatpush1.bf16.msra.mxu1 %v8683_v60  ;;  %v8767_v60 = vld [vmem:[#allocation5 + $0x774] ss:$8 sps:$4 sm:$0xff]  }
 0x2a8   : > { %4211 = vmatpush1.bf16.msra.mxu0 %v8686_v63  ;;  %3835 = vmatprep.subr.bf16.mxu1 %v8691_v0  ;;  %v3576_v63 = vrot.slane %v7532_v57, 1  ;;  %v8764_v0 = vld [vmem:[#allocation5 + $0x684] ss:$8 sps:$4 sm:$0xff]   ;;  %v8835_v57 = vld [vmem:[#allocation5 + $0x950] ss:$8 sps:$4 sm:$0xff]  }
 0x2a9   : > { %4212 = vmatprep.subr.bf16.mxu0 %v8694_v1  ;;  %v3575_v1 = vrot.slane %v9670_v16, 1  ;;  %v8779_v16 = vld [vmem:[#allocation5 + $0x8e4] ss:$8 sps:$4 sm:$0xff]  }
 0x2ab   : > { %3836 = vmatpush1.bf16.msra.mxu1 %v8689_v2  ;;  %v8765_v2 = vld [vmem:[#allocation5 + $0x770] ss:$8 sps:$4 sm:$0xff]  }
 0x2ac   : > { %4213 = vmatpush1.bf16.msra.mxu0 %v8692_v3  ;;  %3837 = vmatprep.subr.bf16.mxu1 %v8697_v23  ;;  %v8762_v3 = vld [vmem:[#allocation5 + $0x680] ss:$8 sps:$4 sm:$0xff]   ;;  %v8770_v23 = vld [vmem:[#allocation5 + $0x764] ss:$8 sps:$4 sm:$0xff]  }
 0x2ad   : > { %4214 = vmatprep.subr.bf16.mxu0 %v8700_v4  ;;  %v3577_v4 = vsel %vm3574_vm7, %v3575_v1, %v3576_v63  ;;  %v8846_v63 = vld [vmem:[#allocation5 + $0x7a4] ss:$8 sps:$4 sm:$0xff]   ;;  %v8844_v1 = vld [vmem:[#allocation5 + $0x7a0] ss:$8 sps:$4 sm:$0xff]  }
 0x2af   : > { %3838 = vmatpush1.bf16.msra.mxu1 %v8695_v5  ;;  %v8768_v5 = vld [vmem:[#allocation5 + $0x760] ss:$8 sps:$4 sm:$0xff]  }
 0x2b0   : > { %4215 = vmatpush1.bf16.msra.mxu0 %v8698_v28  ;;  %3839 = vmatprep.subr.bf16.mxu1 %v8703_v8  ;;  %v8771_v28 = vld [vmem:[#allocation5 + $0x8f0] ss:$8 sps:$4 sm:$0xff]   ;;  %v8776_v8 = vld [vmem:[#allocation5 + $0x754] ss:$8 sps:$4 sm:$0xff]  }
 0x2b1   : > { %4216 = vmatprep.subr.bf16.mxu0 %v8706_v9  ;;  %v8774_v9 = vld [vmem:[#allocation5 + $0x750] ss:$8 sps:$4 sm:$0xff]  }
 0x2b3   : > { %3840 = vmatpush1.bf16.msra.mxu1 %v8701_v11  ;;  %v8777_v11 = vld [vmem:[#allocation5 + $0x8e0] ss:$8 sps:$4 sm:$0xff]  }
 0x2b4   : > { %4217 = vmatpush1.bf16.msra.mxu0 %v8704_v12  ;;  %3841 = vmatprep.subr.bf16.mxu1 %v8709_v17  ;;  %v8782_v12 = vld [vmem:[#allocation5 + $0x744] ss:$8 sps:$4 sm:$0xff]   ;;  %v8785_v17 = vld [vmem:[#allocation5 + $0x8d4] ss:$8 sps:$4 sm:$0xff]  }
 0x2b5   : > { %4218 = vmatprep.subr.bf16.mxu0 %v8712_v48  ;;  %v8780_v48 = vld [vmem:[#allocation5 + $0x740] ss:$8 sps:$4 sm:$0xff]  }
 0x2b7   : > { %3842 = vmatpush1.bf16.msra.mxu1 %v8707_v19  ;;  %v8783_v19 = vld [vmem:[#allocation5 + $0x8d0] ss:$8 sps:$4 sm:$0xff]  }
 0x2b8   : > { %4219 = vmatpush1.bf16.msra.mxu0 %v8710_v7  ;;  %3843 = vmatprep.subr.bf16.mxu1 %v8715_v13  ;;  %v8788_v7 = vld [vmem:[#allocation5 + $0x734] ss:$8 sps:$4 sm:$0xff]   ;;  %v8791_v13 = vld [vmem:[#allocation5 + $0x8c4] ss:$8 sps:$4 sm:$0xff]  }
 0x2b9   : > { %4220 = vmatprep.subr.bf16.mxu0 %v8718_v21  ;;  %v8786_v21 = vld [vmem:[#allocation5 + $0x730] ss:$8 sps:$4 sm:$0xff]  }
 0x2bb   : > { %3844 = vmatpush2.bf16.msra.mxu1 %v8713_v22  ;;  %v8789_v22 = vld [vmem:[#allocation5 + $0x8c0] ss:$8 sps:$4 sm:$0xff]  }
 0x2bc   : > { %4221 = vmatpush1.bf16.msra.mxu0 %v8716_v25  ;;  %3845 = vmatprep.subr.bf16.mxu1 %v8721_v26  ;;  %v8794_v25 = vld [vmem:[#allocation5 + $0x724] ss:$8 sps:$4 sm:$0xff]   ;;  %v8797_v26 = vld [vmem:[#allocation5 + $0x8b4] ss:$8 sps:$4 sm:$0xff]  }
 0x2bd   : > { %4222 = vmatprep.subr.bf16.mxu0 %v8724_v32  ;;  %v8792_v32 = vld [vmem:[#allocation5 + $0x720] ss:$8 sps:$4 sm:$0xff]  }
 0x2bf   : > { %3846 = vmatpush2.bf16.msra.mxu1 %v8719_v35  ;;  %v8795_v35 = vld [vmem:[#allocation5 + $0x8b0] ss:$8 sps:$4 sm:$0xff]  }
 0x2c0   : > { %4223 = vmatpush2.bf16.msra.mxu0 %v8722_v18  ;;  %3847 = vmatprep.subr.bf16.mxu1 %v8727_v58  ;;  %v8800_v18 = vld [vmem:[#allocation5 + $0x714] ss:$8 sps:$4 sm:$0xff]   ;;  %v8803_v58 = vld [vmem:[#allocation5 + $0x8a4] ss:$8 sps:$4 sm:$0xff]  }
 0x2c1   : > { %4224 = vmatprep.subr.bf16.mxu0 %v8730_v36  ;;  %v8798_v36 = vld [vmem:[#allocation5 + $0x710] ss:$8 sps:$4 sm:$0xff]  }
 0x2c3   : > { %3848 = vmatpush2.bf16.msra.mxu1 %v8725_v38  ;;  %v8801_v38 = vld [vmem:[#allocation5 + $0x8a0] ss:$8 sps:$4 sm:$0xff]  }
 0x2c4   : > { %4225 = vmatpush2.bf16.msra.mxu0 %v8728_v39  ;;  %3849 = vmatprep.subr.bf16.mxu1 %v8733_v40  ;;  %v8806_v39 = vld [vmem:[#allocation5 + $0x704] ss:$8 sps:$4 sm:$0xff]   ;;  %v8809_v40 = vld [vmem:[#allocation5 + $0x894] ss:$8 sps:$4 sm:$0xff]  }
 0x2c5   : > { %4226 = vmatprep.subr.bf16.mxu0 %v8736_v41  ;;  %v8804_v41 = vld [vmem:[#allocation5 + $0x700] ss:$8 sps:$4 sm:$0xff]  }
 0x2c7   : > { %3850 = vmatpush2.bf16.msra.mxu1 %v8731_v30  ;;  %v8807_v30 = vld [vmem:[#allocation5 + $0x890] ss:$8 sps:$4 sm:$0xff]  }
 0x2c8   : > { %4227 = vmatpush2.bf16.msra.mxu0 %v8734_v49  ;;  %3851 = vmatprep.subr.bf16.mxu1 %v8739_v53  ;;  %v8812_v49 = vld [vmem:[#allocation5 + $0x7f4] ss:$8 sps:$4 sm:$0xff]   ;;  %v8815_v53 = vld [vmem:[#allocation5 + $0x884] ss:$8 sps:$4 sm:$0xff]  }
 0x2c9   : > { %4228 = vmatprep.subr.bf16.mxu0 %v8742_v42  ;;  %v8810_v42 = vld [vmem:[#allocation5 + $0x7f0] ss:$8 sps:$4 sm:$0xff]  }
 0x2cb   : > { %3852 = vmatpush2.bf16.msra.mxu1 %v8737_v43  ;;  %v8813_v43 = vld [vmem:[#allocation5 + $0x880] ss:$8 sps:$4 sm:$0xff]  }
 0x2cc   : > { %4229 = vmatpush2.bf16.msra.mxu0 %v8740_v14  ;;  %3853 = vmatprep.subr.bf16.mxu1 %v8745_v44  ;;  %v8818_v14 = vld [vmem:[#allocation5 + $0x7e4] ss:$8 sps:$4 sm:$0xff]   ;;  %v8822_v44 = vld [vmem:[#allocation5 + $0x974] ss:$8 sps:$4 sm:$0xff]  }
 0x2cd   : > { %4230 = vmatprep.subr.bf16.mxu0 %v8748_v46  ;;  %v8816_v46 = vld [vmem:[#allocation5 + $0x7e0] ss:$8 sps:$4 sm:$0xff]  }
 0x2cf   : > { %3854 = vmatpush2.bf16.msra.mxu1 %v8743_v15  ;;  %v8820_v15 = vld [vmem:[#allocation5 + $0x970] ss:$8 sps:$4 sm:$0xff]  }
 0x2d0   : > { %4231 = vmatpush2.bf16.msra.mxu0 %v8746_v47  ;;  %3855 = vmatprep.subr.bf16.mxu1 %v8751_v54  ;;  %v8828_v47 = vld [vmem:[#allocation5 + $0x7d4] ss:$8 sps:$4 sm:$0xff]   ;;  %v8831_v54 = vld [vmem:[#allocation5 + $0x964] ss:$8 sps:$4 sm:$0xff]  }
 0x2d1   : > { %4232 = vmatprep.subr.bf16.mxu0 %v8754_v50  ;;  %v8825_v50 = vld [vmem:[#allocation2 + $0x4] ss:$12 sps:$4 sm:$0xff]  }
 0x2d3   : > { %3856 = vmatpush2.bf16.msra.mxu1 %v8749_v55  ;;  %v8826_v55 = vld [vmem:[#allocation5 + $0x7d0] ss:$8 sps:$4 sm:$0xff]  }
 0x2d4   : > { %4233 = vmatpush2.bf16.msra.mxu0 %v8752_v6  ;;  %3857 = vmatprep.subr.bf16.mxu1 %v8757_v56  ;;  %v8829_v6 = vld [vmem:[#allocation5 + $0x960] ss:$8 sps:$4 sm:$0xff]   ;;  %v8834_v56 = vld [vmem:[#allocation5 + $0x7c4] ss:$8 sps:$4 sm:$0xff]  }
 0x2d5   : > { %4234 = vmatprep.subr.bf16.mxu0 %v8760_v52  ;;  %v8837_v52 = vld [vmem:[#allocation5 + $0x954] ss:$8 sps:$4 sm:$0xff]  }
 0x2d7   : > { %3858 = vmatpush2.bf16.msra.mxu1 %v8755_v37  ;;  %v8840_v37 = vld [vmem:[#allocation5 + $0x7b4] ss:$8 sps:$4 sm:$0xff]  }
 0x2d8   : > { %4235 = vmatpush2.bf16.msra.mxu0 %v8758_v59  ;;  %4249 = vmatprep.subr.bf16.mxu1 %v8767_v60  ;;  %v8843_v59 = vld [vmem:[#allocation5 + $0x944] ss:$8 sps:$4 sm:$0xff]   ;;  %v8838_v60 = vld [vmem:[#allocation5 + $0x7b0] ss:$8 sps:$4 sm:$0xff]  }
 0x2d9   : > { %4236 = vmatprep.subr.bf16.mxu0 %v8764_v0  ;;  %v8849_v0 = vld [vmem:[#allocation5 + $0x934] ss:$8 sps:$4 sm:$0xff]  }
 0x2da   : > { %3860 = vmatmul.mubr.bf16.vlgmr.msra.gmra.mxu1 %v3577_v4  ;;  %v8850_v4 = vld [vmem:[#allocation5 + $0x790] ss:$8 sps:$4 sm:$0xff]  }
 0x2db   : > { %4250 = vmatpush1.bf16.msra.mxu1 %v8765_v2  ;;  %4281 = vmatprep.mubr.bf16.mxu1 %v9378_v29  ;;  %v8847_v2 = vld [vmem:[#allocation5 + $0x930] ss:$8 sps:$4 sm:$0xff]  }
 0x2dc   : > { %4237 = vmatpush2.bf16.msra.mxu0 %v8762_v3  ;;  %4251 = vmatprep.subr.bf16.mxu1 %v8770_v23  ;;  %v8852_v3 = vld [vmem:[#allocation5 + $0x794] ss:$8 sps:$4 sm:$0xff]   ;;  %v8855_v23 = vld [vmem:[#allocation5 + $0x924] ss:$8 sps:$4 sm:$0xff]  }
 0x2dd   : > { %4651 = vmatprep.subr.bf16.mxu0 %v8773_v10  ;;  %v8853_v10 = vld [vmem:[#allocation5 + $0x920] ss:$8 sps:$4 sm:$0xff]  }
 0x2df   : > { %4239 = vmatmul.mubr.bf16.vlgmr.msra.gmra.mxu0 %v9683_v34  ;;  %4252 = vmatpush1.bf16.msra.mxu1 %v8768_v5  ;;  %v8858_v5 = vld [vmem:[#allocation5 + $0x784] ss:$8 sps:$4 sm:$0xff]  }
 0x2e0   : > { %4652 = vmatpush1.bf16.msra.mxu0 %v8771_v28  ;;  %4253 = vmatprep.subr.bf16.mxu1 %v8776_v8  ;;  %v8861_v28 = vld [vmem:[#allocation5 + $0x914] ss:$8 sps:$4 sm:$0xff]   ;;  %v8856_v8 = vld [vmem:[#allocation5 + $0x780] ss:$8 sps:$4 sm:$0xff]  }
 0x2e1   : > { %4653 = vmatprep.subr.bf16.mxu0 %v8779_v16  ;;  %4683 = vmatprep.mubr.bf16.mxu0 %v9378_v29  ;;  %v8859_v16 = vld [vmem:[#allocation5 + $0x910] ss:$8 sps:$4 sm:$0xff]  }
 0x2e3   : > { %4254 = vmatpush1.bf16.msra.mxu1 %v8774_v9  ;;  %v8864_v9 = vld [vmem:[#allocation5 + $0x874] ss:$8 sps:$4 sm:$0xff]  }
 0x2e4   : > { %4654 = vmatpush1.bf16.msra.mxu0 %v8777_v11  ;;  %4255 = vmatprep.subr.bf16.mxu1 %v8782_v12  ;;  %v8867_v11 = vld [vmem:[#allocation5 + $0x904] ss:$8 sps:$4 sm:$0xff]   ;;  %v8862_v12 = vld [vmem:[#allocation5 + $0x870] ss:$8 sps:$4 sm:$0xff]  }
 0x2e5   : > { %4655 = vmatprep.subr.bf16.mxu0 %v8785_v17  ;;  %v8865_v17 = vld [vmem:[#allocation5 + $0x900] ss:$8 sps:$4 sm:$0xff]  }
 0x2e7   : > { %4256 = vmatpush1.bf16.msra.mxu1 %v8780_v48  ;;  %v8870_v48 = vld [vmem:[#allocation5 + $0x864] ss:$8 sps:$4 sm:$0xff]  }
 0x2e8   : > { %4656 = vmatpush1.bf16.msra.mxu0 %v8783_v19  ;;  %4257 = vmatprep.subr.bf16.mxu1 %v8788_v7  ;;  %v8873_v19 = vld [vmem:[#allocation5 + $0x9f4] ss:$8 sps:$4 sm:$0xff]   ;;  %v8868_v7 = vld [vmem:[#allocation5 + $0x860] ss:$8 sps:$4 sm:$0xff]  }
 0x2e9   : > { %4657 = vmatprep.subr.bf16.mxu0 %v8791_v13  ;;  %v8871_v13 = vld [vmem:[#allocation5 + $0x9f0] ss:$8 sps:$4 sm:$0xff]  }
 0x2eb   : > { %4258 = vmatpush1.bf16.msra.mxu1 %v8786_v21  ;;  %v8876_v21 = vld [vmem:[#allocation5 + $0x854] ss:$8 sps:$4 sm:$0xff]  }
 0x2ec   : > { %4658 = vmatpush1.bf16.msra.mxu0 %v8789_v22  ;;  %4259 = vmatprep.subr.bf16.mxu1 %v8794_v25  ;;  %v8879_v22 = vld [vmem:[#allocation5 + $0x9e4] ss:$8 sps:$4 sm:$0xff]   ;;  %v8874_v25 = vld [vmem:[#allocation5 + $0x850] ss:$8 sps:$4 sm:$0xff]  }
 0x2ed   : > { %4659 = vmatprep.subr.bf16.mxu0 %v8797_v26  ;;  %v8877_v26 = vld [vmem:[#allocation5 + $0x9e0] ss:$8 sps:$4 sm:$0xff]  }
 0x2ef   : > { %4260 = vmatpush1.bf16.msra.mxu1 %v8792_v32  ;;  %v8882_v32 = vld [vmem:[#allocation5 + $0x844] ss:$8 sps:$4 sm:$0xff]  }
 0x2f0   : > { %4660 = vmatpush1.bf16.msra.mxu0 %v8795_v35  ;;  %4261 = vmatprep.subr.bf16.mxu1 %v8800_v18  ;;  %v8885_v35 = vld [vmem:[#allocation5 + $0x9d4] ss:$8 sps:$4 sm:$0xff]   ;;  %v8880_v18 = vld [vmem:[#allocation5 + $0x840] ss:$8 sps:$4 sm:$0xff]  }
 0x2f1   : > { %4661 = vmatprep.subr.bf16.mxu0 %v8803_v58  ;;  %v8883_v58 = vld [vmem:[#allocation5 + $0x9d0] ss:$8 sps:$4 sm:$0xff]  }
 0x2f3   : > { %4262 = vmatpush1.bf16.msra.mxu1 %v8798_v36  ;;  %v8888_v36 = vld [vmem:[#allocation5 + $0x834] ss:$8 sps:$4 sm:$0xff]  }
 0x2f4   : > { %4662 = vmatpush1.bf16.msra.mxu0 %v8801_v38  ;;  %4263 = vmatprep.subr.bf16.mxu1 %v8806_v39  ;;  %v8891_v38 = vld [vmem:[#allocation5 + $0x9c4] ss:$8 sps:$4 sm:$0xff]   ;;  %v8886_v39 = vld [vmem:[#allocation5 + $0x830] ss:$8 sps:$4 sm:$0xff]  }
 0x2f5   : > { %4663 = vmatprep.subr.bf16.mxu0 %v8809_v40  ;;  %v8889_v40 = vld [vmem:[#allocation5 + $0x9c0] ss:$8 sps:$4 sm:$0xff]  }
 0x2f7   : > { %4264 = vmatpush1.bf16.msra.mxu1 %v8804_v41  ;;  %v8894_v41 = vld [vmem:[#allocation5 + $0x824] ss:$8 sps:$4 sm:$0xff]  }
 0x2f8   : > { %4664 = vmatpush1.bf16.msra.mxu0 %v8807_v30  ;;  %4608 = vmatprep.subr.bf16.mxu1 %v8812_v49  ;;  %v8897_v30 = vld [vmem:[#allocation5 + $0x9b4] ss:$8 sps:$4 sm:$0xff]   ;;  %v8892_v49 = vld [vmem:[#allocation5 + $0x820] ss:$8 sps:$4 sm:$0xff]  }
 0x2f9   : > { %4665 = vmatprep.subr.bf16.mxu0 %v8815_v53  ;;  %v8895_v53 = vld [vmem:[#allocation5 + $0x9b0] ss:$8 sps:$4 sm:$0xff]  }
 0x2fa   : > { %4282 = vmatmul.mubr.bf16.vlgmr.msra.gmra.mxu1 %v9734_v51 }
 0x2fb   : > { %4609 = vmatpush1.bf16.msra.mxu1 %v8810_v42  ;;  %4640 = vmatprep.mubr.bf16.mxu1 %v9700_v61  ;;  %v8832_v61 = vld [vmem:[#allocation5 + $0x7c0] ss:$8 sps:$4 sm:$0xff]   ;;  %v8900_v42 = vld [vmem:[#allocation5 + $0x814] ss:$8 sps:$4 sm:$0xff]  }
 0x2fc   : > { %4666 = vmatpush1.bf16.msra.mxu0 %v8813_v43  ;;  %4610 = vmatprep.subr.bf16.mxu1 %v8818_v14  ;;  %v8903_v43 = vld [vmem:[#allocation5 + $0x9a4] ss:$8 sps:$4 sm:$0xff]   ;;  %v8898_v14 = vld [vmem:[#allocation5 + $0x810] ss:$8 sps:$4 sm:$0xff]  }
 0x2fd   : > { %5007 = vmatprep.subr.bf16.mxu0 %v8822_v44  ;;  %v8901_v44 = vld [vmem:[#allocation5 + $0x9a0] ss:$8 sps:$4 sm:$0xff]  }
 0x2ff   : > { %4684 = vmatmul.mubr.bf16.vlgmr.msra.gmra.mxu0 %v9744_v45  ;;  %4611 = vmatpush1.bf16.msra.mxu1 %v8816_v46  ;;  %v8841_v45 = vld [vmem:[#allocation5 + $0x940] ss:$8 sps:$4 sm:$0xff]   ;;  %v8906_v46 = vld [vmem:[#allocation5 + $0x804] ss:$8 sps:$4 sm:$0xff]  }
 0x300   : > { %5008 = vmatpush1.bf16.msra.mxu0 %v8820_v15  ;;  %5039 = vmatprep.mubr.bf16.mxu0 %v8825_v50  ;;  %v8909_v15 = vld [vmem:[#allocation5 + $0x994] ss:$8 sps:$4 sm:$0xff]  }
 0x301   : > { %4612 = vmatprep.subr.bf16.mxu1 %v8828_v47  ;;  %5009 = vmatprep.subr.bf16.mxu0 %v8831_v54  ;;  %v8904_v47 = vld [vmem:[#allocation5 + $0x800] ss:$8 sps:$4 sm:$0xff]   ;;  %v8907_v54 = vld [vmem:[#allocation5 + $0x990] ss:$8 sps:$4 sm:$0xff]   ;;  %v8915_v50 = vld [vmem:[#allocation5 + $0xa74] ss:$8 sps:$4 sm:$0xff]  }
 0x303   : > { %4613 = vmatpush1.bf16.msra.mxu1 %v8826_v55  ;;  %v8912_v55 = vld [vmem:[#allocation5 + $0x984] ss:$8 sps:$4 sm:$0xff]  }
 0x304   : > { %5010 = vmatpush1.bf16.msra.mxu0 %v8829_v6  ;;  %4614 = vmatprep.subr.bf16.mxu1 %v8834_v56  ;;  %v8913_v6 = vld [vmem:[#allocation5 + $0xa70] ss:$8 sps:$4 sm:$0xff]   ;;  %v8910_v56 = vld [vmem:[#allocation5 + $0x980] ss:$8 sps:$4 sm:$0xff]  }
 0x305   : > { %5011 = vmatprep.subr.bf16.mxu0 %v8837_v52  ;;  %v8918_v52 = vld [vmem:[#allocation5 + $0xa64] ss:$8 sps:$4 sm:$0xff]  }
 0x307   : > { %4615 = vmatpush1.bf16.msra.mxu1 %v8832_v61  ;;  %v8921_v61 = vld [vmem:[#allocation5 + $0xbf4] ss:$8 sps:$4 sm:$0xff]  }
 0x308   : > { %5012 = vmatpush1.bf16.msra.mxu0 %v8835_v57  ;;  %4616 = vmatprep.subr.bf16.mxu1 %v8840_v37  ;;  %v8916_v57 = vld [vmem:[#allocation5 + $0xa60] ss:$8 sps:$4 sm:$0xff]   ;;  %v8919_v37 = vld [vmem:[#allocation5 + $0xbf0] ss:$8 sps:$4 sm:$0xff]  }
 0x309   : > { %5013 = vmatprep.subr.bf16.mxu0 %v8843_v59  ;;  %v8924_v59 = vld [vmem:[#allocation5 + $0xa54] ss:$8 sps:$4 sm:$0xff]  }
 0x30b   : > { %4617 = vmatpush1.bf16.msra.mxu1 %v8838_v60  ;;  %v8823_v60 = vld [vmem:[#allocation2] ss:$12 sps:$4 sm:$0xff]  }
 0x30c   : > { %5014 = vmatpush1.bf16.msra.mxu0 %v8841_v45  ;;  %4618 = vmatprep.subr.bf16.mxu1 %v8846_v63  ;;  %v8927_v45 = vld [vmem:[#allocation5 + $0xbe4] ss:$8 sps:$4 sm:$0xff]   ;;  %v8922_v63 = vld [vmem:[#allocation5 + $0xa50] ss:$8 sps:$4 sm:$0xff]  }
 0x30d   : > { %5015 = vmatprep.subr.bf16.mxu0 %v8849_v0  ;;  %v8925_v0 = vld [vmem:[#allocation5 + $0xbe0] ss:$8 sps:$4 sm:$0xff]  }
 0x30f   : > { %4619 = vmatpush1.bf16.msra.mxu1 %v8844_v1  ;;  %v8930_v1 = vld [vmem:[#allocation5 + $0xa44] ss:$8 sps:$4 sm:$0xff]  }
 0x310   : > { %5016 = vmatpush1.bf16.msra.mxu0 %v8847_v2  ;;  %4620 = vmatprep.subr.bf16.mxu1 %v8852_v3  ;;  %v8928_v2 = vld [vmem:[#allocation5 + $0xa40] ss:$8 sps:$4 sm:$0xff]   ;;  %v8931_v3 = vld [vmem:[#allocation5 + $0xbd0] ss:$8 sps:$4 sm:$0xff]  }
 0x311   : > { %5017 = vmatprep.subr.bf16.mxu0 %v8855_v23  ;;  %v8936_v23 = vld [vmem:[#allocation5 + $0xa34] ss:$8 sps:$4 sm:$0xff]  }
 0x313   : > { %4621 = vmatpush1.bf16.msra.mxu1 %v8850_v4  ;;  %v8939_v4 = vld [vmem:[#allocation5 + $0xbc4] ss:$8 sps:$4 sm:$0xff]  }
 0x314   : > { %5018 = vmatpush1.bf16.msra.mxu0 %v8853_v10  ;;  %4622 = vmatprep.subr.bf16.mxu1 %v8858_v5  ;;  %v8934_v10 = vld [vmem:[#allocation5 + $0xa30] ss:$8 sps:$4 sm:$0xff]   ;;  %v8937_v5 = vld [vmem:[#allocation5 + $0xbc0] ss:$8 sps:$4 sm:$0xff]  }
 0x315   : > { %5019 = vmatprep.subr.bf16.mxu0 %v8861_v28  ;;  %v8942_v28 = vld [vmem:[#allocation5 + $0xa24] ss:$8 sps:$4 sm:$0xff]  }
 0x317   : > { %4623 = vmatpush1.bf16.msra.mxu1 %v8856_v8  ;;  %v8945_v8 = vld [vmem:[#allocation5 + $0xbb4] ss:$8 sps:$4 sm:$0xff]  }
 0x318   : > { %5020 = vmatpush1.bf16.msra.mxu0 %v8859_v16  ;;  %4624 = vmatprep.subr.bf16.mxu1 %v8864_v9  ;;  %v8940_v16 = vld [vmem:[#allocation5 + $0xa20] ss:$8 sps:$4 sm:$0xff]   ;;  %v8943_v9 = vld [vmem:[#allocation5 + $0xbb0] ss:$8 sps:$4 sm:$0xff]  }
 0x319   : > { %5021 = vmatprep.subr.bf16.mxu0 %v8867_v11  ;;  %v8948_v11 = vld [vmem:[#allocation5 + $0xa14] ss:$8 sps:$4 sm:$0xff]  }
 0x31b   : > { %4625 = vmatpush2.bf16.msra.mxu1 %v8862_v12  ;;  %v8951_v12 = vld [vmem:[#allocation5 + $0xba4] ss:$8 sps:$4 sm:$0xff]  }
 0x31c   : > { %5022 = vmatpush1.bf16.msra.mxu0 %v8865_v17  ;;  %4626 = vmatprep.subr.bf16.mxu1 %v8870_v48  ;;  %v8946_v17 = vld [vmem:[#allocation5 + $0xa10] ss:$8 sps:$4 sm:$0xff]   ;;  %v8949_v48 = vld [vmem:[#allocation5 + $0xba0] ss:$8 sps:$4 sm:$0xff]  }
 0x31d   : > { %5023 = vmatprep.subr.bf16.mxu0 %v8873_v19  ;;  %v8954_v19 = vld [vmem:[#allocation5 + $0xa04] ss:$8 sps:$4 sm:$0xff]  }
 0x31f   : > { %4627 = vmatpush2.bf16.msra.mxu1 %v8868_v7  ;;  %v8957_v7 = vld [vmem:[#allocation5 + $0xb94] ss:$8 sps:$4 sm:$0xff]  }
 0x320   : > { %5024 = vmatpush2.bf16.msra.mxu0 %v8871_v13  ;;  %4628 = vmatprep.subr.bf16.mxu1 %v8876_v21  ;;  %v8952_v13 = vld [vmem:[#allocation5 + $0xa00] ss:$8 sps:$4 sm:$0xff]   ;;  %v8955_v21 = vld [vmem:[#allocation5 + $0xb90] ss:$8 sps:$4 sm:$0xff]  }
 0x321   : > { %5025 = vmatprep.subr.bf16.mxu0 %v8879_v22  ;;  %v8961_v22 = vld [vmem:[#allocation5 + $0xaf4] ss:$8 sps:$4 sm:$0xff]  }
 0x323   : > { %4629 = vmatpush2.bf16.msra.mxu1 %v8874_v25  ;;  %v8964_v25 = vld [vmem:[#allocation5 + $0xb84] ss:$8 sps:$4 sm:$0xff]  }
 0x324   : > { %5026 = vmatpush2.bf16.msra.mxu0 %v8877_v26  ;;  %4630 = vmatprep.subr.bf16.mxu1 %v8882_v32  ;;  %v8959_v26 = vld [vmem:[#allocation5 + $0xaf0] ss:$8 sps:$4 sm:$0xff]  }
 0x325   : > { %5027 = vmatprep.subr.bf16.mxu0 %v8885_v35  ;;  %v8958_v32 = vld [vmem:[#allocation2 + $0x8] ss:$12 sps:$4 sm:$0xff]   ;;  %v8962_v35 = vld [vmem:[#allocation5 + $0xb80] ss:$8 sps:$4 sm:$0xff]  }
 0x327   : > { %4631 = vmatpush2.bf16.msra.mxu1 %v8880_v18  ;;  %v8967_v18 = vld [vmem:[#allocation5 + $0xae4] ss:$8 sps:$4 sm:$0xff]  }
 0x328   : > { %5028 = vmatpush2.bf16.msra.mxu0 %v8883_v58  ;;  %4632 = vmatprep.subr.bf16.mxu1 %v8888_v36  ;;  %v8970_v58 = vld [vmem:[#allocation5 + $0xc74] ss:$8 sps:$4 sm:$0xff]   ;;  %v8965_v36 = vld [vmem:[#allocation5 + $0xae0] ss:$8 sps:$4 sm:$0xff]  }
 0x329   : > { %5029 = vmatprep.subr.bf16.mxu0 %v8891_v38  ;;  %v9782_v38 = vld [vmem:[#allocation2 + $0x18] sm:$0xff] }
 0x32b   : > { %4633 = vmatpush2.bf16.msra.mxu1 %v8886_v39  ;;  %v8968_v39 = vld [vmem:[#allocation5 + $0xc70] ss:$8 sps:$4 sm:$0xff]  }
 0x32c   : > { %5030 = vmatpush2.bf16.msra.mxu0 %v8889_v40  ;;  %4634 = vmatprep.subr.bf16.mxu1 %v8894_v41  ;;  %v8973_v40 = vld [vmem:[#allocation5 + $0xad4] ss:$8 sps:$4 sm:$0xff]   ;;  %v8976_v41 = vld [vmem:[#allocation5 + $0xc64] ss:$8 sps:$4 sm:$0xff]  }
 0x32d   : > { %5031 = vmatprep.subr.bf16.mxu0 %v8897_v30  ;;  %v9784_v30 = vld [vmem:[#allocation2 + $0xc] sm:$0xff] }
 0x32f   : > { %4635 = vmatpush2.bf16.msra.mxu1 %v8892_v49  ;;  %v7782_v49 = vcombine.high %v9784_v30, %v9782_v38 }
 0x330   : > { %5032 = vmatpush2.bf16.msra.mxu0 %v8895_v53  ;;  %4636 = vmatprep.subr.bf16.mxu1 %v8900_v42  ;;  %v8971_v53 = vld [vmem:[#allocation5 + $0xad0] ss:$8 sps:$4 sm:$0xff]   ;;  %v8979_v42 = vld [vmem:[#allocation5 + $0xac4] ss:$8 sps:$4 sm:$0xff]  }
 0x331   : > { %5033 = vmatprep.subr.bf16.mxu0 %v8903_v43  ;;  %v8982_v43 = vld [vmem:[#allocation5 + $0xc54] ss:$8 sps:$4 sm:$0xff]  }
 0x333   : > { %4637 = vmatpush2.bf16.msra.mxu1 %v8898_v14  ;;  %v8977_v14 = vld [vmem:[#allocation5 + $0xac0] ss:$8 sps:$4 sm:$0xff]  }
 0x334   : > { %5034 = vmatpush2.bf16.msra.mxu0 %v8901_v44  ;;  %4638 = vmatprep.subr.bf16.mxu1 %v8906_v46  ;;  %v8980_v44 = vld [vmem:[#allocation5 + $0xc50] ss:$8 sps:$4 sm:$0xff]   ;;  %v8985_v46 = vld [vmem:[#allocation5 + $0xab4] ss:$8 sps:$4 sm:$0xff]  }
 0x335   : > { %5035 = vmatprep.subr.bf16.mxu0 %v8909_v15  ;;  %v8988_v15 = vld [vmem:[#allocation5 + $0xc44] ss:$8 sps:$4 sm:$0xff]  }
 0x337   : > { %4639 = vmatpush2.bf16.msra.mxu1 %v8904_v47  ;;  %v8983_v47 = vld [vmem:[#allocation5 + $0xab0] ss:$8 sps:$4 sm:$0xff]  }
 0x338   : > { %5036 = vmatpush2.bf16.msra.mxu0 %v8907_v54  ;;  %5050 = vmatprep.subr.bf16.mxu1 %v8915_v50  ;;  %v8991_v54 = vld [vmem:[#allocation5 + $0xaa4] ss:$8 sps:$4 sm:$0xff]   ;;  %v8994_v50 = vld [vmem:[#allocation5 + $0xc34] ss:$8 sps:$4 sm:$0xff]  }
 0x339   : > { %5037 = vmatprep.subr.bf16.mxu0 %v8912_v55  ;;  %v8989_v55 = vld [vmem:[#allocation5 + $0xaa0] ss:$8 sps:$4 sm:$0xff]  }
 0x33a   : > { %4641 = vmatmul.mubr.bf16.vlgmr.msra.gmra.mxu1 %v9703_v62  ;;  %v8933_v62 = vld [vmem:[#allocation5 + $0xbd4] ss:$8 sps:$4 sm:$0xff]  }
 0x33b   : > { %5051 = vmatpush1.bf16.msra.mxu1 %v8913_v6  ;;  %5082 = vmatprep.mubr.bf16.mxu1 %v9378_v29  ;;  %v8992_v6 = vld [vmem:[#allocation5 + $0xc30] ss:$8 sps:$4 sm:$0xff]  }
 0x33c   : > { %5038 = vmatpush2.bf16.msra.mxu0 %v8910_v56  ;;  %5052 = vmatprep.subr.bf16.mxu1 %v8918_v52  ;;  %v8997_v56 = vld [vmem:[#allocation5 + $0xa94] ss:$8 sps:$4 sm:$0xff]   ;;  %v9000_v52 = vld [vmem:[#allocation5 + $0xc24] ss:$8 sps:$4 sm:$0xff]  }
 0x33d   : > { %5429 = vmatprep.subr.bf16.mxu0 %v8921_v61  ;;  %v8995_v61 = vld [vmem:[#allocation5 + $0xa90] ss:$8 sps:$4 sm:$0xff]  }
 0x33f   : > { %5040 = vmatmul.mubr.bf16.vlgmr.msra.gmra.mxu0 %v8823_v60  ;;  %5053 = vmatpush1.bf16.msra.mxu1 %v8916_v57  ;;  %v8998_v57 = vld [vmem:[#allocation5 + $0xc20] ss:$8 sps:$4 sm:$0xff]  }
 0x340   : > { %5430 = vmatpush1.bf16.msra.mxu0 %v8919_v37  ;;  %5054 = vmatprep.subr.bf16.mxu1 %v8924_v59  ;;  %v9003_v37 = vld [vmem:[#allocation5 + $0xa84] ss:$8 sps:$4 sm:$0xff]   ;;  %v9006_v59 = vld [vmem:[#allocation5 + $0xc14] ss:$8 sps:$4 sm:$0xff]   ;;  %v9001_v60 = vld [vmem:[#allocation5 + $0xa80] ss:$8 sps:$4 sm:$0xff]  }
 0x341   : > { %5431 = vmatprep.subr.bf16.mxu0 %v8927_v45  ;;  %5461 = vmatprep.mubr.bf16.mxu0 %v9378_v29  ;;  %v9004_v45 = vld [vmem:[#allocation5 + $0xc10] ss:$8 sps:$4 sm:$0xff]  }
 0x343   : > { %5055 = vmatpush1.bf16.msra.mxu1 %v8922_v63  ;;  %v9009_v63 = vld [vmem:[#allocation5 + $0xb74] ss:$8 sps:$4 sm:$0xff]  }
 0x344   : > { %5432 = vmatpush1.bf16.msra.mxu0 %v8925_v0  ;;  %5056 = vmatprep.subr.bf16.mxu1 %v8930_v1  ;;  %v9012_v0 = vld [vmem:[#allocation5 + $0xc04] ss:$8 sps:$4 sm:$0xff]   ;;  %v9007_v1 = vld [vmem:[#allocation5 + $0xb70] ss:$8 sps:$4 sm:$0xff]  }
 0x345   : > { %5433 = vmatprep.subr.bf16.mxu0 %v8933_v62  ;;  %v9010_v62 = vld [vmem:[#allocation5 + $0xc00] ss:$8 sps:$4 sm:$0xff]  }
 0x347   : > { %5057 = vmatpush1.bf16.msra.mxu1 %v8928_v2  ;;  %v9015_v2 = vld [vmem:[#allocation5 + $0xb64] ss:$8 sps:$4 sm:$0xff]  }
 0x348   : > { %5434 = vmatpush1.bf16.msra.mxu0 %v8931_v3  ;;  %5058 = vmatprep.subr.bf16.mxu1 %v8936_v23  ;;  %v9018_v3 = vld [vmem:[#allocation5 + $0xcf4] ss:$8 sps:$4 sm:$0xff]   ;;  %v9013_v23 = vld [vmem:[#allocation5 + $0xb60] ss:$8 sps:$4 sm:$0xff]  }
 0x349   : > { %5435 = vmatprep.subr.bf16.mxu0 %v8939_v4  ;;  %v9016_v4 = vld [vmem:[#allocation5 + $0xcf0] ss:$8 sps:$4 sm:$0xff]  }
 0x34b   : > { %5059 = vmatpush1.bf16.msra.mxu1 %v8934_v10  ;;  %v9021_v10 = vld [vmem:[#allocation5 + $0xb54] ss:$8 sps:$4 sm:$0xff]  }
 0x34c   : > { %5436 = vmatpush1.bf16.msra.mxu0 %v8937_v5  ;;  %5060 = vmatprep.subr.bf16.mxu1 %v8942_v28  ;;  %v9024_v5 = vld [vmem:[#allocation5 + $0xce4] ss:$8 sps:$4 sm:$0xff]   ;;  %v9019_v28 = vld [vmem:[#allocation5 + $0xb50] ss:$8 sps:$4 sm:$0xff]  }
 0x34d   : > { %5437 = vmatprep.subr.bf16.mxu0 %v8945_v8  ;;  %v9022_v8 = vld [vmem:[#allocation5 + $0xce0] ss:$8 sps:$4 sm:$0xff]  }
 0x34f   : > { %5061 = vmatpush1.bf16.msra.mxu1 %v8940_v16  ;;  %v9027_v16 = vld [vmem:[#allocation5 + $0xb44] ss:$8 sps:$4 sm:$0xff]  }
 0x350   : > { %5438 = vmatpush1.bf16.msra.mxu0 %v8943_v9  ;;  %5062 = vmatprep.subr.bf16.mxu1 %v8948_v11  ;;  %v9030_v9 = vld [vmem:[#allocation5 + $0xcd4] ss:$8 sps:$4 sm:$0xff]   ;;  %v9025_v11 = vld [vmem:[#allocation5 + $0xb40] ss:$8 sps:$4 sm:$0xff]  }
 0x351   : > { %5439 = vmatprep.subr.bf16.mxu0 %v8951_v12  ;;  %v9028_v12 = vld [vmem:[#allocation5 + $0xcd0] ss:$8 sps:$4 sm:$0xff]  }
 0x353   : > { %5063 = vmatpush1.bf16.msra.mxu1 %v8946_v17  ;;  %v9033_v17 = vld [vmem:[#allocation5 + $0xb34] ss:$8 sps:$4 sm:$0xff]  }
 0x354   : > { %5440 = vmatpush1.bf16.msra.mxu0 %v8949_v48  ;;  %5064 = vmatprep.subr.bf16.mxu1 %v8954_v19  ;;  %v9036_v48 = vld [vmem:[#allocation5 + $0xcc4] ss:$8 sps:$4 sm:$0xff]   ;;  %v9031_v19 = vld [vmem:[#allocation5 + $0xb30] ss:$8 sps:$4 sm:$0xff]  }
 0x355   : > { %5441 = vmatprep.subr.bf16.mxu0 %v8957_v7  ;;  %v9034_v7 = vld [vmem:[#allocation5 + $0xcc0] ss:$8 sps:$4 sm:$0xff]  }
 0x357   : > { %5065 = vmatpush1.bf16.msra.mxu1 %v8952_v13  ;;  %v9039_v13 = vld [vmem:[#allocation5 + $0xb24] ss:$8 sps:$4 sm:$0xff]  }
 0x358   : > { %5442 = vmatpush1.bf16.msra.mxu0 %v8955_v21  ;;  %5386 = vmatprep.subr.bf16.mxu1 %v8961_v22  ;;  %v9042_v21 = vld [vmem:[#allocation5 + $0xcb4] ss:$8 sps:$4 sm:$0xff]   ;;  %v9037_v22 = vld [vmem:[#allocation5 + $0xb20] ss:$8 sps:$4 sm:$0xff]  }
 0x359   : > { %5443 = vmatprep.subr.bf16.mxu0 %v8964_v25  ;;  %v9040_v25 = vld [vmem:[#allocation5 + $0xcb0] ss:$8 sps:$4 sm:$0xff]  }
 0x35a   : > { %5083 = vmatmul.mubr.bf16.vlgmr.msra.gmra.mxu1 %v8958_v32  ;;  %v9048_v32 = vld [vmem:[#allocation5 + $0xca4] ss:$8 sps:$4 sm:$0xff]  }
 0x35b   : > { %5387 = vmatpush1.bf16.msra.mxu1 %v8959_v26  ;;  %5418 = vmatprep.mubr.bf16.mxu1 %v9680_v33  ;;  %v8974_v33 = vld [vmem:[#allocation5 + $0xc60] ss:$8 sps:$4 sm:$0xff]   ;;  %v9045_v26 = vld [vmem:[#allocation5 + $0xb14] ss:$8 sps:$4 sm:$0xff]  }
 0x35c   : > { %5444 = vmatpush1.bf16.msra.mxu0 %v8962_v35  ;;  %5388 = vmatprep.subr.bf16.mxu1 %v8967_v18  ;;  %v9043_v35 = vld [vmem:[#allocation5 + $0xb10] ss:$8 sps:$4 sm:$0xff]   ;;  %v9046_v18 = vld [vmem:[#allocation5 + $0xca0] ss:$8 sps:$4 sm:$0xff]  }
 0x35d   : > { %5778 = vmatprep.subr.bf16.mxu0 %v8970_v58  ;;  %v9051_v58 = vld [vmem:[#allocation5 + $0xb04] ss:$8 sps:$4 sm:$0xff]  }
 0x35f   : > { %5462 = vmatmul.mubr.bf16.vlgmr.msra.gmra.mxu0 %v9734_v51  ;;  %5389 = vmatpush1.bf16.msra.mxu1 %v8965_v36  ;;  %v8986_v51 = vld [vmem:[#allocation5 + $0xc40] ss:$8 sps:$4 sm:$0xff]   ;;  %v9054_v36 = vld [vmem:[#allocation5 + $0xc94] ss:$8 sps:$4 sm:$0xff]  }
 0x360   : > { %5779 = vmatpush1.bf16.msra.mxu0 %v8968_v39  ;;  %5810 = vmatprep.mubr.bf16.mxu0 %v7782_v49  ;;  %v9049_v39 = vld [vmem:[#allocation5 + $0xb00] ss:$8 sps:$4 sm:$0xff]   ;;  %v9057_v49 = vld [vmem:[#allocation5 + $0xc84] ss:$8 sps:$4 sm:$0xff]  }
 0x361   : > { %5390 = vmatprep.subr.bf16.mxu1 %v8973_v40  ;;  %5780 = vmatprep.subr.bf16.mxu0 %v8976_v41  ;;  %v9052_v40 = vld [vmem:[#allocation5 + $0xc90] ss:$8 sps:$4 sm:$0xff]   ;;  %v9060_v41 = vld [vmem:[#allocation5 + $0xd74] ss:$8 sps:$4 sm:$0xff]  }
 0x363   : > { %5391 = vmatpush1.bf16.msra.mxu1 %v8971_v53  ;;  %v9058_v53 = vld [vmem:[#allocation5 + $0xd70] ss:$8 sps:$4 sm:$0xff]  }
 0x364   : > { %5781 = vmatpush1.bf16.msra.mxu0 %v8974_v33  ;;  %5392 = vmatprep.subr.bf16.mxu1 %v8979_v42  ;;  %v9055_v33 = vld [vmem:[#allocation5 + $0xc80] ss:$8 sps:$4 sm:$0xff]   ;;  %v9063_v42 = vld [vmem:[#allocation5 + $0xd64] ss:$8 sps:$4 sm:$0xff]  }
 0x365   : > { %5782 = vmatprep.subr.bf16.mxu0 %v8982_v43  ;;  %v9061_v43 = vld [vmem:[#allocation5 + $0xd60] ss:$8 sps:$4 sm:$0xff]  }
 0x367   : > { %5393 = vmatpush1.bf16.msra.mxu1 %v8977_v14  ;;  %v9066_v14 = vld [vmem:[#allocation5 + $0xd54] ss:$8 sps:$4 sm:$0xff]  }
 0x368   : > { %5783 = vmatpush1.bf16.msra.mxu0 %v8980_v44  ;;  %5394 = vmatprep.subr.bf16.mxu1 %v8985_v46  ;;  %v7781_v44 = vcombine.low %v9784_v30, %v9782_v38  ;;  %v9064_v46 = vld [vmem:[#allocation5 + $0xd50] ss:$8 sps:$4 sm:$0xff]   ;;  %v5947_v30 = vld [vmem:[#allocation7 + $0x148] sm:$0xff] }
 0x369   : > { %5784 = vmatprep.subr.bf16.mxu0 %v8988_v15  ;;  %v9069_v15 = vld [vmem:[#allocation5 + $0xd44] ss:$8 sps:$4 sm:$0xff]  }
 0x36b   : > { %5395 = vmatpush1.bf16.msra.mxu1 %v8983_v47  ;;  %v9067_v47 = vld [vmem:[#allocation5 + $0xd40] ss:$8 sps:$4 sm:$0xff]  }
 0x36c   : > { %5785 = vmatpush1.bf16.msra.mxu0 %v8986_v51  ;;  %5396 = vmatprep.subr.bf16.mxu1 %v8991_v54  ;;  %v9072_v51 = vld [vmem:[#allocation5 + $0xd34] ss:$8 sps:$4 sm:$0xff]   ;;  %v5967_v54 = vld [vmem:[#allocation7 + $0x1e8] sm:$0xff] }
 0x36d   : > { %5786 = vmatprep.subr.bf16.mxu0 %v8994_v50  ;;  %v9070_v50 = vld [vmem:[#allocation5 + $0xd30] ss:$8 sps:$4 sm:$0xff]  }
 0x36f   : > { %5397 = vmatpush1.bf16.msra.mxu1 %v8989_v55 }
 0x370   : > { %5787 = vmatpush1.bf16.msra.mxu0 %v8992_v6  ;;  %5398 = vmatprep.subr.bf16.mxu1 %v8997_v56  ;;  %v5955_v6 = vld [vmem:[#allocation7 + $0x188] sm:$0xff] }
 0x371   : > { %5788 = vmatprep.subr.bf16.mxu0 %v9000_v52  ;;  %v5959_v56 = vld [vmem:[#allocation7 + $0x1a8] sm:$0xff] }
 0x372   : > { %v9075_v52 = vld [vmem:[#allocation5 + $0xd24] ss:$8 sps:$4 sm:$0xff]   ;;  %v7883_v38 = vcombine.high %v5955_v6, %v5959_v56 }
 0x373   : > { %5399 = vmatpush1.bf16.msra.mxu1 %v8995_v61  ;;  %v5951_v61 = vld [vmem:[#allocation7 + $0x168] sm:$0xff] }
 0x374   : > { %5789 = vmatpush1.bf16.msra.mxu0 %v8998_v57  ;;  %5400 = vmatprep.subr.bf16.mxu1 %v9003_v37  ;;  %v7882_v57 = vcombine.low %v5955_v6, %v5959_v56  ;;  %v9073_v37 = vld [vmem:[#allocation5 + $0xd20] ss:$8 sps:$4 sm:$0xff]  }
 0x375   : > { %5790 = vmatprep.subr.bf16.mxu0 %v9006_v59  ;;  %v7875_v59 = vcombine.high %v5947_v30, %v5951_v61 }
 0x377   : > { %5401 = vmatpush1.bf16.msra.mxu1 %v9001_v60  ;;  %v9078_v60 = vld [vmem:[#allocation5 + $0xd14] ss:$8 sps:$4 sm:$0xff]  }
 0x378   : > { %5791 = vmatpush1.bf16.msra.mxu0 %v9004_v45  ;;  %5402 = vmatprep.subr.bf16.mxu1 %v9009_v63  ;;  %v5939_v45 = vld [vmem:[#allocation7 + $0x108] sm:$0xff] }
 0x379   : > { %5792 = vmatprep.subr.bf16.mxu0 %v9012_v0  ;;  %v5943_v63 = vld [vmem:[#allocation7 + $0x128] sm:$0xff]  ;;  %v7874_v0 = vcombine.low %v5947_v30, %v5951_v61 }
 0x37b   : > { %5403 = vmatpush2.bf16.msra.mxu1 %v9007_v1  ;;  %v9076_v1 = vld [vmem:[#allocation5 + $0xd10] ss:$8 sps:$4 sm:$0xff]  }
 0x37c   : > { %5793 = vmatpush1.bf16.msra.mxu0 %v9010_v62  ;;  %5404 = vmatprep.subr.bf16.mxu1 %v9015_v2  ;;  %v7867_v62 = vcombine.high %v5939_v45, %v5943_v63  ;;  %v9081_v2 = vld [vmem:[#allocation5 + $0xd04] ss:$8 sps:$4 sm:$0xff]  }
 0x37d   : > { %5794 = vmatprep.subr.bf16.mxu0 %v9018_v3  ;;  %v5962_v3 = vld [vmem:[#allocation7 + $0x1c0] sm:$0xff] }
 0x37f   : > { %5405 = vmatpush2.bf16.msra.mxu1 %v9013_v23  ;;  %v5966_v23 = vld [vmem:[#allocation7 + $0x1e0] sm:$0xff] }
 0x380   : > { %5795 = vmatpush2.bf16.msra.mxu0 %v9016_v4  ;;  %5406 = vmatprep.subr.bf16.mxu1 %v9021_v10  ;;  %v7866_v4 = vcombine.low %v5939_v45, %v5943_v63  ;;  %v9079_v10 = vld [vmem:[#allocation5 + $0xd00] ss:$8 sps:$4 sm:$0xff]  }
 0x381   : > { %5796 = vmatprep.subr.bf16.mxu0 %v9024_v5  ;;  %v7889_v5 = vcombine.high %v5962_v3, %v5966_v23  ;;  %v6031_v45 = vld [vmem:[#allocation7 + $0x3e8] sm:$0xff] }
 0x383   : > { %5407 = vmatpush2.bf16.msra.mxu1 %v9019_v28  ;;  %v5477_v28 = vld [vmem:[#allocation2 + $0x20] sm:$0xf] }
 0x384   : > { %5797 = vmatpush2.bf16.msra.mxu0 %v9022_v8  ;;  %5408 = vmatprep.subr.bf16.mxu1 %v9027_v16  ;;  %v5954_v8 = vld [vmem:[#allocation7 + $0x180] sm:$0xff] }
 0x385   : > { %5798 = vmatprep.subr.bf16.mxu0 %v9030_v9  ;;  %v5958_v16 = vld [vmem:[#allocation7 + $0x1a0] sm:$0xff]  ;;  %v7888_v9 = vcombine.low %v5962_v3, %v5966_v23  ;;  %v6019_v23 = vld [vmem:[#allocation7 + $0x388] sm:$0xff] }
 0x386   : > { %v6022_v3 = vld [vmem:[#allocation7 + $0x3a0] sm:$0xff] }
 0x387   : > { %5409 = vmatpush2.bf16.msra.mxu1 %v9025_v11  ;;  %v9084_v11 = vld [vmem:[#allocation2 + $0x14] sm:$0xf] }
 0x388   : > { %5799 = vmatpush2.bf16.msra.mxu0 %v9028_v12  ;;  %5410 = vmatprep.subr.bf16.mxu1 %v9033_v17  ;;  %v7783_v12 = vcombine.low %v9084_v11, %v5477_v28  ;;  %v7881_v17 = vcombine.high %v5954_v8, %v5958_v16  ;;  %v6011_v11 = vld [vmem:[#allocation7 + $0x348] sm:$0xff] }
 0x389   : > { %5800 = vmatprep.subr.bf16.mxu0 %v9036_v48  ;;  %v5946_v48 = vld [vmem:[#allocation7 + $0x140] sm:$0xff] }
 0x38b   : > { %5411 = vmatpush2.bf16.msra.mxu1 %v9031_v19  ;;  %v5950_v19 = vld [vmem:[#allocation7 + $0x160] sm:$0xff] }
 0x38c   : > { %5801 = vmatpush2.bf16.msra.mxu0 %v9034_v7  ;;  %5412 = vmatprep.subr.bf16.mxu1 %v9039_v13  ;;  %v7880_v7 = vcombine.low %v5954_v8, %v5958_v16  ;;  %v7873_v13 = vcombine.high %v5946_v48, %v5950_v19  ;;  %v6010_v16 = vld [vmem:[#allocation7 + $0x340] sm:$0xff] }
 0x38d   : > { %5802 = vmatprep.subr.bf16.mxu0 %v9042_v21  ;;  %v5938_v21 = vld [vmem:[#allocation7 + $0x100] sm:$0xff] }
 0x38f   : > { %5413 = vmatpush2.bf16.msra.mxu1 %v9037_v22  ;;  %v5942_v22 = vld [vmem:[#allocation7 + $0x120] sm:$0xff] }
 0x390   : > { %5803 = vmatpush2.bf16.msra.mxu0 %v9040_v25  ;;  %5414 = vmatprep.subr.bf16.mxu1 %v9045_v26  ;;  %v7872_v25 = vcombine.low %v5946_v48, %v5950_v19  ;;  %v7865_v26 = vcombine.high %v5938_v21, %v5942_v22 }
 0x391   : > { %5804 = vmatprep.subr.bf16.mxu0 %v9048_v32  ;;  %v7864_v32 = vcombine.low %v5938_v21, %v5942_v22  ;;  %v6006_v21 = vld [vmem:[#allocation7 + $0x320] sm:$0xff]  ;;  %v6003_v22 = vld [vmem:[#allocation7 + $0x308] sm:$0xff] }
 0x393   : > { %5415 = vmatpush2.bf16.msra.mxu1 %v9043_v35  ;;  %v5930_v35 = vld [vmem:[#allocation7 + $0xc0] sm:$0xff] }
 0x394   : > { %5805 = vmatpush2.bf16.msra.mxu0 %v9046_v18  ;;  %5416 = vmatprep.subr.bf16.mxu1 %v9051_v58  ;;  %v5934_v18 = vld [vmem:[#allocation7 + $0xe0] sm:$0xff]  ;;  %v5931_v58 = vld [vmem:[#allocation7 + $0xc8] sm:$0xff] }
 0x395   : > { %5806 = vmatprep.subr.bf16.mxu0 %v9054_v36  ;;  %v7856_v36 = vcombine.low %v5930_v35, %v5934_v18 }
 0x397   : > { %5417 = vmatpush2.bf16.msra.mxu1 %v9049_v39  ;;  %v7857_v39 = vcombine.high %v5930_v35, %v5934_v18 }
 0x398   : > { %5807 = vmatpush2.bf16.msra.mxu0 %v9052_v40  ;;  %5821 = vmatprep.subr.bf16.mxu1 %v9060_v41  ;;  %v5935_v40 = vld [vmem:[#allocation7 + $0xe8] sm:$0xff] }
 0x399   : > { %5808 = vmatprep.subr.bf16.mxu0 %v9057_v49  ;;  %v7858_v41 = vcombine.low %v5931_v58, %v5935_v40  ;;  %v7859_v49 = vcombine.high %v5931_v58, %v5935_v40  ;;  %v5994_v40 = vld [vmem:[#allocation7 + $0x2c0] sm:$0xff] }
 0x39a   : > { %5419 = vmatmul.mubr.bf16.vlgmr.msra.gmra.mxu1 %v9683_v34  ;;  %v5963_v34 = vld [vmem:[#allocation7 + $0x1c8] sm:$0xff] }
 0x39b   : > { %5822 = vmatpush1.bf16.msra.mxu1 %v9058_v53  ;;  %5853 = vmatprep.mubr.bf16.mxu1 %v9378_v29  ;;  %v7890_v29 = vcombine.low %v5963_v34, %v5967_v54  ;;  %v7891_v55 = vcombine.high %v5963_v34, %v5967_v54  ;;  %v5922_v53 = vld [vmem:[#allocation7 + $0x80] sm:$0xff]  ;;  %v5915_v34 = vld [vmem:[#allocation7 + $0x48] sm:$0xff] }
 0x39c   : > { %5809 = vmatpush2.bf16.msra.mxu0 %v9055_v33  ;;  %5823 = vmatprep.subr.bf16.mxu1 %v9063_v42  ;;  %v5926_v33 = vld [vmem:[#allocation7 + $0xa0] sm:$0xff]  ;;  %v5923_v42 = vld [vmem:[#allocation7 + $0x88] sm:$0xff] }
 0x39d   : > { %6717 = vmatprep.subr.bf16.mxu0 %v7891_v55  ;;  %v5910_v55 = vld [vmem:[#allocation7 + $0x20] sm:$0xff] }
 0x39f   : > { %5811 = vmatmul.mubr.bf16.vlgmr.msra.gmra.mxu0 %v7781_v44  ;;  %5824 = vmatpush1.bf16.msra.mxu1 %v9061_v43  ;;  %v7848_v43 = vcombine.low %v5922_v53, %v5926_v33  ;;  %v5927_v44 = vld [vmem:[#allocation7 + $0xa8] sm:$0xff] }
 0x3a0   : > { %5825 = vmatprep.subr.bf16.mxu1 %v9066_v14  ;;  %6718 = vmatpush1.bf16.msra.mxu0 %v7890_v29  ;;  %v7849_v14 = vcombine.high %v5922_v53, %v5926_v33  ;;  %v5906_v29 = vld [vmem:[#allocation7] sm:$0xff] }
 0x3a1   : > { %6719 = vmatprep.subr.bf16.mxu0 %v7883_v38  ;;  %v5911_v38 = vld [vmem:[#allocation7 + $0x28] sm:$0xff]  ;;  %v7833_v61 = vcombine.high %v5906_v29, %v5910_v55  ;;  %v7832_v63 = vcombine.low %v5906_v29, %v5910_v55  ;;  %v5978_v29 = vld [vmem:[#allocation7 + $0x240] sm:$0xff] }
 0x3a2   : > { %v5982_v55 = vld [vmem:[#allocation7 + $0x260] sm:$0xff] }
 0x3a3   : > { %5826 = vmatpush1.bf16.msra.mxu1 %v9064_v46  ;;  %v7850_v46 = vcombine.low %v5923_v42, %v5927_v44 }
 0x3a4   : > { %5827 = vmatprep.subr.bf16.mxu1 %v9069_v15  ;;  %6720 = vmatpush1.bf16.msra.mxu0 %v7882_v57  ;;  %v7851_v15 = vcombine.high %v5923_v42, %v5927_v44  ;;  %v5999_v42 = vld [vmem:[#allocation7 + $0x2e8] sm:$0xff] }
 0x3a5   : > { %6721 = vmatprep.subr.bf16.mxu0 %v7875_v59  ;;  %v6030_v59 = vld [vmem:[#allocation7 + $0x3e0] sm:$0xff] }
 0x3a7   : > { %5828 = vmatpush1.bf16.msra.mxu1 %v9067_v47  ;;  %v5914_v47 = vld [vmem:[#allocation7 + $0x40] sm:$0xff] }
 0x3a8   : > { %5829 = vmatprep.subr.bf16.mxu1 %v9072_v51  ;;  %6722 = vmatpush1.bf16.msra.mxu0 %v7874_v0  ;;  %v5918_v51 = vld [vmem:[#allocation7 + $0x60] sm:$0xff] }
 0x3a9   : > { %6723 = vmatprep.subr.bf16.mxu0 %v7867_v62  ;;  %v7841_v54 = vcombine.high %v5914_v47, %v5918_v51  ;;  %v7840_v6 = vcombine.low %v5914_v47, %v5918_v51  ;;  %v5987_v47 = vld [vmem:[#allocation7 + $0x288] sm:$0xff]  ;;  %v9797_v51 = vpop.f32.mrf.mxu1 }
 0x3ab   : > { %5830 = vmatpush1.bf16.msra.mxu1 %v9070_v50  ;;  %v5919_v50 = vld [vmem:[#allocation7 + $0x68] sm:$0xff] }
 0x3ac   : > { %5831 = vmatprep.subr.bf16.mxu1 %v9075_v52  ;;  %6724 = vmatpush1.bf16.msra.mxu0 %v7866_v4  ;;  %v7843_v56 = vcombine.high %v5915_v34, %v5919_v50  ;;  %v5907_v52 = vld [vmem:[#allocation7 + $0x8] sm:$0xff]  ;;  %v7842_v30 = vcombine.low %v5915_v34, %v5919_v50 }
 0x3ad   : > { %6725 = vmatprep.subr.bf16.mxu0 %v7859_v49  ;;  %v7835_v57 = vcombine.high %v5907_v52, %v5911_v38  ;;  %v7834_v0 = vcombine.low %v5907_v52, %v5911_v38  ;;  %v6023_v4 = vld [vmem:[#allocation7 + $0x3a8] sm:$0xff]  ;;  %v7905_v52 = vcombine.high %v5978_v29, %v5982_v55 }
 0x3ae   : > { %v7947_v8 = vcombine.high %v6019_v23, %v6023_v4  ;;  %v7946_v48 = vcombine.low %v6019_v23, %v6023_v4  ;;  %v5995_v49 = vld [vmem:[#allocation7 + $0x2c8] sm:$0xff] }
 0x3af   : > { %5832 = vmatpush1.bf16.msra.mxu1 %v9073_v37  ;;  %v6026_v37 = vld [vmem:[#allocation7 + $0x3c0] sm:$0xff]  ;;  %v5991_v50 = vld [vmem:[#allocation7 + $0x2a8] sm:$0xff] }
 0x3b0   : > { %5833 = vmatprep.subr.bf16.mxu1 %v9078_v60  ;;  %6726 = vmatpush1.bf16.msra.mxu0 %v7858_v41  ;;  %v6027_v60 = vld [vmem:[#allocation7 + $0x3c8] sm:$0xff]  ;;  %v5998_v41 = vld [vmem:[#allocation7 + $0x2e0] sm:$0xff] }
 0x3b1   : > { %6727 = vmatprep.subr.bf16.mxu0 %v7851_v15  ;;  %v7955_v62 = vcombine.high %v6027_v60, %v6031_v45  ;;  %v7920_v53 = vcombine.low %v5994_v40, %v5998_v41  ;;  %v7921_v33 = vcombine.high %v5994_v40, %v5998_v41  ;;  %v5990_v15 = vld [vmem:[#allocation7 + $0x2a0] sm:$0xff]  ;;  %v5979_v38 = vld [vmem:[#allocation7 + $0x248] sm:$0xff] }
 0x3b3   : > { %5834 = vmatpush1.bf16.msra.mxu1 %v9076_v1  ;;  %v7953_v1 = vcombine.high %v6026_v37, %v6030_v59 }
 0x3b4   : > { %5835 = vmatprep.subr.bf16.mxu1 %v9081_v2  ;;  %6728 = vmatpush1.bf16.msra.mxu0 %v7850_v46  ;;  %v6018_v2 = vld [vmem:[#allocation7 + $0x380] sm:$0xff] }
 0x3b5   : > { %6729 = vmatprep.subr.bf16.mxu0 %v7843_v56  ;;  %v7945_v28 = vcombine.high %v6018_v2, %v6022_v3  ;;  %v5986_v46 = vld [vmem:[#allocation7 + $0x280] sm:$0xff]  ;;  %v7915_v56 = vcombine.high %v5987_v47, %v5991_v50 }
 0x3b6   : > { %v7912_v34 = vcombine.low %v5986_v46, %v5990_v15 }
 0x3b7   : > { %5836 = vmatpush1.bf16.msra.mxu1 %v9079_v10  ;;  %v7952_v10 = vcombine.low %v6026_v37, %v6030_v59  ;;  %v5974_v59 = vld [vmem:[#allocation7 + $0x220] sm:$0xff] }
 0x3b8   : > { %6674 = vmatprep.subr.bf16.mxu1 %v7889_v5  ;;  %6730 = vmatpush1.bf16.msra.mxu0 %v7842_v30  ;;  %v7954_v5 = vcombine.low %v6027_v60, %v6031_v45  ;;  %v5983_v30 = vld [vmem:[#allocation7 + $0x268] sm:$0xff] }
 0x3b9   : > { %6731 = vmatprep.subr.bf16.mxu0 %v7835_v57  ;;  %v7907_v37 = vcombine.high %v5979_v38, %v5983_v30  ;;  %v5971_v60 = vld [vmem:[#allocation7 + $0x208] sm:$0xff] }
 0x3ba   : > { %5854 = vmatmul.mubr.bf16.vlgmr.msra.gmra.mxu1 %v7783_v12  ;;  %v6015_v12 = vld [vmem:[#allocation7 + $0x368] sm:$0xff] }
 0x3bb   : > { %6675 = vmatpush1.bf16.msra.mxu1 %v7888_v9  ;;  %v6014_v9 = vld [vmem:[#allocation7 + $0x360] sm:$0xff]  ;;  %v5975_v45 = vld [vmem:[#allocation7 + $0x228] sm:$0xff] }
 0x3bc   : > { %6676 = vmatprep.subr.bf16.mxu1 %v7881_v17  ;;  %6732 = vmatpush1.bf16.msra.mxu0 %v7834_v0  ;;  %v7944_v17 = vcombine.low %v6018_v2, %v6022_v3  ;;  %v7937_v19 = vcombine.high %v6010_v16, %v6014_v9  ;;  %v9801_v0 = vld [vmem:[#allocation7 + $0x1d0] sm:$0xff]  ;;  %v9807_v2 = vpop.f32.mrf.mxu1  ;;  %v7906_v3 = vcombine.low %v5979_v38, %v5983_v30 }
 0x3bd   : > { %6733 = vmatprep.subr.bf16.mxu0 %v7955_v62  ;;  %9979 = vst [vmem:[#allocation26_spill] sm:$0xff] %v9801_v0  ;;  %v9805_v62 = vld [vmem:[#allocation7 + $0x1d8] sm:$0xff] }
 0x3be   : > { %9981 = vst [vmem:[#allocation28_spill] sm:$0xff] %v9805_v62 }
 0x3bf   : > { %6677 = vmatpush1.bf16.msra.mxu1 %v7880_v7  ;;  %v7939_v7 = vcombine.high %v6011_v11, %v6015_v12 }
 0x3c0   : > { %6678 = vmatprep.subr.bf16.mxu1 %v7873_v13  ;;  %6734 = vmatpush2.bf16.msra.mxu0 %v7954_v5  ;;  %v6002_v13 = vld [vmem:[#allocation7 + $0x300] sm:$0xff]  ;;  %v7899_v5 = vcombine.high %v5971_v60, %v5975_v45 }
 0x3c1   : > { %6735 = vmatprep.subr.bf16.mxu0 %v7947_v8  ;;  %v7929_v35 = vcombine.high %v6002_v13, %v6006_v21  ;;  %v7928_v58 = vcombine.low %v6002_v13, %v6006_v21 }
 0x3c3   : > { %6679 = vmatpush1.bf16.msra.mxu1 %v7872_v25  ;;  %v6007_v25 = vld [vmem:[#allocation7 + $0x328] sm:$0xff] }
 0x3c4   : > { %6680 = vmatprep.subr.bf16.mxu1 %v7865_v26  ;;  %v7936_v26 = vcombine.low %v6010_v16, %v6014_v9  ;;  %6736 = vmatpush2.bf16.msra.mxu0 %v7946_v48  ;;  %v7931_v18 = vcombine.high %v6003_v22, %v6007_v25  ;;  %v9817_v9 = vpop.f32.mrf.mxu1 }
 0x3c5   : > { %6737 = vmatprep.subr.bf16.mxu0 %v7939_v7 }
 0x3c7   : > { %6681 = vmatpush1.bf16.msra.mxu1 %v7864_v32  ;;  %v7938_v32 = vcombine.low %v6011_v11, %v6015_v12  ;;  %v7898_v12 = vcombine.low %v5971_v60, %v5975_v45 }
 0x3c8   : > { %6682 = vmatprep.subr.bf16.mxu1 %v7857_v39  ;;  %v9793_v39 = vpop.f32.mrf.mxu0 }
 0x3c9   : > { %6738 = vmatpush2.bf16.msra.mxu0 %v7938_v32  ;;  %v2674_v27 = vadd.f32 %v9797_v51, %v9793_v39 }
 0x3ca   : > { %6739 = vmatprep.subr.bf16.mxu0 %v7931_v18  ;;  %v9795_v44 = vpop.f32.mrf.mxu0 }
 0x3cb   : > { %6683 = vmatpush1.bf16.msra.mxu1 %v7856_v36  ;;  %v7930_v36 = vcombine.low %v6003_v22, %v6007_v25  ;;  %v2676_v20 = vadd.f32 %v9807_v2, %v9795_v44 }
 0x3cc   : > { %6684 = vmatprep.subr.bf16.mxu1 %v7849_v14  ;;  %v7923_v14 = vcombine.high %v5995_v49, %v5999_v42  ;;  %v9799_v57 = vpop.f32.mrf.mxu0 }
 0x3cd   : > { %6740 = vmatpush2.bf16.msra.mxu0 %v7930_v36 }
 0x3ce   : > { %6741 = vmatprep.subr.bf16.mxu0 %v7923_v14  ;;  %v9815_v8 = vpop.f32.mrf.mxu0 }
 0x3cf   : > { %6685 = vmatpush1.bf16.msra.mxu1 %v7848_v43  ;;  %v7922_v43 = vcombine.low %v5995_v49, %v5999_v42 }
 0x3d0   : > { %6686 = vmatprep.subr.bf16.mxu1 %v7841_v54  ;;  %v7913_v54 = vcombine.high %v5986_v46, %v5990_v15  ;;  %v9819_v11 = vpop.f32.mrf.mxu0 }
 0x3d1   : > { %6742 = vmatpush2.bf16.msra.mxu0 %v7922_v43  ;;  %9983 = vst [vmem:[#allocation30_spill] sm:$0xff] %v9819_v11 }
 0x3d2   : > { %6743 = vmatprep.subr.bf16.mxu0 %v7915_v56  ;;  %v9825_v7 = vpop.f32.mrf.mxu0 }
 0x3d3   : > { %6687 = vmatpush1.bf16.msra.mxu1 %v7840_v6  ;;  %v7914_v6 = vcombine.low %v5987_v47, %v5991_v50  ;;  %9984 = vst [vmem:[#allocation31_spill] sm:$0xff] %v9825_v7 }
 0x3d4   : > { %6688 = vmatprep.subr.bf16.mxu1 %v7833_v61  ;;  %v5970_v61 = vld [vmem:[#allocation7 + $0x200] sm:$0xff]  ;;  %v9827_v21 = vpop.f32.mrf.mxu0 }
 0x3d5   : > { %6744 = vmatpush2.bf16.msra.mxu0 %v7914_v6  ;;  %v7897_v23 = vcombine.high %v5970_v61, %v5974_v59  ;;  %v7896_v16 = vcombine.low %v5970_v61, %v5974_v59  ;;  %9985 = vst [vmem:[#allocation32_spill] sm:$0xff] %v9827_v21 }
 0x3d6   : > { %6745 = vmatprep.subr.bf16.mxu0 %v7907_v37  ;;  %v9829_v25 = vpop.f32.mrf.mxu0 }
 0x3d7   : > { %6689 = vmatpush1.bf16.msra.mxu1 %v7832_v63  ;;  %v7904_v63 = vcombine.low %v5978_v29, %v5982_v55  ;;  %9986 = vst [vmem:[#allocation33_spill] sm:$0xff] %v9829_v25 }
 0x3d8   : > { %6690 = vmatprep.subr.bf16.mxu1 %v7953_v1  ;;  %v9803_v1 = vld [vmem:[#allocation7 + $0x1f0] sm:$0xff]  ;;  %v3459_v32 = vpop.f32.mrf.mxu0  ;;  %v9988_v2 = vld [vmem:[#allocation30_spill] sm:$0xff] }
 0x3d9   : > { %9980 = vst [vmem:[#allocation27_spill] sm:$0xff] %v9803_v1  ;;  %6746 = vmatpush2.bf16.msra.mxu0 %v7906_v3 }
 0x3da   : > { %6747 = vmatprep.subr.bf16.mxu0 %v7899_v5  ;;  %v3461_v18 = vpop.f32.mrf.mxu0 }
 0x3db   : > { %6691 = vmatpush2.bf16.msra.mxu1 %v7952_v10  ;;  %v9811_v10 = vld [vmem:[#allocation7 + $0x1f8] sm:$0xff] }
 0x3dc   : > { %6692 = vmatprep.subr.bf16.mxu1 %v7945_v28  ;;  %9982 = vst [vmem:[#allocation29_spill] sm:$0xff] %v9811_v10  ;;  %v7895_v48 = vcombine.high %v9805_v62, %v9811_v10  ;;  %v3463_v36 = vpop.f32.mrf.mxu0 }
 0x3dd   : > { %6748 = vmatpush2.bf16.msra.mxu0 %v7898_v12 }
 0x3de   : > { %6803 = vmatprep.subr.bf16.mxu0 %v7895_v48  ;;  %v3465_v41 = vpop.f32.mrf.mxu0 }
 0x3df   : > { %6693 = vmatpush2.bf16.msra.mxu1 %v7944_v17  ;;  %v7893_v17 = vcombine.high %v9801_v0, %v9803_v1  ;;  %v2678_v1 = vadd.f32 %v9817_v9, %v9799_v57  ;;  %v9989_v9 = vld [vmem:[#allocation31_spill] sm:$0xff] }
 0x3e0   : > { %6694 = vmatprep.subr.bf16.mxu1 %v7937_v19  ;;  %v2679_v19 = vpop.f32.mrf.mxu1 }
 0x3e1   : > { %v2680_v0 = vadd.f32 %v2679_v19, %v9815_v8 }
 0x3e2   : > { %v3019_v13 = vpop.f32.mrf.mxu1 }
 0x3e3   : > { %6695 = vmatpush2.bf16.msra.mxu1 %v7936_v26  ;;  %v3020_v24 = vadd.f32 %v3019_v13, %v2674_v27  ;;  %v9990_v13 = vld [vmem:[#allocation32_spill] sm:$0xff] }
 0x3e4   : > { %6696 = vmatprep.subr.bf16.mxu1 %v7929_v35  ;;  %v3021_v22 = vpop.f32.mrf.mxu1 }
 0x3e5   : > { %v3022_v31 = vadd.f32 %v3021_v22, %v2676_v20  ;;  %v3063_v44 = vadd.f32 %v9988_v2, %v3020_v24 }
 0x3e6   : > { %v3023_v26 = vpop.f32.mrf.mxu1 }
 0x3e7   : > { %6697 = vmatpush2.bf16.msra.mxu1 %v7928_v58  ;;  %v3024_v21 = vadd.f32 %v3023_v26, %v2678_v1  ;;  %v3065_v57 = vadd.f32 %v9989_v9, %v3022_v31  ;;  %v9991_v26 = vld [vmem:[#allocation33_spill] sm:$0xff] }
 0x3e8   : > { %6698 = vmatprep.subr.bf16.mxu1 %v7921_v33  ;;  %v3025_v35 = vpop.f32.mrf.mxu1 }
 0x3e9   : > { %v3067_v27 = vadd.f32 %v9990_v13, %v3024_v21 }
 0x3ea   : > { %v3502_v58 = vpop.f32.mrf.mxu1 }
 0x3eb   : > { %6699 = vmatpush2.bf16.msra.mxu1 %v7920_v53  ;;  %v3904_v53 = vpop.f32.mrf.mxu0  ;;  %v3503_v7 = vadd.f32 %v3502_v58, %v3459_v32 }
 0x3ec   : > { %6700 = vmatprep.subr.bf16.mxu1 %v7913_v54  ;;  %v3504_v40 = vpop.f32.mrf.mxu1 }
 0x3ed   : > { %v3906_v42 = vpop.f32.mrf.mxu0  ;;  %v3505_v39 = vadd.f32 %v3504_v40, %v3461_v18 }
 0x3ee   : > { %v3506_v49 = vpop.f32.mrf.mxu1 }
 0x3ef   : > { %6701 = vmatpush2.bf16.msra.mxu1 %v7912_v34  ;;  %v3908_v14 = vpop.f32.mrf.mxu0  ;;  %v3507_v51 = vadd.f32 %v3506_v49, %v3463_v36  ;;  %v3512_v18 = vadd.f32 %v3505_v39, %v3065_v57  ;;  %v9994_v57 = vld [vmem:[#allocation23_spill] sm:$0xff] }
 0x3f0   : > { %6702 = vmatprep.subr.bf16.mxu1 %v7905_v52  ;;  %v3508_v33 = vpop.f32.mrf.mxu1 }
 0x3f1   : > { %v3910_v15 = vpop.f32.mrf.mxu0  ;;  %v3509_v20 = vadd.f32 %v3508_v33, %v3465_v41  ;;  %v3513_v40 = vadd.f32 %v3507_v51, %v3067_v27 }
 0x3f2   : > { %v3861_v43 = vpop.f32.mrf.mxu1 }
 0x3f3   : > { %6703 = vmatpush2.bf16.msra.mxu1 %v7904_v63  ;;  %v4240_v34 = vpop.f32.mrf.mxu0  ;;  %v3905_v8 = vadd.f32 %v3904_v53, %v3861_v43 }
 0x3f4   : > { %6704 = vmatprep.subr.bf16.mxu1 %v7897_v23  ;;  %v3863_v46 = vpop.f32.mrf.mxu1 }
 0x3f5   : > { %v4242_v50 = vpop.f32.mrf.mxu0  ;;  %v3907_v22 = vadd.f32 %v3906_v42, %v3863_v46 }
 0x3f6   : > { %v3865_v47 = vpop.f32.mrf.mxu1 }
 0x3f7   : > { %6705 = vmatpush2.bf16.msra.mxu1 %v7896_v16  ;;  %v4244_v55 = vpop.f32.mrf.mxu0  ;;  %v3909_v1 = vadd.f32 %v3908_v14, %v3865_v47  ;;  %v3914_v13 = vadd.f32 %v3907_v22, %v3512_v18 }
 0x3f8   : > { %6760 = vmatprep.subr.bf16.mxu1 %v7893_v17  ;;  %v3867_v54 = vpop.f32.mrf.mxu1 }
 0x3f9   : > { %v4246_v56 = vpop.f32.mrf.mxu0  ;;  %v3911_v36 = vadd.f32 %v3910_v15, %v3867_v54  ;;  %v3915_v21 = vadd.f32 %v3909_v1, %v3513_v40 }
 0x3fa   : > { %v4283_v29 = vpop.f32.mrf.mxu1 }
 0x3fb   : > { %v4685_v38 = vpop.f32.mrf.mxu0  ;;  %v4284_v32 = vadd.f32 %v4283_v29, %v4240_v34 }
 0x3fc   : > { %v4285_v6 = vpop.f32.mrf.mxu1 }
 0x3fd   : > { %v4687_v61 = vpop.f32.mrf.mxu0  ;;  %v4286_v49 = vadd.f32 %v4285_v6, %v4242_v50 }
 0x3fe   : > { %v4287_v52 = vpop.f32.mrf.mxu1 }
 0x3ff   : > { %v4689_v59 = vpop.f32.mrf.mxu0  ;;  %v4288_v24 = vadd.f32 %v4287_v52, %v4244_v55  ;;  %v4293_v47 = vadd.f32 %v4286_v49, %v3914_v13 }
 0x400   : > { %v4289_v30 = vpop.f32.mrf.mxu1 }
 0x401   : > { %v4691_v45 = vpop.f32.mrf.mxu0  ;;  %v4290_v42 = vadd.f32 %v4289_v30, %v4246_v56  ;;  %v4294_v29 = vadd.f32 %v4288_v24, %v3915_v21 }
 0x402   : > { %v4642_v37 = vpop.f32.mrf.mxu1 }
 0x403   : > { %v5041_v3 = vpop.f32.mrf.mxu0  ;;  %v4686_v9 = vadd.f32 %v4685_v38, %v4642_v37 }
 0x404   : > { %v4644_v60 = vpop.f32.mrf.mxu1 }
 0x405   : > { %v5043_v5 = vpop.f32.mrf.mxu0  ;;  %v4688_v41 = vadd.f32 %v4687_v61, %v4644_v60 }
 0x406   : > { %v4646_v63 = vpop.f32.mrf.mxu1 }
 0x407   : > { %v5045_v12 = vpop.f32.mrf.mxu0  ;;  %v4690_v14 = vadd.f32 %v4689_v59, %v4646_v63  ;;  %v4695_v6 = vadd.f32 %v4688_v41, %v4293_v47 }
 0x408   : > { %v4648_v23 = vpop.f32.mrf.mxu1 }
 0x409   : > { %v9831_v48 = vpop.f32.mrf.mxu0  ;;  %v4692_v15 = vadd.f32 %v4691_v45, %v4648_v23  ;;  %v4696_v39 = vadd.f32 %v4690_v14, %v4294_v29  ;;  %v5960_v14 = vld [vmem:[#allocation7 + $0x1b0] sm:$0xff] }
 0x40a   : > { %9987 = vst [vmem:[#allocation34_spill] sm:$0xff] %v9831_v48  ;;  %v3026_v48 = vadd.f32 %v3025_v35, %v2680_v0  ;;  %v3511_v35 = vadd.f32 %v3503_v7, %v3063_v44  ;;  %v5948_v29 = vld [vmem:[#allocation7 + $0x150] sm:$0xff] }
 0x40c   : > { %v3069_v0 = vadd.f32 %v9991_v26, %v3026_v48  ;;  %v3913_v2 = vadd.f32 %v3905_v8, %v3511_v35 }
 0x40e   : > { %v3514_v43 = vadd.f32 %v3509_v20, %v3069_v0  ;;  %v4292_v33 = vadd.f32 %v4284_v32, %v3913_v2 }
 0x410   : > { %v3916_v7 = vadd.f32 %v3911_v36, %v3514_v43  ;;  %v4694_v48 = vadd.f32 %v4686_v9, %v4292_v33  ;;  %v5956_v33 = vld [vmem:[#allocation7 + $0x190] sm:$0xff] }
 0x411   : > { %v9992_v56 = vld [vmem:[#allocation34_spill] sm:$0xff] }
 0x412   : > { %v4295_v37 = vadd.f32 %v4290_v42, %v3916_v7  ;;  %v5961_v7 = vld [vmem:[#allocation7 + $0x1b8] sm:$0xff] }
 0x41a   : > { %v5084_v16 = vpop.f32.mrf.mxu1 }
 0x41b   : > { %v5085_v46 = vadd.f32 %v5084_v16, %v5041_v3  ;;  %v5868_v3 = vld [vmem:[#allocation11] sm:$0x3] }
 0x41c   : > { %v5086_v17 = vpop.f32.mrf.mxu1  ;;  %v5873_v8 = vrot.slane %v5868_v3, %v9994_v57 }
 0x41d   : > { %v5087_v34 = vadd.f32 %v5086_v17, %v5043_v5  ;;  %v5093_v51 = vadd.f32 %v5085_v46, %v4694_v48  ;;  %v4697_v5 = vadd.f32 %v4692_v15, %v4295_v37  ;;  %v5957_v46 = vld [vmem:[#allocation7 + $0x198] sm:$0xff]  ;;  %v7885_v48 = vcombine.high %v5956_v33, %v5960_v14  ;;  %v9998_v37 = vld [vmem:[#allocation28_spill] sm:$0xff] }
 0x41e   : > { %v5088_v28 = vpop.f32.mrf.mxu1  ;;  %v7887_v15 = vcombine.high %v5957_v46, %v5961_v7 }
 0x41f   : > { %v5463_v4 = vpop.f32.mrf.mxu0  ;;  %v5089_v52 = vadd.f32 %v5088_v28, %v5045_v12  ;;  %v5094_v60 = vadd.f32 %v5087_v34, %v4695_v6  ;;  %v9995_v6 = vld [vmem:[#allocation26_spill] sm:$0xff] }
 0x420   : > { %v5090_v10 = vpop.f32.mrf.mxu1 }
 0x421   : > { %v5465_v62 = vpop.f32.mrf.mxu0  ;;  %v5091_v30 = vadd.f32 %v5090_v10, %v9992_v56  ;;  %v5095_v23 = vadd.f32 %v5089_v52, %v4696_v39  ;;  %v5884_v10 = vld [vmem:[#allocation13] sm:$0x3]  ;;  %v9999_v39 = vld [vmem:[#allocation29_spill] sm:$0xff] }
 0x422   : > { %v9996_v52 = vld [vmem:[#allocation27_spill] sm:$0xff] }
 0x423   : > { %v5467_v11 = vpop.f32.mrf.mxu0  ;;  %v5096_v27 = vadd.f32 %v5091_v30, %v4697_v5  ;;  %v5945_v5 = vld [vmem:[#allocation7 + $0x138] sm:$0xff] }
 0x425   : > { %v5469_v58 = vpop.f32.mrf.mxu0 }
 0x45a   : > { %v5420_v25 = vpop.f32.mrf.mxu1 }
 0x45b   : > { %v5464_v54 = vadd.f32 %v5463_v4, %v5420_v25  ;;  %v9993_v4 = vld [vmem:[#allocation24_spill] sm:$0xff] }
 0x45c   : > { %v5422_v19 = vpop.f32.mrf.mxu1  ;;  %v5877_v25 = vrot.slane %v5868_v3, %v9993_v4  ;;  %v5893_v26 = vrot.slane %v5884_v10, %v9993_v4  ;;  %v5941_v3 = vld [vmem:[#allocation7 + $0x118] sm:$0xff] }
 0x45d   : > { %v5466_v38 = vadd.f32 %v5465_v62, %v5422_v19  ;;  %v5472_v16 = vadd.f32 %v5464_v54, %v5093_v51  ;;  %v5952_v54 = vld [vmem:[#allocation7 + $0x170] sm:$0xff]  ;;  %v10000_v51 = vcombine.low %v9998_v37, %v9999_v39 }
 0x45e   : > { %v5424_v31 = vpop.f32.mrf.mxu1  ;;  %v7877_v56 = vcombine.high %v5948_v29, %v5952_v54 }
 0x45f   : > { %v5812_v53 = vpop.f32.mrf.mxu0  ;;  %v5468_v59 = vadd.f32 %v5467_v11, %v5424_v31  ;;  %v5473_v44 = vadd.f32 %v5466_v38, %v5094_v60  ;;  %v9997_v38 = vcombine.low %v9995_v6, %v9996_v52  ;;  %v7886_v60 = vcombine.low %v5957_v46, %v5961_v7  ;;  %v6029_v46 = vld [vmem:[#allocation7 + $0x3d8] sm:$0xff] }
 0x460   : > { %v5426_v50 = vpop.f32.mrf.mxu1  ;;  %v6033_v7 = vld [vmem:[#allocation7 + $0x3f8] sm:$0xff] }
 0x461   : > { %v5814_v55 = vpop.f32.mrf.mxu0  ;;  %v5470_v28 = vadd.f32 %v5469_v58, %v5426_v50  ;;  %v5474_v20 = vadd.f32 %v5468_v59, %v5095_v23  ;;  %v5889_v58 = vrot.slane %v5884_v10, %v9994_v57  ;;  %v5949_v50 = vld [vmem:[#allocation7 + $0x158] sm:$0xff]  ;;  %v5940_v59 = vld [vmem:[#allocation7 + $0x110] sm:$0xff] }
 0x462   : > { %v5932_v23 = vld [vmem:[#allocation7 + $0xd0] sm:$0xff]  ;;  %v6025_v6 = vld [vmem:[#allocation7 + $0x3b8] sm:$0xff] }
 0x463   : > { %v5816_v17 = vpop.f32.mrf.mxu0  ;;  %v5475_v35 = vadd.f32 %v5470_v28, %v5096_v27  ;;  %v5933_v28 = vld [vmem:[#allocation7 + $0xd8] sm:$0xff]  ;;  %v5928_v10 = vld [vmem:[#allocation7 + $0xb0] sm:$0xff] }
 0x465   : > { %v5818_v1 = vpop.f32.mrf.mxu0 }
 0x47a   : > { %v5855_v61 = vpop.f32.mrf.mxu1 }
 0x47b   : > { %v5856_v63 = vadd.f32 %v5855_v61, %v5812_v53  ;;  %v7884_v61 = vcombine.low %v5956_v33, %v5960_v14  ;;  %v6032_v14 = vld [vmem:[#allocation7 + $0x3f0] sm:$0xff] }
 0x47c   : > { %v5857_v45 = vpop.f32.mrf.mxu1 }
 0x47d   : > { %v5858_v62 = vadd.f32 %v5857_v45, %v5814_v55  ;;  %v5864_v12 = vadd.f32 %v5856_v63, %v5472_v16  ;;  %v5953_v55 = vld [vmem:[#allocation7 + $0x178] sm:$0xff]  ;;  %v5944_v63 = vld [vmem:[#allocation7 + $0x130] sm:$0xff]  ;;  %v7876_v16 = vcombine.low %v5948_v29, %v5952_v54 }
 0x47e   : > { %v5859_v19 = vpop.f32.mrf.mxu1  ;;  %v7879_v30 = vcombine.high %v5949_v50, %v5953_v55  ;;  %v7869_v45 = vcombine.high %v5940_v59, %v5944_v63  ;;  %v6020_v54 = vld [vmem:[#allocation7 + $0x390] sm:$0xff] }
 0x47f   : > { %v5865_v11 = vadd.f32 %v5858_v62, %v5473_v44  ;;  %v5860_v22 = vadd.f32 %v5859_v19, %v5816_v17  ;;  %v5880_v36 = vmul.f32 %v5873_v8, %v5864_v12  ;;  %v7878_v17 = vcombine.low %v5949_v50, %v5953_v55  ;;  %v5936_v44 = vld [vmem:[#allocation7 + $0xf0] sm:$0xff]  ;;  %v5937_v62 = vld [vmem:[#allocation7 + $0xf8] sm:$0xff] }
 0x480   : > { %v5861_v0 = vpop.f32.mrf.mxu1  ;;  %v7868_v12 = vcombine.low %v5940_v59, %v5944_v63  ;;  %v7861_v19 = vcombine.high %v5932_v23, %v5936_v44  ;;  %v7863_v27 = vcombine.high %v5933_v28, %v5937_v62  ;;  %v6024_v50 = vld [vmem:[#allocation7 + $0x3b0] sm:$0xff]  ;;  %v6021_v55 = vld [vmem:[#allocation7 + $0x398] sm:$0xff] }
 0x481   : > { %v5881_v32 = vmul.f32 %v5877_v25, %v5865_v11  ;;  %v5866_v18 = vadd.f32 %v5860_v22, %v5474_v20  ;;  %v5862_v40 = vadd.f32 %v5861_v0, %v5818_v1  ;;  %v5896_v53 = vadd.f32 %v5889_v58, %v5880_v36  ;;  %v5924_v20 = vld [vmem:[#allocation7 + $0x90] sm:$0xff]  ;;  %v5925_v11 = vld [vmem:[#allocation7 + $0x98] sm:$0xff] }
 0x482   : > { %v5929_v22 = vld [vmem:[#allocation7 + $0xb8] sm:$0xff]  ;;  %v7860_v1 = vcombine.low %v5932_v23, %v5936_v44  ;;  %v7853_v0 = vcombine.high %v5924_v20, %v5928_v10  ;;  %v7949_v37 = vcombine.high %v6020_v54, %v6024_v50  ;;  %v7951_v39 = vcombine.high %v6021_v55, %v6025_v6 }
 0x483   : > { %v5882_v49 = vmul.f32 %v5873_v8, %v5866_v18  ;;  %v5867_v2 = vadd.f32 %v5862_v40, %v5475_v35  ;;  %v5897_v24 = vadd.f32 %v5893_v26, %v5881_v32  ;;  %v5900_v42 = vmax.f32 %v5896_v53, 0.0  ;;  %v5916_v32 = vld [vmem:[#allocation7 + $0x50] sm:$0xff]  ;;  %v5917_v40 = vld [vmem:[#allocation7 + $0x58] sm:$0xff] }
 0x484   : > { %v7870_v8 = vcombine.low %v5941_v3, %v5945_v5  ;;  %v7855_v35 = vcombine.high %v5925_v11, %v5929_v22  ;;  %v5920_v18 = vld [vmem:[#allocation7 + $0x70] sm:$0xff]  ;;  %v5921_v36 = vld [vmem:[#allocation7 + $0x78] sm:$0xff]  ;;  %v7950_v59 = vcombine.low %v6021_v55, %v6025_v6 }
 0x485   : > { %v5898_v9 = vadd.f32 %v5889_v58, %v5882_v49  ;;  %v5883_v31 = vmul.f32 %v5877_v25, %v5867_v2  ;;  %v5901_v21 = vmax.f32 %v5897_v24, 0.0  ;;  %v7871_v25 = vcombine.high %v5941_v3, %v5945_v5  ;;  %v5909_v53 = vld [vmem:[#allocation7 + $0x18] sm:$0xff]  ;;  %v6004_v5 = vld [vmem:[#allocation7 + $0x310] sm:$0xff] }
 0x486   : > { %v7852_v58 = vcombine.low %v5924_v20, %v5928_v10  ;;  %v7854_v49 = vcombine.low %v5925_v11, %v5929_v22  ;;  %v7845_v2 = vcombine.high %v5916_v32, %v5920_v18  ;;  %v7847_v24 = vcombine.high %v5917_v40, %v5921_v36  ;;  %v5988_v22 = vld [vmem:[#allocation7 + $0x290] sm:$0xff] }
 0x487   : > { %v5899_v43 = vadd.f32 %v5893_v26, %v5883_v31  ;;  %v5902_v13 = vmax.f32 %v5898_v9, 0.0  ;;  %v7862_v26 = vcombine.low %v5933_v28, %v5937_v62  ;;  %v5908_v9 = vld [vmem:[#allocation7 + $0x10] sm:$0xff] }
 0x488   : > { %v5912_v31 = vld [vmem:[#allocation7 + $0x30] sm:$0xff] }
 0x489   : > { %v5903_v41 = vmax.f32 %v5899_v43, 0.0  ;;  %v9849_v34 = vpack.c.bf16 %v5902_v13, %v5900_v42  ;;  %v5913_v43 = vld [vmem:[#allocation7 + $0x38] sm:$0xff]  ;;  %v7844_v13 = vcombine.low %v5916_v32, %v5920_v18  ;;  %v6028_v42 = vld [vmem:[#allocation7 + $0x3d0] sm:$0xff] }
 0x48a   : > { %v7839_v33 = vcombine.high %v5909_v53, %v5913_v43  ;;  %v7838_v29 = vcombine.low %v5909_v53, %v5913_v43  ;;  %v7956_v52 = vcombine.low %v6028_v42, %v6032_v14  ;;  %v5996_v62 = vld [vmem:[#allocation7 + $0x2d0] sm:$0xff] }
 0x48b   : > { %v5905_v47 = vpack.c.bf16 %v5903_v41, %v5901_v21  ;;  %v7846_v21 = vcombine.low %v5917_v40, %v5921_v36  ;;  %v7837_v41 = vcombine.high %v5908_v9, %v5912_v31  ;;  %v5980_v36 = vld [vmem:[#allocation7 + $0x250] sm:$0xff] }
 0x48c   : > { %v5972_v43 = vld [vmem:[#allocation7 + $0x210] sm:$0xff] }
 0x48d   : > { %6706 = vmatprep.mubr.bf16.mxu1 %v5905_v47  ;;  %6749 = vmatprep.mubr.bf16.mxu0 %v5905_v47  ;;  %v10002_v55 = vld [vmem:[#allocation25_spill] sm:$0xff] }
 0x48e   : > { %6707 = vmatmul.mubr.bf16.vlgmr.msra.gmra.mxu1 %v9849_v34  ;;  %6750 = vmatmul.mubr.bf16.vlgmr.msra.gmra.mxu0 %v9849_v34 }
 0x48f   : > { %6761 = vmatpush1.bf16.msra.mxu1 %v9997_v38  ;;  %6804 = vmatpush1.bf16.msra.mxu0 %v10000_v51  ;;  %v7958_v38 = vcombine.low %v6029_v46, %v6033_v7  ;;  %v6012_v51 = vld [vmem:[#allocation7 + $0x350] sm:$0xff] }
 0x490   : > { %6792 = vmatprep.mubr.bf16.mxu1 %v5905_v47  ;;  %6835 = vmatprep.mubr.bf16.mxu0 %v5905_v47  ;;  %v7836_v47 = vcombine.low %v5908_v9, %v5912_v31 }
 0x491   : > { %6762 = vmatprep.subr.bf16.mxu1 %v7885_v48  ;;  %6805 = vmatprep.subr.bf16.mxu0 %v7887_v15  ;;  %v7957_v48 = vcombine.high %v6028_v42, %v6032_v14  ;;  %v7959_v15 = vcombine.high %v6029_v46, %v6033_v7 }
 0x493   : > { %6763 = vmatpush1.bf16.msra.mxu1 %v7884_v61  ;;  %6806 = vmatpush1.bf16.msra.mxu0 %v7886_v60  ;;  %v6016_v61 = vld [vmem:[#allocation7 + $0x370] sm:$0xff]  ;;  %v6013_v60 = vld [vmem:[#allocation7 + $0x358] sm:$0xff] }
 0x494   : > { %6764 = vmatprep.subr.bf16.mxu1 %v7877_v56  ;;  %6807 = vmatprep.subr.bf16.mxu0 %v7879_v30  ;;  %v6017_v56 = vld [vmem:[#allocation7 + $0x378] sm:$0xff]  ;;  %v7948_v30 = vcombine.low %v6020_v54, %v6024_v50  ;;  %v7941_v63 = vcombine.high %v6012_v51, %v6016_v61 }
 0x495   : > { %v7943_v3 = vcombine.high %v6013_v60, %v6017_v56  ;;  %v7942_v23 = vcombine.low %v6013_v60, %v6017_v56  ;;  %v9864_v54 = vld [vmem:[#allocation16] sm:$0xff] }
 0x496   : > { %v6913_v56 = vrot.slane %v9864_v54, %v9993_v4 }
 0x497   : > { %6765 = vmatpush1.bf16.msra.mxu1 %v7876_v16  ;;  %6808 = vmatpush1.bf16.msra.mxu0 %v7878_v17  ;;  %v6008_v16 = vld [vmem:[#allocation7 + $0x330] sm:$0xff]  ;;  %v6005_v17 = vld [vmem:[#allocation7 + $0x318] sm:$0xff] }
 0x498   : > { %6766 = vmatprep.subr.bf16.mxu1 %v7869_v45  ;;  %6809 = vmatprep.subr.bf16.mxu0 %v7871_v25  ;;  %v6009_v45 = vld [vmem:[#allocation7 + $0x338] sm:$0xff]  ;;  %v7940_v25 = vcombine.low %v6012_v51, %v6016_v61  ;;  %v7933_v44 = vcombine.high %v6004_v5, %v6008_v16 }
 0x499   : > { %v7935_v28 = vcombine.high %v6005_v17, %v6009_v45  ;;  %v7934_v20 = vcombine.low %v6005_v17, %v6009_v45 }
 0x49b   : > { %6767 = vmatpush1.bf16.msra.mxu1 %v7868_v12  ;;  %6810 = vmatpush1.bf16.msra.mxu0 %v7870_v8  ;;  %v6000_v12 = vld [vmem:[#allocation7 + $0x2f0] sm:$0xff]  ;;  %v5997_v8 = vld [vmem:[#allocation7 + $0x2d8] sm:$0xff] }
 0x49c   : > { %6768 = vmatprep.subr.bf16.mxu1 %v7861_v19  ;;  %6811 = vmatprep.subr.bf16.mxu0 %v7863_v27  ;;  %v6001_v19 = vld [vmem:[#allocation7 + $0x2f8] sm:$0xff]  ;;  %v7932_v27 = vcombine.low %v6004_v5, %v6008_v16  ;;  %v7925_v10 = vcombine.high %v5996_v62, %v6000_v12 }
 0x49d   : > { %v7927_v11 = vcombine.high %v5997_v8, %v6001_v19  ;;  %v7926_v32 = vcombine.low %v5997_v8, %v6001_v19 }
 0x49f   : > { %6769 = vmatpush1.bf16.msra.mxu1 %v7860_v1  ;;  %6812 = vmatpush1.bf16.msra.mxu0 %v7862_v26  ;;  %v5992_v1 = vld [vmem:[#allocation7 + $0x2b0] sm:$0xff]  ;;  %v5989_v26 = vld [vmem:[#allocation7 + $0x298] sm:$0xff] }
 0x4a0   : > { %6770 = vmatprep.subr.bf16.mxu1 %v7853_v0  ;;  %6813 = vmatprep.subr.bf16.mxu0 %v7855_v35  ;;  %v5993_v0 = vld [vmem:[#allocation7 + $0x2b8] sm:$0xff]  ;;  %v7924_v35 = vcombine.low %v5996_v62, %v6000_v12  ;;  %v7917_v18 = vcombine.high %v5988_v22, %v5992_v1 }
 0x4a1   : > { %v7919_v40 = vcombine.high %v5989_v26, %v5993_v0  ;;  %v7918_v9 = vcombine.low %v5989_v26, %v5993_v0 }
 0x4a3   : > { %6771 = vmatpush1.bf16.msra.mxu1 %v7852_v58  ;;  %6814 = vmatpush1.bf16.msra.mxu0 %v7854_v49  ;;  %v5984_v58 = vld [vmem:[#allocation7 + $0x270] sm:$0xff]  ;;  %v5981_v49 = vld [vmem:[#allocation7 + $0x258] sm:$0xff] }
 0x4a4   : > { %6772 = vmatprep.subr.bf16.mxu1 %v7845_v2  ;;  %6815 = vmatprep.subr.bf16.mxu0 %v7847_v24  ;;  %v5985_v2 = vld [vmem:[#allocation7 + $0x278] sm:$0xff]  ;;  %v7916_v24 = vcombine.low %v5988_v22, %v5992_v1  ;;  %v7909_v31 = vcombine.high %v5980_v36, %v5984_v58 }
 0x4a5   : > { %v7911_v53 = vcombine.high %v5981_v49, %v5985_v2  ;;  %v7910_v42 = vcombine.low %v5981_v49, %v5985_v2  ;;  %v9088_v1 = vld [vmem:[%s9576_s28 + $0x18] sm:$0xff]  ;;  %v9090_v2 = vld [vmem:[%s9576_s28 + $0x50] sm:$0xff] }
 0x4a7   : > { %6773 = vmatpush1.bf16.msra.mxu1 %v7844_v13  ;;  %6816 = vmatpush1.bf16.msra.mxu0 %v7846_v21  ;;  %v5976_v13 = vld [vmem:[#allocation7 + $0x230] sm:$0xff]  ;;  %v5973_v21 = vld [vmem:[#allocation7 + $0x218] sm:$0xff] }
 0x4a8   : > { %6774 = vmatprep.subr.bf16.mxu1 %v7837_v41  ;;  %6817 = vmatprep.subr.bf16.mxu0 %v7839_v33  ;;  %v5977_v41 = vld [vmem:[#allocation7 + $0x238] sm:$0xff]  ;;  %v7908_v33 = vcombine.low %v5980_v36, %v5984_v58  ;;  %v7901_v14 = vcombine.high %v5972_v43, %v5976_v13  ;;  %v7900_v7 = vcombine.low %v5972_v43, %v5976_v13  ;;  %v9091_v13 = vld [vmem:[%s9576_s28 + $0x48] sm:$0xff] }
 0x4a9   : > { %v7903_v46 = vcombine.high %v5973_v21, %v5977_v41  ;;  %v9089_v58 = vld [vmem:[%s9576_s28 + $0x40] sm:$0xff] }
 0x4ab   : > { %6775 = vmatpush1.bf16.msra.mxu1 %v7836_v47  ;;  %6818 = vmatpush1.bf16.msra.mxu0 %v7838_v29  ;;  %v7902_v47 = vcombine.low %v5973_v21, %v5977_v41  ;;  %v9861_v29 = vld [vmem:[#allocation14] sm:$0xff]  ;;  %v9092_v41 = vld [vmem:[%s9576_s28 + $0x58] sm:$0xff] }
 0x4ac   : > { %6776 = vmatprep.subr.bf16.mxu1 %v7957_v48  ;;  %6819 = vmatprep.subr.bf16.mxu0 %v7959_v15  ;;  %v10001_v48 = vld [vmem:[#allocation22_spill] sm:$0xff]  ;;  %v6851_v50 = vrot.slane %v9861_v29, %v9994_v57  ;;  %v6859_v6 = vrot.slane %v9861_v29, %v10002_v55 }
 0x4ad   : > { %v6862_v15 = vsub.s32 3, %v10001_v48 }
 0x4af   : > { %6777 = vmatpush2.bf16.msra.mxu1 %v7956_v52  ;;  %6820 = vmatpush2.bf16.msra.mxu0 %v7958_v38  ;;  %v6909_v52 = vrot.slane %v9864_v54, %v9994_v57  ;;  %v6917_v38 = vrot.slane %v9864_v54, %v10002_v55  ;;  %v6921_v57 = vrot.slane %v9864_v54, %v6862_v15 }
 0x4b0   : > { %6778 = vmatprep.subr.bf16.mxu1 %v7949_v37  ;;  %6821 = vmatprep.subr.bf16.mxu0 %v7951_v39  ;;  %v6863_v37 = vrot.slane %v9861_v29, %v6862_v15  ;;  %v6878_v15 = vsub.s32 7, %v10001_v48 }
 0x4b3   : > { %6779 = vmatpush2.bf16.msra.mxu1 %v7948_v30  ;;  %6822 = vmatpush2.bf16.msra.mxu0 %v7950_v59 }
 0x4b4   : > { %6780 = vmatprep.subr.bf16.mxu1 %v7941_v63  ;;  %6823 = vmatprep.subr.bf16.mxu0 %v7943_v3 }
 0x4b7   : > { %6781 = vmatpush2.bf16.msra.mxu1 %v7940_v25  ;;  %6824 = vmatpush2.bf16.msra.mxu0 %v7942_v23  ;;  %v9085_v25 = vld [vmem:[%s9576_s28] sm:$0xff] }
 0x4b8   : > { %6782 = vmatprep.subr.bf16.mxu1 %v7933_v44  ;;  %6825 = vmatprep.subr.bf16.mxu0 %v7935_v28  ;;  %v9086_v44 = vld [vmem:[%s9576_s28 + $0x10] sm:$0xff] }
 0x4bb   : > { %6783 = vmatpush2.bf16.msra.mxu1 %v7932_v27  ;;  %6826 = vmatpush2.bf16.msra.mxu0 %v7934_v20 }
 0x4bc   : > { %6784 = vmatprep.subr.bf16.mxu1 %v7925_v10  ;;  %6827 = vmatprep.subr.bf16.mxu0 %v7927_v11  ;;  %v9087_v11 = vld [vmem:[%s9576_s28 + $0x8] sm:$0xff] }
 0x4bf   : > { %6785 = vmatpush2.bf16.msra.mxu1 %v7924_v35  ;;  %6828 = vmatpush2.bf16.msra.mxu0 %v7926_v32 }
 0x4c0   : > { %6786 = vmatprep.subr.bf16.mxu1 %v7917_v18  ;;  %6829 = vmatprep.subr.bf16.mxu0 %v7919_v40 }
 0x4c3   : > { %6787 = vmatpush2.bf16.msra.mxu1 %v7916_v24  ;;  %6830 = vmatpush2.bf16.msra.mxu0 %v7918_v9 }
 0x4c4   : > { %6788 = vmatprep.subr.bf16.mxu1 %v7909_v31  ;;  %6831 = vmatprep.subr.bf16.mxu0 %v7911_v53 }
 0x4c7   : > { %6789 = vmatpush2.bf16.msra.mxu1 %v7908_v33  ;;  %6832 = vmatpush2.bf16.msra.mxu0 %v7910_v42 }
 0x4c8   : > { %6790 = vmatprep.subr.bf16.mxu1 %v7901_v14  ;;  %6833 = vmatprep.subr.bf16.mxu0 %v7903_v46  ;;  %v6866_v46 = vsub.s32 4, %v10001_v48 }
 0x4cb   : > { %6791 = vmatpush2.bf16.msra.mxu1 %v7900_v7  ;;  %6834 = vmatpush2.bf16.msra.mxu0 %v7902_v47  ;;  %v6874_v7 = vsub.s32 6, %v10001_v48  ;;  %v6870_v47 = vsub.s32 5, %v10001_v48 }
 0x4cd   : > { %v6875_v55 = vrot.slane %v9861_v29, %v6874_v7  ;;  %v6929_v48 = vrot.slane %v9864_v54, %v6870_v47 }
 0x4ce   : > { %6793 = vmatmul.mubr.bf16.vlgmr.msra.gmra.mxu1 %v9849_v34  ;;  %6836 = vmatmul.mubr.bf16.vlgmr.msra.gmra.mxu0 %v9849_v34  ;;  %v6855_v34 = vrot.slane %v9861_v29, %v9993_v4 }
 0x54e   : > { %v6708_v39 = vpop.f32.mrf.mxu1  ;;  %v6751_v51 = vpop.f32.mrf.mxu0 }
 0x54f   : > { %v6888_v61 = vmul.f32 %v6851_v50, %v6708_v39  ;;  %v6890_v60 = vmul.f32 %v6859_v6, %v6751_v51 }
 0x550   : > { %v6710_v30 = vpop.f32.mrf.mxu1  ;;  %v6753_v59 = vpop.f32.mrf.mxu0 }
 0x551   : > { %v6946_v63 = vadd.f32 %v6909_v52, %v6888_v61  ;;  %v6948_v3 = vadd.f32 %v6917_v38, %v6890_v60  ;;  %v6889_v5 = vmul.f32 %v6855_v34, %v6710_v30  ;;  %v6891_v16 = vmul.f32 %v6863_v37, %v6753_v59 }
 0x552   : > { %v6712_v17 = vpop.f32.mrf.mxu1  ;;  %v6755_v45 = vpop.f32.mrf.mxu0  ;;  %v6937_v60 = vrot.slane %v9864_v54, %v6878_v15 }
 0x553   : > { %v6962_v23 = vadd.f32 %v9085_v25, %v6946_v63  ;;  %v6964_v28 = vadd.f32 %v9086_v44, %v6948_v3  ;;  %v6947_v62 = vadd.f32 %v6913_v56, %v6889_v5  ;;  %v6949_v12 = vadd.f32 %v6921_v57, %v6891_v16 }
 0x554   : > { %v6896_v4 = vmul.f32 %v6851_v50, %v6712_v17  ;;  %v6898_v8 = vmul.f32 %v6859_v6, %v6755_v45  ;;  %v6714_v19 = vpop.f32.mrf.mxu1  ;;  %v6757_v27 = vpop.f32.mrf.mxu0  ;;  %v6867_v50 = vrot.slane %v9861_v29, %v6866_v46  ;;  %v6925_v6 = vrot.slane %v9864_v54, %v6866_v46  ;;  %v9094_v45 = vld [vmem:[%s9576_s28 + $0x30] sm:$0xff] }
 0x555   : > { %v6978_v20 = vmax.f32 %v6962_v23, 0.0  ;;  %v6980_v10 = vmax.f32 %v6964_v28, 0.0  ;;  %v6963_v22 = vadd.f32 %v9087_v11, %v6947_v62  ;;  %v6965_v26 = vadd.f32 %v9088_v1, %v6949_v12 }
 0x556   : > { %v6954_v0 = vadd.f32 %v6909_v52, %v6896_v4  ;;  %v6956_v35 = vadd.f32 %v6917_v38, %v6898_v8  ;;  %v6897_v32 = vmul.f32 %v6855_v34, %v6714_v19  ;;  %v6899_v18 = vmul.f32 %v6863_v37, %v6757_v27  ;;  %v9095_v19 = vld [vmem:[%s9576_s28 + $0x28] sm:$0xff] }
 0x557   : > { %6994 = vst [vmem:[%s9887_s30] sm:$0xff] %v6978_v20  ;;  %6996 = vst [vmem:[%s9887_s30 + $0x10] sm:$0xff] %v6980_v10  ;;  %v6979_v40 = vmax.f32 %v6963_v22, 0.0  ;;  %v6981_v36 = vmax.f32 %v6965_v26, 0.0  ;;  %v6933_v52 = vrot.slane %v9864_v54, %v6874_v7  ;;  %v6871_v38 = vrot.slane %v9861_v29, %v6870_v47  ;;  %v9096_v20 = vld [vmem:[%s9576_s28 + $0x38] sm:$0xff] }
 0x558   : > { %v6970_v49 = vadd.f32 %v9089_v58, %v6954_v0  ;;  %v6972_v24 = vadd.f32 %v9090_v2, %v6956_v35  ;;  %v6955_v9 = vadd.f32 %v6913_v56, %v6897_v32  ;;  %v6957_v31 = vadd.f32 %v6921_v57, %v6899_v18  ;;  %v9097_v32 = vld [vmem:[%s9576_s28 + $0x60] sm:$0xff] }
 0x559   : > { %6995 = vst [vmem:[%s9887_s30 + $0x8] sm:$0xff] %v6979_v40  ;;  %6997 = vst [vmem:[%s9887_s30 + $0x18] sm:$0xff] %v6981_v36  ;;  %v6879_v34 = vrot.slane %v9861_v29, %v6878_v15  ;;  %v9093_v29 = vld [vmem:[%s9576_s28 + $0x20] sm:$0xff]  ;;  %v9098_v40 = vld [vmem:[%s9576_s28 + $0x70] sm:$0xff] }
 0x55a   : > { %v6986_v53 = vmax.f32 %v6970_v49, 0.0  ;;  %v6988_v43 = vmax.f32 %v6972_v24, 0.0  ;;  %v6971_v21 = vadd.f32 %v9091_v13, %v6955_v9  ;;  %v6973_v33 = vadd.f32 %v9092_v41, %v6957_v31  ;;  %v9099_v9 = vld [vmem:[%s9576_s28 + $0x68] sm:$0xff] }
 0x55c   : > { %7002 = vst [vmem:[%s9887_s30 + $0x40] sm:$0xff] %v6986_v53  ;;  %7004 = vst [vmem:[%s9887_s30 + $0x50] sm:$0xff] %v6988_v43  ;;  %v6987_v42 = vmax.f32 %v6971_v21, 0.0  ;;  %v6989_v14 = vmax.f32 %v6973_v33, 0.0  ;;  %v9100_v53 = vld [vmem:[%s9576_s28 + $0x78] sm:$0xff] }
 0x55e   : > { %7003 = vst [vmem:[%s9887_s30 + $0x48] sm:$0xff] %v6987_v42  ;;  %7005 = vst [vmem:[%s9887_s30 + $0x58] sm:$0xff] %v6989_v14 }
 0x58e   : > { %v6794_v37 = vpop.f32.mrf.mxu1  ;;  %v6837_v39 = vpop.f32.mrf.mxu0 }
 0x58f   : > { %v6892_v51 = vmul.f32 %v6867_v50, %v6794_v37  ;;  %v6894_v61 = vmul.f32 %v6875_v55, %v6837_v39 }
 0x590   : > { %v6796_v56 = vpop.f32.mrf.mxu1  ;;  %v6839_v57 = vpop.f32.mrf.mxu0 }
 0x591   : > { %v6950_v30 = vadd.f32 %v6925_v6, %v6892_v51  ;;  %v6952_v59 = vadd.f32 %v6933_v52, %v6894_v61  ;;  %v6893_v63 = vmul.f32 %v6871_v38, %v6796_v56  ;;  %v6895_v3 = vmul.f32 %v6879_v34, %v6839_v57 }
 0x592   : > { %v6798_v5 = vpop.f32.mrf.mxu1  ;;  %v6841_v16 = vpop.f32.mrf.mxu0 }
 0x593   : > { %v6966_v17 = vadd.f32 %v9093_v29, %v6950_v30  ;;  %v6968_v25 = vadd.f32 %v9094_v45, %v6952_v59  ;;  %v6951_v23 = vadd.f32 %v6929_v48, %v6893_v63  ;;  %v6953_v44 = vadd.f32 %v6937_v60, %v6895_v3 }
 0x594   : > { %v6900_v28 = vmul.f32 %v6867_v50, %v6798_v5  ;;  %v6902_v54 = vmul.f32 %v6875_v55, %v6841_v16  ;;  %v6800_v62 = vpop.f32.mrf.mxu1  ;;  %v6843_v12 = vpop.f32.mrf.mxu0 }
 0x595   : > { %v6982_v4 = vmax.f32 %v6966_v17, 0.0  ;;  %v6984_v8 = vmax.f32 %v6968_v25, 0.0  ;;  %v6967_v27 = vadd.f32 %v9095_v19, %v6951_v23  ;;  %v6969_v10 = vadd.f32 %v9096_v20, %v6953_v44 }
 0x596   : > { %v6958_v11 = vadd.f32 %v6925_v6, %v6900_v28  ;;  %v6960_v22 = vadd.f32 %v6933_v52, %v6902_v54  ;;  %v6901_v1 = vmul.f32 %v6871_v38, %v6800_v62  ;;  %v6903_v26 = vmul.f32 %v6879_v34, %v6843_v12 }
 0x597   : > { %6998 = vst [vmem:[%s9887_s30 + $0x20] sm:$0xff] %v6982_v4  ;;  %7000 = vst [vmem:[%s9887_s30 + $0x30] sm:$0xff] %v6984_v8  ;;  %v6983_v0 = vmax.f32 %v6967_v27, 0.0  ;;  %v6985_v35 = vmax.f32 %v6969_v10, 0.0 }
 0x598   : > { %v6974_v18 = vadd.f32 %v9097_v32, %v6958_v11  ;;  %v6976_v36 = vadd.f32 %v9098_v40, %v6960_v22  ;;  %v6959_v58 = vadd.f32 %v6929_v48, %v6901_v1  ;;  %v6961_v49 = vadd.f32 %v6937_v60, %v6903_v26 }
 0x599   : > { %6999 = vst [vmem:[%s9887_s30 + $0x28] sm:$0xff] %v6983_v0  ;;  %7001 = vst [vmem:[%s9887_s30 + $0x38] sm:$0xff] %v6985_v35 }
 0x59a   : > { %v6990_v2 = vmax.f32 %v6974_v18, 0.0  ;;  %v6992_v24 = vmax.f32 %v6976_v36, 0.0  ;;  %v6975_v31 = vadd.f32 %v9099_v9, %v6959_v58  ;;  %v6977_v43 = vadd.f32 %v9100_v53, %v6961_v49 }
 0x59c   : > { %7006 = vst [vmem:[%s9887_s30 + $0x60] sm:$0xff] %v6990_v2  ;;  %7008 = vst [vmem:[%s9887_s30 + $0x70] sm:$0xff] %v6992_v24  ;;  %v6991_v13 = vmax.f32 %v6975_v31, 0.0  ;;  %v6993_v21 = vmax.f32 %v6977_v43, 0.0 }
 0x59e   : > { %7007 = vst [vmem:[%s9887_s30 + $0x68] sm:$0xff] %v6991_v13  ;;  %7009 = vst [vmem:[%s9887_s30 + $0x78] sm:$0xff] %v6993_v21 }
 0x59f PF: > { %s25_s13 = sadd.s32 1, %s9361_s13  }
 0x5a0   : > { %p22_p4 = scmp.ge.s32.totalorder %s25_s13, 4  }
 0x5a2   :  { %24 = sbr.rel (!%p22_p4) target bundleno = 5 (0x5), region = 135 }
 0x5a7   :  { %7031 = vsyncpa [#allocation4], 1 }
 0x5a8   :  { %7033 = vsyncpa [#allocation4 + $0x1], 1 }
 0x5a9   :  { %7034 = vsyncpa [#allocation6], 1 }
 0x5aa   :  { %7035 = vsyncpa [#allocation9], 1 }
 0x5ab   :  { %7036 = vsyncpa [#allocation12], 1 }
 0x5ac   :  { %7037 = vsyncpa [#allocation15], 1 }

</bundles_post_ra>
